<compile_context>
chip_gen: v7x
topology: tpu7x:2x2x1
jax: 0.10.0
libtpu: 0.0.40
codegen_flags: <defaults>
</compile_context>

<pallas_src>
import math
import functools

import numpy as np
import jax
import jax.numpy as jnp
from jax.experimental import pallas as pl
from jax.experimental.pallas import tpu as pltpu


def _pos_embed_kernel(nm_ref, rep_ref, cumx_ref, sely_ref, selx_ref, inv_ref, phase_ref,
                      out_ref, *, num_pos_feats, normalize, scale):
    """One batch element per grid step.

    Shapes:
      nm_ref   : (1, H, W)          float32 not_mask
      rep_ref  : (W, H*W)           REP[j', i*W+j]  = (j' == j)   (column replication)
      cumx_ref : (W, H*W)           CUMX[j', i*W+j] = (j' <= j)   (running sum along W)
      sely_ref : (H, H*W)           SELY[i', i*W+j] = (i' <= i)   (running sum along H)
      selx_ref : (H, H*W)           SELX[i', i*W+j] = (i' == i)   (row selection)
      inv_ref  : (num_pos_feats, 1) 1 / dim_t  (reciprocal, channel-major)
      phase_ref: (num_pos_feats, 1) 0 or pi/2 per channel (sin(x + pi/2) == cos(x))
      out_ref  : (1, 2*num_pos_feats, H*W)   channel-major output (NCHW after free reshape)
    """
    npf = num_pos_feats
    nm = nm_ref[0]                                                           # (H, W)

    # Replicate columns / partial row-sums with the flattened pixel index on the lane axis.
    nm_rep = jnp.dot(nm, rep_ref[...], preferred_element_type=jnp.float32)   # (H, HW): nm[i', j_p]
    x_rep = jnp.dot(nm, cumx_ref[...], preferred_element_type=jnp.float32)   # (H, HW): sum_{j'<=j_p} nm[i', j']

    # y_embed / x_embed flattened to (1, HW) via masked sublane reductions.
    y_flat = jnp.sum(sely_ref[...] * nm_rep, axis=0, keepdims=True)          # (1, HW)
    x_flat = jnp.sum(selx_ref[...] * x_rep, axis=0, keepdims=True)           # (1, HW)

    if normalize:
        eps = 1e-6
        y_den = jnp.sum(nm_rep, axis=0, keepdims=True)                       # column totals per pixel
        row_tot = jnp.sum(nm, axis=1, keepdims=True)                         # (H, 1) row totals
        x_den = jnp.sum(selx_ref[...] * row_tot, axis=0, keepdims=True)      # row totals per pixel
        y_flat = y_flat / (y_den + eps) * scale
        x_flat = x_flat / (x_den + eps) * scale

    inv = inv_ref[...]       # (npf, 1)
    ph = phase_ref[...]      # (npf, 1)

    # Channel-major arguments; one sin per output element gives the interleaved sin/cos order.
    out_ref[0, 0:npf, :] = jnp.sin(y_flat * inv + ph)          # pos_y -> channels [0, npf)
    out_ref[0, npf:2 * npf, :] = jnp.sin(x_flat * inv + ph)    # pos_x -> channels [npf, 2*npf)


def position_embedding_sine(mask, *, num_pos_feats=64, temperature=10000,
                            normalize=False, scale=None):
    """mask: (B, H, W) bool. Returns (B, 2*num_pos_feats, H, W) float32 (NCHW, like PyTorch)."""
    if scale is not None and normalize is False:
        raise ValueError("normalize should be True if scale is passed")
    if scale is None:
        scale = 2 * math.pi

    B, H, W = mask.shape
    HW = H * W
    C = 2 * num_pos_feats
    not_mask = (~mask).astype(jnp.float32)

    # ---- trace-time constants (numpy); resident in VMEM across the whole grid ----
    p_i = np.arange(HW) // W                      # row index of flattened pixel p
    p_j = np.arange(HW) % W                       # col index of flattened pixel p
    rep = (np.arange(W)[:, None] == p_j[None, :]).astype(np.float32)     # (W, HW)
    cumx = (np.arange(W)[:, None] <= p_j[None, :]).astype(np.float32)    # (W, HW)
    sely = (np.arange(H)[:, None] <= p_i[None, :]).astype(np.float32)    # (H, HW)
    selx = (np.arange(H)[:, None] == p_i[None, :]).astype(np.float32)    # (H, HW)

    k = np.arange(num_pos_feats)
    inv_dim_t = (float(temperature) ** (-2.0 * (k // 2) / num_pos_feats)).astype(np.float32)
    inv_dim_t = inv_dim_t.reshape(num_pos_feats, 1)                      # (npf, 1)
    phase = ((k % 2) * (math.pi / 2.0)).astype(np.float32).reshape(num_pos_feats, 1)

    kernel = functools.partial(
        _pos_embed_kernel,
        num_pos_feats=num_pos_feats,
        normalize=normalize,
        scale=float(scale),
    )

    cost = pl.CostEstimate(
        flops=int(B * (4 * H * W * HW + 6 * C * HW)),
        transcendentals=int(B * C * HW),
        bytes_accessed=int(4 * (B * H * W + 2 * W * HW + 2 * H * HW
                                + 2 * num_pos_feats + B * C * HW)),
    )

    pos_chw = pl.pallas_call(
        kernel,
        out_shape=jax.ShapeDtypeStruct((B, C, HW), jnp.float32),
        grid_spec=pltpu.PrefetchScalarGridSpec(
            num_scalar_prefetch=0,
            grid=(B,),
            in_specs=[
                pl.BlockSpec((1, H, W), lambda b: (b, 0, 0)),            # not_mask (per batch)
                pl.BlockSpec((W, HW), lambda b: (0, 0)),                 # REP   (resident)
                pl.BlockSpec((W, HW), lambda b: (0, 0)),                 # CUMX  (resident)
                pl.BlockSpec((H, HW), lambda b: (0, 0)),                 # SELY  (resident)
                pl.BlockSpec((H, HW), lambda b: (0, 0)),                 # SELX  (resident)
                pl.BlockSpec((num_pos_feats, 1), lambda b: (0, 0)),      # 1/dim_t (resident)
                pl.BlockSpec((num_pos_feats, 1), lambda b: (0, 0)),      # phase   (resident)
            ],
            out_specs=pl.BlockSpec((1, C, HW), lambda b: (b, 0, 0)),
        ),
        compiler_params=pltpu.CompilerParams(dimension_semantics=("parallel",)),
        cost_estimate=cost,
    )(not_mask, rep, cumx, sely, selx, inv_dim_t, phase)

    # (B, C, H*W) -> (B, C, H, W): contiguous reshape, no data movement.
    return pos_chw.reshape(B, C, H, W)


def _reference(mask, *, num_pos_feats=64, temperature=10000, normalize=False, scale=None):
    """Pure-JAX transliteration of the PyTorch forward (for validation)."""
    if scale is None:
        scale = 2 * math.pi
    not_mask = (~mask).astype(jnp.float32)
    y_embed = jnp.cumsum(not_mask, axis=1)
    x_embed = jnp.cumsum(not_mask, axis=2)
    if normalize:
        eps = 1e-6
        y_embed = y_embed / (y_embed[:, -1:, :] + eps) * scale
        x_embed = x_embed / (x_embed[:, :, -1:] + eps) * scale
    dim_t = jnp.arange(num_pos_feats, dtype=jnp.float32)
    dim_t = temperature ** (2 * jnp.floor(dim_t / 2) / num_pos_feats)
    pos_x = x_embed[:, :, :, None] / dim_t
    pos_y = y_embed[:, :, :, None] / dim_t
    pos_x = jnp.stack((jnp.sin(pos_x[:, :, :, 0::2]), jnp.cos(pos_x[:, :, :, 1::2])),
                      axis=4).reshape(*pos_x.shape[:3], -1)
    pos_y = jnp.stack((jnp.sin(pos_y[:, :, :, 0::2]), jnp.cos(pos_y[:, :, :, 1::2])),
                      axis=4).reshape(*pos_y.shape[:3], -1)
    pos = jnp.concatenate((pos_y, pos_x), axis=3).transpose(0, 3, 1, 2)
    return pos


if __name__ == "__main__":
    key = jax.random.PRNGKey(0)
    kx, km = jax.random.split(key)

    B, Cx, H, W = 2, 4, 16, 16
    num_pos_feats = 64

    # x is only used by the PyTorch module for device/dtype placement; kept for shape parity.
    x = jax.random.normal(kx, (B, Cx, H, W), dtype=jnp.float32)
    mask = jax.random.bernoulli(km, p=0.2, shape=(B, H, W))  # bool padding mask

    pos = position_embedding_sine(mask, num_pos_feats=num_pos_feats)
    pos = jax.block_until_ready(pos)

    ref = _reference(mask, num_pos_feats=num_pos_feats)
    assert pos.shape == (B, 2 * num_pos_feats, H, W)
    assert pos.dtype == jnp.float32
    assert jnp.allclose(pos, ref, atol=1e-5, rtol=1e-5)

    print("KERNEL_OK")
</pallas_src>

<mosaic_0001>
module attributes {stable_mosaic.version = 11 : i64} {
  func.func @_pos_embed_kernel(%arg0: i32, %arg1: memref<1x16x16xf32, #tpu.memory_space<vmem>>, %arg2: memref<16x256xf32, #tpu.memory_space<vmem>>, %arg3: memref<16x256xf32, #tpu.memory_space<vmem>>, %arg4: memref<16x256xf32, #tpu.memory_space<vmem>>, %arg5: memref<16x256xf32, #tpu.memory_space<vmem>>, %arg6: memref<64x1xf32, #tpu.memory_space<vmem>>, %arg7: memref<64x1xf32, #tpu.memory_space<vmem>>, %arg8: memref<1x128x256xf32, #tpu.memory_space<vmem>>) attributes {dimension_semantics = [#tpu.dimension_semantics<parallel>], iteration_bounds = array<i64: 2>, scalar_prefetch = 0 : i64, scratch_operands = 0 : i64, tpu.core_type = #tpu.core_type<tc>, window_params = [{transform_indices = @transform_0, window_bounds = array<i64: 1, 16, 16>}, {pipeline_mode = #tpu.pipeline_mode<synchronous>, transform_indices = @transform_1, window_bounds = array<i64: 16, 256>}, {pipeline_mode = #tpu.pipeline_mode<synchronous>, transform_indices = @transform_2, window_bounds = array<i64: 16, 256>}, {pipeline_mode = #tpu.pipeline_mode<synchronous>, transform_indices = @transform_3, window_bounds = array<i64: 16, 256>}, {pipeline_mode = #tpu.pipeline_mode<synchronous>, transform_indices = @transform_4, window_bounds = array<i64: 16, 256>}, {pipeline_mode = #tpu.pipeline_mode<synchronous>, transform_indices = @transform_5, window_bounds = array<i64: 64, 1>}, {pipeline_mode = #tpu.pipeline_mode<synchronous>, transform_indices = @transform_6, window_bounds = array<i64: 64, 1>}, {transform_indices = @transform_7, window_bounds = array<i64: 1, 128, 256>}]} {
    %c0 = arith.constant 0 : index
    %c0_0 = arith.constant 0 : index
    %c0_1 = arith.constant 0 : index
    %0 = vector.load %arg1[%c0, %c0_0, %c0_1] : memref<1x16x16xf32, #tpu.memory_space<vmem>>, vector<1x16x16xf32>
    %1 = vector.shape_cast %0 : vector<1x16x16xf32> to vector<16x16xf32>
    %c0_2 = arith.constant 0 : index
    %c0_3 = arith.constant 0 : index
    %2 = vector.load %arg2[%c0_2, %c0_3] : memref<16x256xf32, #tpu.memory_space<vmem>>, vector<16x256xf32>
    %cst = arith.constant dense<0.000000e+00> : vector<16x256xf32>
    %3 = tpu.matmul %1, %2, %cst {dimension_numbers = #tpu.dot_dimension_numbers<[1], [0], [0], [1], [0, 0, 1, 1], [], []>} : vector<16x16xf32>, vector<16x256xf32>, vector<16x256xf32> -> vector<16x256xf32>
    %c0_4 = arith.constant 0 : index
    %c0_5 = arith.constant 0 : index
    %4 = vector.load %arg3[%c0_4, %c0_5] : memref<16x256xf32, #tpu.memory_space<vmem>>, vector<16x256xf32>
    %cst_6 = arith.constant dense<0.000000e+00> : vector<16x256xf32>
    %5 = tpu.matmul %1, %4, %cst_6 {dimension_numbers = #tpu.dot_dimension_numbers<[1], [0], [0], [1], [0, 0, 1, 1], [], []>} : vector<16x16xf32>, vector<16x256xf32>, vector<16x256xf32> -> vector<16x256xf32>
    %c0_7 = arith.constant 0 : index
    %c0_8 = arith.constant 0 : index
    %6 = vector.load %arg4[%c0_7, %c0_8] : memref<16x256xf32, #tpu.memory_space<vmem>>, vector<16x256xf32>
    %7 = arith.mulf %6, %3 : vector<16x256xf32>
    %cst_9 = arith.constant dense<0.000000e+00> : vector<256xf32>
    %8 = vector.multi_reduction <add>, %7, %cst_9 [0] : vector<16x256xf32> to vector<256xf32>
    %9 = vector.shape_cast %8 : vector<256xf32> to vector<1x256xf32>
    %c0_10 = arith.constant 0 : index
    %c0_11 = arith.constant 0 : index
    %10 = vector.load %arg5[%c0_10, %c0_11] : memref<16x256xf32, #tpu.memory_space<vmem>>, vector<16x256xf32>
    %11 = arith.mulf %10, %5 : vector<16x256xf32>
    %cst_12 = arith.constant dense<0.000000e+00> : vector<256xf32>
    %12 = vector.multi_reduction <add>, %11, %cst_12 [0] : vector<16x256xf32> to vector<256xf32>
    %13 = vector.shape_cast %12 : vector<256xf32> to vector<1x256xf32>
    %c0_13 = arith.constant 0 : index
    %c0_14 = arith.constant 0 : index
    %14 = vector.load %arg6[%c0_13, %c0_14] : memref<64x1xf32, #tpu.memory_space<vmem>>, vector<64x1xf32>
    %c0_15 = arith.constant 0 : index
    %c0_16 = arith.constant 0 : index
    %15 = vector.load %arg7[%c0_15, %c0_16] : memref<64x1xf32, #tpu.memory_space<vmem>>, vector<64x1xf32>
    %16 = vector.broadcast %9 : vector<1x256xf32> to vector<64x256xf32>
    %17 = vector.broadcast %14 : vector<64x1xf32> to vector<64x256xf32>
    %18 = arith.mulf %16, %17 : vector<64x256xf32>
    %19 = vector.broadcast %15 : vector<64x1xf32> to vector<64x256xf32>
    %20 = arith.addf %18, %19 : vector<64x256xf32>
    %21 = math.sin %20 : vector<64x256xf32>
    %c0_17 = arith.constant 0 : index
    %c0_18 = arith.constant 0 : index
    %c0_19 = arith.constant 0 : index
    %22 = vector.load %arg8[%c0_17, %c0_18, %c0_19] : memref<1x128x256xf32, #tpu.memory_space<vmem>>, vector<1x64x256xf32>
    %23 = vector.shape_cast %22 : vector<1x64x256xf32> to vector<64x256xf32>
    %24 = vector.shape_cast %21 : vector<64x256xf32> to vector<1x64x256xf32>
    tpu.vector_store %arg8[%c0_17, %c0_18, %c0_19], %24 {strides = array<i32>} : memref<1x128x256xf32, #tpu.memory_space<vmem>>, vector<1x64x256xf32>,
    %25 = vector.broadcast %13 : vector<1x256xf32> to vector<64x256xf32>
    %26 = vector.broadcast %14 : vector<64x1xf32> to vector<64x256xf32>
    %27 = arith.mulf %25, %26 : vector<64x256xf32>
    %28 = vector.broadcast %15 : vector<64x1xf32> to vector<64x256xf32>
    %29 = arith.addf %27, %28 : vector<64x256xf32>
    %30 = math.sin %29 : vector<64x256xf32>
    %c0_20 = arith.constant 0 : index
    %c64 = arith.constant 64 : index
    %c0_21 = arith.constant 0 : index
    %31 = vector.load %arg8[%c0_20, %c64, %c0_21] : memref<1x128x256xf32, #tpu.memory_space<vmem>>, vector<1x64x256xf32>
    %32 = vector.shape_cast %31 : vector<1x64x256xf32> to vector<64x256xf32>
    %33 = vector.shape_cast %30 : vector<64x256xf32> to vector<1x64x256xf32>
    tpu.vector_store %arg8[%c0_20, %c64, %c0_21], %33 {strides = array<i32>} : memref<1x128x256xf32, #tpu.memory_space<vmem>>, vector<1x64x256xf32>,
    return
  }
  func.func @transform_0(%arg0: i32) -> (i32, i32, i32) {
    %c0_i32 = arith.constant 0 : i32
    %c0_i32_0 = arith.constant 0 : i32
    %c0_i32_1 = arith.constant 0 : i32
    return %arg0, %c0_i32, %c0_i32_0 : i32, i32, i32
  }
  func.func @transform_1(%arg0: i32) -> (i32, i32) {
    %c0_i32 = arith.constant 0 : i32
    %c0_i32_0 = arith.constant 0 : i32
    %c0_i32_1 = arith.constant 0 : i32
    return %c0_i32, %c0_i32_0 : i32, i32
  }
  func.func @transform_2(%arg0: i32) -> (i32, i32) {
    %c0_i32 = arith.constant 0 : i32
    %c0_i32_0 = arith.constant 0 : i32
    %c0_i32_1 = arith.constant 0 : i32
    return %c0_i32, %c0_i32_0 : i32, i32
  }
  func.func @transform_3(%arg0: i32) -> (i32, i32) {
    %c0_i32 = arith.constant 0 : i32
    %c0_i32_0 = arith.constant 0 : i32
    %c0_i32_1 = arith.constant 0 : i32
    return %c0_i32, %c0_i32_0 : i32, i32
  }
  func.func @transform_4(%arg0: i32) -> (i32, i32) {
    %c0_i32 = arith.constant 0 : i32
    %c0_i32_0 = arith.constant 0 : i32
    %c0_i32_1 = arith.constant 0 : i32
    return %c0_i32, %c0_i32_0 : i32, i32
  }
  func.func @transform_5(%arg0: i32) -> (i32, i32) {
    %c0_i32 = arith.constant 0 : i32
    %c0_i32_0 = arith.constant 0 : i32
    %c0_i32_1 = arith.constant 0 : i32
    return %c0_i32, %c0_i32_0 : i32, i32
  }
  func.func @transform_6(%arg0: i32) -> (i32, i32) {
    %c0_i32 = arith.constant 0 : i32
    %c0_i32_0 = arith.constant 0 : i32
    %c0_i32_1 = arith.constant 0 : i32
    return %c0_i32, %c0_i32_0 : i32, i32
  }
  func.func @transform_7(%arg0: i32) -> (i32, i32, i32) {
    %c0_i32 = arith.constant 0 : i32
    %c0_i32_0 = arith.constant 0 : i32
    %c0_i32_1 = arith.constant 0 : i32
    return %arg0, %c0_i32, %c0_i32_0 : i32, i32, i32
  }
}

</mosaic_0001>

<bundles_post_ra>
// kernel: tpu_custom_call.1
= control target key start
LH: loop header
LB: loop body
LE: loop exit
PB: predicated region body
PF: predicated region fallthrough
CT: control target
= control target key end

     0   :  { %12 = vsyncpa [#allocation3], 0  ;;  %s7707_s0 = inlined_call_operand.vmem [shape: f32[2,16,16], index: 0, kind: input, shape index: {}]   ;;  %s7708_s1 = inlined_call_operand.vmem [shape: f32[16,256], index: 1, kind: input, shape index: {}]   ;;  %s7709_s2 = inlined_call_operand.vmem [shape: f32[16,256], index: 2, kind: input, shape index: {}]   ;;  %s7710_s3 = inlined_call_operand.vmem [shape: f32[16,256], index: 3, kind: input, shape index: {}]   ;;  %s7711_s4 = inlined_call_operand.hbm [shape: f32[16,256], index: 4, kind: input, shape index: {}]   ;;  %s7712_s5 = inlined_call_operand.vmem [shape: f32[64,1], index: 5, kind: input, shape index: {}]   ;;  %s7713_s6 = inlined_call_operand.vmem [shape: f32[64,1], index: 6, kind: input, shape index: {}]   ;;  %s7714_s7 = inlined_call_operand.hbm [shape: f32[2,128,256], index: 7, kind: output, shape index: {}]  }
   0x1   :  { %13 = vsyncpa [#allocation4], 0 }
   0x2   :  { %15 = vsyncpa [#allocation4 + $0x1], 0  ;;  %s4741_s24 = smov 0   ;;  %s4743_s25 = smov 0  }
   0x3   :  { %s4745_s26 = smov 0   ;;  %s4747_s27 = smov 0  }
   0x4 LB: > { %s4762_s28 = sadd.s32 4294967295, %s4685_s27   ;;  %s4115_s29 = sadd.s32 4294967294, %s4685_s27   ;;  %s4685_s27 = sphi %s4747_s27, %s7853_s27   ;;  %s4681_s26 = sphi %s4745_s26, %s7852_s26   ;;  %s4677_s25 = sphi %s4743_s25, %s7851_s25   ;;  %s4673_s24 = sphi %s4741_s24, %s7850_s24  }
   0x5   : > { %s4766_s30 = sadd.s32 1, %s4685_s27   ;;  %s180_s8 = sadd.s32 1, %s4681_s26 }
   0x6   : > { %s177_s9 = ssub.s32 %s4685_s27, %s4766_s30  ;;  %p190_p0 = scmp.ne.s32.totalorder %s4681_s26, %s4677_s25 }
   0x7   : > { %p178_p1 = scmp.eq.s32.totalorder %s177_s9, 0  ;;  %p191_p2 = scmp.eq.s32.totalorder %s4762_s28, 1 }
   0x8   : > { %p196_p3 = scmp.ne.s32.totalorder %s4677_s25, %s4673_s24  ;;  %p197_p4 = scmp.eq.s32.totalorder %s4115_s29, 1 }
   0x9   : > { %s4777_s10 = scalar_select %p178_p1, %s4681_s26, %s180_s8  }
   0xa   : > { %p4779_p5 = por %p191_p2, %p190_p0  ;;  %p4783_p6 = por %p197_p4, %p196_p3 }
   0xb   : > { %p4116_p7 = scmp.ge.s32.totalorder %s4685_s27, 1  ;;  %p204_p8 = scmp.lt.s32.totalorder %s4685_s27, 3 }
   0xc   : > { %s7748_s11 = scalar_select %p4779_p5, 1, 0 }
   0xd   : > { %s7749_s12 = scalar_select %p4783_p6, 1, 0 }
   0xe   : > { %p7715_p9 = scmp.eq.s32.totalorder %s4762_s28, 0  ;;  %p4790_p10 = pnand %p4116_p7, %p204_p8 }
   0xf   : > { %s4687_s14 = smov [#allocation2]   ;;  %s4591_s19 = scalar_lea.hbm %s7711_s4, 512 }
  0x10   : > { %s7750_s13 = scalar_select %p4790_p10, 1, 0 }
  0x11   : > { %s225_s15 = sshll.u32 %s4687_s14, 4  ;;  %p4405_p11 = pneg %p4790_p10  ;;  %s226_s15 = int_to_ptr.vmem [resolvable:$true] %s225_s15 }
  0x12   : > { %p4592_p13 = scmp.ne.s32.totalorder %s7711_s4, %s4591_s19  ;;  %p4598_p3 = scmp.lt.u32.totalorder %s4591_s19, %s7711_s4 }
  0x13   : > { %p4798_p12 = pnand %p7715_p9, %p4405_p11 }
  0x15   : > { %p4593_p0 = pneg %p4798_p12 }
  0x17   : > { %p4594_p1 = pnand %p4593_p0, %p4592_p13 }
  0x19   : > { %p4595_p2 = pneg %p4594_p1 }
  0x1b   : > { %p4600_p4 = pnand %p4598_p3, %p4595_p2 }
  0x1d   : > { %4603 = shalt.err (!%p4600_p4)
}
  0x1e   : > { %s4604_s29 = scalar_lea.vmem %s226_s15, 512  ;;  %p4612_p9 = scmp.lt.s32.totalorder %s226_s15, %s226_s15 }
  0x1f   : > { %p4605_p7 = scmp.ne.s32.totalorder %s226_s15, %s4604_s29  ;;  %p4613_p6 = scmp.lt.s32.totalorder %s4604_s29, %s4604_s29 }
  0x21   : > { %p4607_p8 = pnand %p4605_p7, %p4593_p0  ;;  %p4614_p5 = por %p4613_p6, %p4612_p9 }
  0x23   : > { %p4608_p11 = pneg %p4607_p8 }
  0x25   : > { %p4615_p10 = pnand %p4614_p5, %p4608_p11 }
  0x27   : > { %4618 = shalt.err (!%p4615_p10)
}
  0x28   : > { %s4688_s8 = smov 256   ;;  %s4689_s9 = smov 16  }
  0x29   : > { %4408 = dma.hbm_to_vmem [thread:$0]  (!%p4798_p12), %s7711_s4, 512, %s226_s15, [#allocation3], %s4688_s8, %s4688_s8, %s4689_s9  }
  0x2a   : > { %p7752_p13 = scmp.ne.s32.totalorder %s7750_s13, 0 }
  0x2c   : > { %255 = sbr.rel (%p7752_p13) target bundleno = 1159 (0x487), region = 48 }
  0x33   : > { %p7753_p1 = scmp.eq.s32.totalorder %s4762_s28, 0 }
  0x35   : > { %4664 = dma.done.wait (%p7753_p1), [#allocation3], 512   ;;  %p7754_p0 = pmov %p7753_p1 }
  0x36   : > { %p287_p5 = scmp.lt.s32.totalorder %s4762_s28, 1  ;;  %v4690_v0 = vmov 0.0   ;;  %v4691_v1 = vmov 0   ;;  %v295_v2 = vld [vmem:[%s7708_s1 + $0x8] sm:$0xff]  ;;  %v297_v3 = vld [vmem:[%s7708_s1 + $0x18] sm:$0xff]  ;;  %v294_v7 = vld [vmem:[%s7708_s1] sm:$0xff] }
  0x37   : > { %4666 = vsyncadd (%p7754_p0), [#allocation3], 4294966784  ;;  %369 = vmatprep.mubr.f32.mxu0 %v4690_v0  ;;  %450 = vmatprep.mubr.f32.mxu1 %v4690_v0  ;;  %v383_v4 = vld [vmem:[%s7709_s2 + $0x8] sm:$0xff]  ;;  %v4263_v5 = vpack.c.bf16 %v297_v3, %v295_v2  ;;  %v385_v6 = vld [vmem:[%s7709_s2 + $0x18] sm:$0xff]  ;;  %vm298_vm0 = vcmask 130048   ;;  %s284_s18 = sand.u32 1, %s4677_s25  }
  0x38   : > { %s288_s16 = scalar_select %p287_p5, %s4762_s28, 1  ;;  %4462 = vset.pattern.permute.xlu1 %v4691_v1  ;;  %4461 = vset.pattern.permute.xlu0 %v4691_v1  ;;  %v296_v8 = vld [vmem:[%s7708_s1 + $0x10] sm:$0xff]  ;;  %v4267_v9 = vpack.c.bf16 %v385_v6, %v383_v4  ;;  %v382_v11 = vld [vmem:[%s7709_s2] sm:$0xff]  ;;  %v510_v17 = vld [vmem:[%s7712_s5 + $0x18] sm:$0xff] }
  0x39   : > { %v4265_v10 = vpack.c.bf16 %v296_v8, %v294_v7  ;;  %v384_v12 = vld [vmem:[%s7709_s2 + $0x10] sm:$0xff]  ;;  %4264 = vmatprep.subr.bf16.mxu0 %v4263_v5  ;;  %v507_v15 = vld [vmem:[%s7712_s5] sm:$0xff]  ;;  %v508_v18 = vld [vmem:[%s7712_s5 + $0x8] sm:$0xff]  ;;  %s5256_s19 = sshll.u32 %s284_s18, 8  ;;  %s4262_s29 = sshll.u32 %s4762_s28, 12 }
  0x3a   : > { %s4261_s15 = sshll.u32 %s288_s16, 4  ;;  %v4269_v13 = vpack.c.bf16 %v384_v12, %v382_v11  ;;  %v509_v14 = vld [vmem:[%s7712_s5 + $0x10] sm:$0xff]  ;;  %4268 = vmatprep.subr.bf16.mxu1 %v4267_v9  ;;  %525 = vperm.xlu0 %4461, %v507_v15   ;;  %v512_v20 = vld [vmem:[%s7712_s5 + $0x28] sm:$0xff]  ;;  %v511_v21 = vld [vmem:[%s7712_s5 + $0x20] sm:$0xff]  ;;  %s5295_s20 = scalar_lea.vmem [#allocation5], %s5256_s19 }
  0x3b   : > { %s291_s13 = scalar_lea.vmem %s7707_s0, %s4261_s15  ;;  %4266 = vmatpush1.bf16.msra.mxu0 %v4265_v10  ;;  %535 = vperm.xlu1 %4462, %v509_v14   ;;  %v514_v22 = vld [vmem:[%s7712_s5 + $0x38] sm:$0xff]  ;;  %v513_v23 = vld [vmem:[%s7712_s5 + $0x30] sm:$0xff]  ;;  %v516_v24 = vld [vmem:[%s7713_s6 + $0x8] sm:$0xff]  ;;  %s4041_s8 = sshll.u32 %s5295_s20, 4  ;;  %s7660_s8 = int_to_ptr.vmem [resolvable:$true] %s4041_s8 }
  0x3c   : > { %v292_v16 = vld [vmem:[%s291_s13] sm:$0xff]  ;;  %4270 = vmatpush1.bf16.msra.mxu1 %v4269_v13  ;;  %v293_v19 = vld [vmem:[%s291_s13 + $0x8] sm:$0xff]  ;;  %v518_v26 = vld [vmem:[%s7713_s6 + $0x18] sm:$0xff]  ;;  %s7658_s14 = scalar_lea.hbm %s7714_s7, %s4262_s29  ;;  %s7666_s28 = scalar_lea.sflag [#allocation4], %s284_s18 }
  0x3d   : > { %v515_v25 = vld [vmem:[%s7713_s6] sm:$0xff]  ;;  %v517_v27 = vld [vmem:[%s7713_s6 + $0x10] sm:$0xff]  ;;  %v520_v28 = vld [vmem:[%s7713_s6 + $0x28] sm:$0xff]  ;;  %s4619_s17 = scalar_lea.vmem %s7660_s8, 4096  ;;  %p7848_p9 = scmp.ne.s32.totalorder %s7748_s11, 0 }
  0x3e   : > { %4124 = vmatmul.mubr.msk.f32.vlgmr.msra.gmra.mrb[0].mxu0 %vm298_vm0, %v292_v16  ;;  %530 = vperm.xlu0 %4461, %v508_v18   ;;  %v519_v29 = vld [vmem:[%s7713_s6 + $0x20] sm:$0xff]  ;;  %v522_v30 = vld [vmem:[%s7713_s6 + $0x38] sm:$0xff]  ;;  %v521_v31 = vld [vmem:[%s7713_s6 + $0x30] sm:$0xff]  ;;  %p4620_p6 = scmp.ne.s32.totalorder %s7660_s8, %s4619_s17  ;;  %s4698_s16 = smov [#allocation5]  }
  0x3f   : > { %4126 = vmatmul.mubr.msk.f32.vlgmr.msra.gmra.mrb[0].mxu1 %vm298_vm0, %v292_v16  ;;  %375 = vmatprep.mubr.f32.mxu0 %v4690_v0  ;;  %v463_v38 = vld [vmem:[%s7710_s3] sm:$0xff]  ;;  %v465_v40 = vld [vmem:[%s7710_s3 + $0x10] sm:$0xff]  ;;  %s4623_s19 = sshll.u32 %s4698_s16, 4  ;;  %s4624_s19 = int_to_ptr.vmem [resolvable:$false] %s4623_s19 }
  0x40   : > { %456 = vmatprep.mubr.f32.mxu1 %v4690_v0  ;;  %540 = vperm.xlu1 %4462, %v510_v17   ;;  %p4621_p10 = pnand %p4620_p6, %p7848_p9  ;;  %s4625_s21 = scalar_lea.vmem %s4624_s19, 8192 }
  0x41   : > { %p4626_p2 = scmp.lt.s32.totalorder %s7660_s8, %s4624_s19  ;;  %p4627_p3 = scmp.lt.s32.totalorder %s4625_s21, %s4619_s17 }
  0x42   : > { %4125 = vmatmul.mubr.msk.f32.gmra.mrb[2].mxu0 %vm298_vm0, %v293_v19  ;;  %545 = vperm.xlu0 %4461, %v511_v21   ;;  %p4622_p12 = pneg %p4621_p10 }
  0x43   : > { %4127 = vmatmul.mubr.msk.f32.gmra.mrb[2].mxu1 %vm298_vm0, %v293_v19  ;;  %p4628_p4 = por %p4627_p3, %p4626_p2 }
  0x44   : > { %550 = vperm.xlu1 %4462, %v512_v20  }
  0x45   : > { %p4629_p7 = pnand %p4628_p4, %p4622_p12 }
  0x46   : > { %555 = vperm.xlu0 %4461, %v513_v23  }
  0x48   : > { %560 = vperm.xlu1 %4462, %v514_v22  }
  0x4a   : > { %581 = vperm.xlu0 %4461, %v515_v25  }
  0x4c   : > { %586 = vperm.xlu1 %4462, %v516_v24  }
  0x4e   : > { %591 = vperm.xlu0 %4461, %v517_v27  }
  0x50   : > { %596 = vperm.xlu1 %4462, %v518_v26  }
  0x52   : > { %601 = vperm.xlu0 %4461, %v519_v29  }
  0x54   : > { %606 = vperm.xlu1 %4462, %v520_v28  }
  0x56   : > { %611 = vperm.xlu0 %4461, %v521_v31  }
  0x58   : > { %616 = vperm.xlu1 %4462, %v522_v30  }
  0xb9   : > { %v4905_v32 = vpop.permute.xlu0 %525 }
  0xba   : > { %v4907_v33 = vpop.permute.xlu1 %535 }
  0xbd   : > { %v4909_v34 = vpop.permute.xlu0 %530 }
  0xbf   : > { %v4923_v41 = vpop.permute.xlu1 %540 }
  0xc0   : > { %7756 = vst [vmem:[#allocation9_spill] sm:$0xff] %v4923_v41 }
  0xc1   : > { %v4925_v43 = vpop.permute.xlu0 %545 }
  0xc2   : > { %7757 = vst [vmem:[#allocation10_spill] sm:$0xff] %v4925_v43 }
  0xc3   : > { %v4927_v48 = vpop.permute.xlu1 %550 }
  0xc4   : > { %7758 = vst [vmem:[#allocation11_spill] sm:$0xff] %v4927_v48 }
  0xc5   : > { %v4929_v49 = vpop.permute.xlu0 %555 }
  0xc6   : > { %7759 = vst [vmem:[#allocation12_spill] sm:$0xff] %v4929_v49 }
  0xc7   : > { %v4931_v53 = vpop.permute.xlu1 %560 }
  0xc9   : > { %v4933_v54 = vpop.permute.xlu0 %581 }
  0xcb   : > { %v4943_v60 = vpop.permute.xlu1 %586 }
  0xcd   : > { %v4945_v61 = vpop.permute.xlu0 %591 }
  0xcf   : > { %v4967_v12 = vpop.permute.xlu1 %596 }
  0xd0   : > { %7760 = vst [vmem:[#allocation13_spill] sm:$0xff] %v4967_v12 }
 0x111   : > { %v371_v35 = vpop.f32.mrb[0].mxu0 }
 0x112   : > { %v4911_v36 = vpop.f32.mrb[0].mxu1  ;;  %v4913_v37 = vpop.f32.mrb[1].mxu0  ;;  %v467_v44 = vmul.f32 %v463_v38, %v371_v35  ;;  %v7731_v38 = vmov 683565275  }
 0x113   : > { %v4918_v39 = vpop.f32.mrb[1].mxu1 }
 0x114   : > { %7755 = vst [vmem:[#allocation8_spill] sm:$0xff] %v4918_v39 }
 0x115   : > { %v377_v42 = vpop.f32.mrb[2].mxu0 }
 0x116   : > { %v469_v45 = vmul.f32 %v465_v40, %v377_v42  ;;  %v4984_v31 = vpop.f32.mrb[2].mxu1 }
 0x118   : > { %v471_v46 = vadd.f32 %v469_v45, %v467_v44  ;;  %v7722_v45 = vmov 2475754826  }
 0x11a   : > { %v472_v47 = vrot.slane %v471_v46, 4 }
 0x11c   : > { %v473_v50 = vadd.f32 %v472_v47, %v471_v46  ;;  %v7720_v47 = vmov 2131351028  }
 0x11e   : > { %v474_v51 = vrot.slane %v473_v50, 2 }
 0x120   : > { %v475_v52 = vadd.f32 %v474_v51, %v473_v50  ;;  %v7729_v51 = vmov 2102212464  }
 0x122   : > { %v476_v55 = vrot.slane %v475_v52, 1 }
 0x124   : > { %v4935_v56 = vadd.f32 %v476_v55, %v475_v52  ;;  %v4696_v55 = vmov 920167782  }
 0x126   : > { %v563_v57 = vmul.f32 %v4905_v32, %v4935_v56  ;;  %v565_v58 = vmul.f32 %v4909_v34, %v4935_v56  ;;  %v567_v59 = vmul.f32 %v4907_v33, %v4935_v56  ;;  %v569_v5 = vmul.f32 %v4923_v41, %v4935_v56 }
 0x128   : > { %v4948_v62 = vadd.f32 %v4933_v54, %v563_v57  ;;  %v4951_v63 = vadd.f32 %v4943_v60, %v565_v58  ;;  %v4954_v0 = vadd.f32 %v4945_v61, %v567_v59  ;;  %v4970_v15 = vadd.f32 %v4967_v12, %v569_v5 }
 0x12a   : > { %v635_v1 = vand.u32 2147483647, %v4948_v62  ;;  %v638_v2 = vand.u32 2139095040, %v4948_v62  ;;  %v843_v3 = vand.u32 2147483647, %v4951_v63  ;;  %v846_v4 = vand.u32 2139095040, %v4951_v63 }
 0x12b   : > { %v1054_v10 = vand.u32 2139095040, %v4954_v0  ;;  %v7719_v20 = vand.u32 2147483647, %v4954_v0  ;;  %v1262_v30 = vand.u32 2139095040, %v4970_v15  ;;  %vm637_vm14 = vcmp.lt.s32.totalorder %v4948_v62, 0 }
 0x12c   : > { %v639_v6 = vshrl.u32 %v638_v2, 23  ;;  %v642_v7 = vand.u32 8388607, %v635_v1  ;;  %v847_v8 = vshrl.u32 %v846_v4, 23  ;;  %v850_v9 = vand.u32 8388607, %v843_v3 }
 0x12d   : > { %v1055_v14 = vshrl.u32 %v1054_v10, 23  ;;  %v4979_v28 = vand.u32 8388607, %v7719_v20  ;;  %vm5079_vm15 = vcmp.le.f32.partialorder %v635_v1, 0.7853982 }
 0x12e   : > { %v4128_v11 = vadd.s32 4294967169, %v639_v6  ;;  %v4136_v13 = vadd.s32 4294967169, %v847_v8  ;;  %v643_v16 = vor.u32 8388608, %v642_v7  ;;  %v851_v18 = vor.u32 8388608, %v850_v9 }
 0x12f   : > { %v4144_v21 = vadd.s32 4294967169, %v1055_v14  ;;  %v7724_v6 = vmov 1326507024  }
 0x130   : > { %v645_v17 = vadd.s32 1, %v4128_v11  ;;  %v853_v19 = vadd.s32 1, %v4136_v13  ;;  %v4973_v25 = vshll.u32 %v643_v16, 8  ;;  %v4975_v27 = vshll.u32 %v851_v18, 8 }
 0x131   : > { %v4981_v29 = vadd.s32 1, %v4144_v21 }
 0x132   : > { %vm646_vm1 = vcmp.gt.s32.totalorder %v645_v17, 0  ;;  %vm854_vm2 = vcmp.gt.s32.totalorder %v853_v19, 0 }
 0x133   : > { %v647_v22 = vsel %vm646_vm1, %v645_v17, 0  ;;  %v855_v26 = vsel %vm854_vm2, %v853_v19, 0  ;;  %vm1062_vm7 = vcmp.gt.s32.totalorder %v4981_v29, 0 }
 0x134   : > { %v648_v23 = vshrl.u32 %v647_v22, 5  ;;  %v649_v24 = vand.u32 31, %v647_v22  ;;  %v4987_v42 = vshrl.u32 %v855_v26, 5  ;;  %v857_v44 = vand.u32 31, %v855_v26 }
 0x136   : > { %v650_v35 = vsub.s32 32, %v649_v24  ;;  %v652_v40 = vshll.u32 %v7731_v38, %v649_v24  ;;  %v655_v46 = vshll.u32 %v7722_v45, %v649_v24  ;;  %v658_v50 = vshll.u32 %v7720_v47, %v649_v24 }
 0x137   : > { %v661_v52 = vshll.u32 %v7729_v51, %v649_v24  ;;  %v664_v57 = vshll.u32 %v4696_v55, %v649_v24  ;;  %vm667_vm3 = vcmp.lt.s32.totalorder %v648_v23, 1  ;;  %vm668_vm4 = vcmp.lt.s32.totalorder %v648_v23, 2 }
 0x138   : > { %v653_v58 = vshrl.u32 %v7722_v45, %v650_v35  ;;  %v656_v59 = vshrl.u32 %v7720_v47, %v650_v35  ;;  %v659_v2 = vshrl.u32 %v7729_v51, %v650_v35  ;;  %v651_v4 = vshrl.u32 %v7731_v38, %v650_v35 }
 0x139   : > { %v662_v5 = vshrl.u32 %v4696_v55, %v650_v35  ;;  %v665_v7 = vshrl.u32 %v7724_v6, %v650_v35  ;;  %v858_v11 = vsub.s32 32, %v857_v44  ;;  %vm669_vm5 = vcmp.lt.s32.totalorder %v648_v23, 3 }
 0x13a   : > { %v654_v8 = vor.u32 %v653_v58, %v652_v40  ;;  %v657_v9 = vor.u32 %v656_v59, %v655_v46  ;;  %v660_v10 = vor.u32 %v659_v2, %v658_v50  ;;  %vm670_vm6 = vcmp.lt.s32.totalorder %v648_v23, 4 }
 0x13b   : > { %v663_v13 = vor.u32 %v662_v5, %v661_v52  ;;  %v666_v14 = vor.u32 %v665_v7, %v664_v57  ;;  %v860_v26 = vshll.u32 %v7731_v38, %v857_v44  ;;  %v861_v46 = vshrl.u32 %v7722_v45, %v858_v11 }
 0x13c   : > { %v671_v16 = vsel %vm667_vm3, %v651_v4, %v654_v8  ;;  %v672_v17 = vsel %vm670_vm6, %v660_v10, 2102212464  ;;  %v675_v18 = vsel %vm667_vm3, %v654_v8, %v657_v9  ;;  %v679_v19 = vsel %vm667_vm3, %v657_v9, %v660_v10 }
 0x13d   : > { %v673_v21 = vsel %vm669_vm5, %v657_v9, %v672_v17  ;;  %v676_v22 = vsel %vm670_vm6, %v663_v13, 920167782  ;;  %v680_v24 = vsel %vm670_vm6, %v666_v14, 1326507024  ;;  %v863_v50 = vshll.u32 %v7722_v45, %v857_v44 }
 0x13e   : > { %v677_v35 = vsel %vm669_vm5, %v660_v10, %v676_v22  ;;  %v681_v40 = vsel %vm669_vm5, %v663_v13, %v680_v24  ;;  %v674_v52 = vsel %vm668_vm4, %v671_v16, %v673_v21  ;;  %v864_v59 = vshrl.u32 %v7720_v47, %v858_v11 }
 0x13f   : > { %v678_v57 = vsel %vm668_vm4, %v675_v18, %v677_v35  ;;  %v682_v58 = vsel %vm668_vm4, %v679_v19, %v681_v40  ;;  %v862_v8 = vor.u32 %v861_v46, %v860_v26  ;;  %v866_v10 = vshll.u32 %v7720_v47, %v857_v44 }
 0x140   : > { %v5011_v2 = vmul.u32.u64.low %v4973_v25, %v682_v58  ;;  %v5012_v4 = vmul.u32.u64.high %v4973_v25, %v682_v58, %v5011_v2  ;;  %v5015_v5 = vmul.u32.u64.low %v4973_v25, %v678_v57  ;;  %v5016_v7 = vmul.u32.u64.high %v4973_v25, %v678_v57, %v5015_v5 }
 0x141   : > { %v865_v9 = vor.u32 %v864_v59, %v863_v50  ;;  %v867_v13 = vshrl.u32 %v7729_v51, %v858_v11  ;;  %v859_v14 = vshrl.u32 %v7731_v38, %v858_v11  ;;  %v869_v23 = vshll.u32 %v7729_v51, %v857_v44 }
 0x142   : > { %v870_v16 = vshrl.u32 %v4696_v55, %v858_v11  ;;  %v873_v17 = vshrl.u32 %v7724_v6, %v858_v11  ;;  %v690_v18 = vmul.u32 %v4973_v25, %v674_v52  ;;  %v872_v21 = vshll.u32 %v4696_v55, %v857_v44 }
 0x143   : > { %v868_v19 = vor.u32 %v867_v13, %v866_v10  ;;  %vm875_vm8 = vcmp.lt.s32.totalorder %v4987_v42, 1  ;;  %vm692_vm9 = vc.u32 %v5012_v4, %v5015_v5  ;;  %v693_v22 = vadd.s32 1, %v5016_v7 }
 0x144   : > { %v871_v24 = vor.u32 %v870_v16, %v869_v23  ;;  %vm876_vm10 = vcmp.lt.s32.totalorder %v4987_v42, 2  ;;  %v874_v26 = vor.u32 %v873_v17, %v872_v21  ;;  %vm877_vm11 = vcmp.lt.s32.totalorder %v4987_v42, 3 }
 0x145   : > { %vm878_vm12 = vcmp.lt.s32.totalorder %v4987_v42, 4  ;;  %v883_v11 = vsel %vm875_vm8, %v862_v8, %v865_v9  ;;  %v694_v25 = vsel %vm692_vm9, %v693_v22, %v5016_v7  ;;  %v887_v44 = vsel %vm875_vm8, %v865_v9, %v868_v19 }
 0x146   : > { %v880_v35 = vsel %vm878_vm12, %v868_v19, 2102212464  ;;  %v884_v40 = vsel %vm878_vm12, %v871_v24, 920167782  ;;  %v695_v46 = vadd.s32 %v694_v25, %v690_v18  ;;  %v879_v50 = vsel %vm875_vm8, %v859_v14, %v862_v8 }
 0x147   : > { %v885_v52 = vsel %vm877_vm11, %v868_v19, %v884_v40  ;;  %v888_v57 = vsel %vm878_vm12, %v874_v26, 1326507024  ;;  %v881_v58 = vsel %vm877_vm11, %v865_v9, %v880_v35  ;;  %v1063_v10 = vsel %vm1062_vm7, %v4981_v29, 0 }
 0x148   : > { %v886_v59 = vsel %vm876_vm10, %v883_v11, %v885_v52  ;;  %v889_v2 = vsel %vm877_vm11, %v871_v24, %v888_v57  ;;  %v696_v13 = vadd.s32 536870912, %v695_v46  ;;  %v7718_v14 = vand.u32 2147483647, %v4970_v15 }
 0x149   : > { %v890_v7 = vsel %vm876_vm10, %v887_v44, %v889_v2  ;;  %v5041_v23 = vmul.u32.u64.low %v4975_v27, %v886_v59  ;;  %v5042_v16 = vmul.u32.u64.high %v4975_v27, %v886_v59, %v5041_v23  ;;  %v882_v18 = vsel %vm876_vm10, %v879_v50, %v881_v58 }
 0x14a   : > { %v5046_v8 = vmul.u32.u64.low %v4975_v27, %v890_v7  ;;  %v5047_v9 = vmul.u32.u64.high %v4975_v27, %v890_v7, %v5046_v8  ;;  %v697_v17 = vshrl.u32 %v696_v13, 30  ;;  %v1059_v29 = vor.u32 8388608, %v4979_v28 }
 0x14b   : > { %v1065_v19 = vand.u32 31, %v1063_v10  ;;  %v5055_v21 = vmul.f32 %v4925_v43, %v4935_v56  ;;  %v901_v24 = vadd.s32 1, %v5042_v16  ;;  %v1263_v11 = vshrl.u32 %v1262_v30, 23 }
 0x14c   : > { %v698_v22 = vshll.u32 %v697_v17, 30  ;;  %v5062_v25 = vmul.f32 %v4927_v48, %v4935_v56  ;;  %v898_v42 = vmul.u32 %v4975_v27, %v882_v18  ;;  %vm900_vm13 = vc.u32 %v5047_v9, %v5041_v23 }
 0x14d   : > { %v1066_v26 = vsub.s32 32, %v1065_v19  ;;  %v5069_v28 = vand.u32 8388607, %v7718_v14  ;;  %v902_v40 = vsel %vm900_vm13, %v901_v24, %v5042_v16  ;;  %v5075_v30 = vshll.u32 %v1059_v29, 8 }
 0x14e   : > { %v5072_v35 = vsub.s32 %v695_v46, %v698_v22  ;;  %v691_v27 = vadd.s32 %v5015_v5, %v5012_v4  ;;  %v903_v50 = vadd.s32 %v902_v40, %v898_v42  ;;  %v5084_v52 = vshrl.u32 %v1063_v10, 5 }
 0x14f   : > { %v1069_v57 = vshrl.u32 %v7722_v45, %v1066_v26  ;;  %v1072_v58 = vshrl.u32 %v7720_v47, %v1066_v26  ;;  %v1075_v59 = vshrl.u32 %v7729_v51, %v1066_v26  ;;  %v4152_v2 = vadd.s32 4294967169, %v1263_v11 }
 0x150   : > { %v701_v46 = vsub.s32 0, %v5072_v35  ;;  %v721_v13 = vsub.s32 4, %v697_v17  ;;  %v904_v7 = vadd.s32 536870912, %v903_v50  ;;  %v1068_v1 = vshll.u32 %v7731_v38, %v1065_v19 }
 0x151   : > { %v1071_v5 = vshll.u32 %v7722_v45, %v1065_v19  ;;  %v1074_v10 = vshll.u32 %v7720_v47, %v1065_v19  ;;  %v1078_v8 = vshrl.u32 %v4696_v55, %v1066_v26  ;;  %v1077_v22 = vshll.u32 %v7729_v51, %v1065_v19 }
 0x152   : > { %v4129_v4 = vmin.u32 %v701_v46, %v5072_v35  ;;  %v905_v18 = vshrl.u32 %v904_v7, 30  ;;  %v1070_v29 = vor.u32 %v1069_v57, %v1068_v1  ;;  %v1081_v24 = vshrl.u32 %v7724_v6, %v1066_v26 }
 0x153   : > { %v1073_v42 = vor.u32 %v1072_v58, %v1071_v5  ;;  %v1076_v40 = vor.u32 %v1075_v59, %v1074_v10  ;;  %v1080_v14 = vshll.u32 %v4696_v55, %v1065_v19  ;;  %v722_v46 = vsel %vm637_vm14, %v721_v13, %v697_v17 }
 0x154   : > { %v703_v11 = vclz %v4129_v4  ;;  %v906_v20 = vshll.u32 %v905_v18, 30  ;;  %v1079_v16 = vor.u32 %v1078_v8, %v1077_v22  ;;  %vm1083_vm0 = vcmp.lt.s32.totalorder %v5084_v52, 1 }
 0x155   : > { %v1082_v45 = vor.u32 %v1081_v24, %v1080_v14  ;;  %vm1084_vm1 = vcmp.lt.s32.totalorder %v5084_v52, 2  ;;  %vm1086_vm2 = vcmp.lt.s32.totalorder %v5084_v52, 4  ;;  %vm845_vm3 = vcmp.lt.s32.totalorder %v4951_v63, 0 }
 0x156   : > { %v4130_v47 = vadd.s32 4294967294, %v703_v11  ;;  %v5105_v57 = vsub.s32 %v903_v50, %v906_v20  ;;  %v1067_v58 = vshrl.u32 %v7731_v38, %v1066_v26  ;;  %vm1085_vm4 = vcmp.lt.s32.totalorder %v5084_v52, 3 }
 0x157   : > { %v1092_v17 = vsel %vm1086_vm2, %v1079_v16, 920167782  ;;  %v724_v19 = vsel %vm5079_vm15, 0, %v722_v46  ;;  %v1091_v14 = vsel %vm1083_vm0, %v1070_v29, %v1073_v42  ;;  %v929_v50 = vsub.s32 4, %v905_v18 }
 0x158   : > { %vm4131_vm5 = vcmp.lt.s32.totalorder %v4130_v47, 0  ;;  %v1093_v59 = vsel %vm1085_vm4, %v1076_v40, %v1092_v17  ;;  %v909_v20 = vsub.s32 0, %v5105_v57  ;;  %v1095_v26 = vsel %vm1083_vm0, %v1073_v42, %v1076_v40 }
 0x159   : > { %v706_v13 = vsel %vm4131_vm5, 0, %v4130_v47  ;;  %vm5122_vm6 = vcmp.le.f32.partialorder %v843_v3, 0.7853982  ;;  %v1088_v5 = vsel %vm1086_vm2, %v1076_v40, 2102212464  ;;  %v1094_v22 = vsel %vm1084_vm1, %v1091_v14, %v1093_v59 }
 0x15a   : > { %v707_v7 = vsub.s32 32, %v706_v13  ;;  %v711_v1 = vsub.s32 4294967266, %v706_v13  ;;  %v1096_v47 = vsel %vm1086_vm2, %v1082_v45, 1326507024  ;;  %v708_v10 = vshll.u32 %v5072_v35, %v706_v13 }
 0x15b   : > { %v4137_v8 = vmin.u32 %v909_v20, %v5105_v57  ;;  %v1097_v24 = vsel %vm1085_vm4, %v1079_v16, %v1096_v47  ;;  %v1269_v17 = vadd.s32 1, %v4152_v2  ;;  %v728_v40 = vadd.s32 3, %v724_v19 }
 0x15c   : > { %v709_v3 = vshrl.u32 %v691_v27, %v707_v7  ;;  %v712_v11 = vadd.s32 127, %v711_v1  ;;  %v1098_v46 = vsel %vm1084_vm1, %v1095_v26, %v1097_v24  ;;  %v1087_v45 = vsel %vm1083_vm0, %v1067_v58, %v1070_v29 }
 0x15d   : > { %v911_v6 = vclz %v4137_v8  ;;  %v1089_v35 = vsel %vm1085_vm4, %v1073_v42, %v1088_v5  ;;  %v5143_v14 = vmul.u32.u64.low %v5075_v30, %v1098_v46  ;;  %v5144_v59 = vmul.u32.u64.high %v5075_v30, %v1098_v46, %v5143_v14 }
 0x15e   : > { %v710_v13 = vor.u32 %v709_v3, %v708_v10  ;;  %v713_v20 = vshll.u32 %v712_v11, 23  ;;  %v5147_v16 = vmul.u32.u64.low %v5075_v30, %v1094_v22  ;;  %v5148_v7 = vmul.u32.u64.high %v5075_v30, %v1094_v22, %v5147_v16 }
 0x15f   : > { %v4138_v27 = vadd.s32 4294967294, %v911_v6  ;;  %vm1270_vm7 = vcmp.gt.s32.totalorder %v1269_v17, 0  ;;  %v899_v29 = vadd.s32 %v5041_v23, %v5047_v9  ;;  %v930_v42 = vsel %vm845_vm3, %v929_v50, %v905_v18 }
 0x160   : > { %v714_v2 = vor.u32 4788187, %v713_v20  ;;  %v1271_v58 = vsel %vm1270_vm7, %v1269_v17, 0  ;;  %v5155_v19 = vand.u32 3, %v728_v40  ;;  %v1090_v6 = vsel %vm1084_vm1, %v1087_v45, %v1089_v35 }
 0x161   : > { %vm4139_vm8 = vcmp.lt.s32.totalorder %v4138_v27, 0  ;;  %v1273_v26 = vand.u32 31, %v1271_v58  ;;  %v717_v5 = vcvt.s32.f32 %v710_v13  ;;  %vm1108_vm9 = vc.u32 %v5144_v59, %v5147_v16 }
 0x162   : > { %v715_v1 = vand.u32 2147483647, %v714_v2  ;;  %v914_v47 = vsel %vm4139_vm8, 0, %v4138_v27  ;;  %v932_v23 = vsel %vm5122_vm6, 0, %v930_v42  ;;  %v1109_v9 = vadd.s32 1, %v5148_v7 }
 0x163   : > { %v915_v10 = vsub.s32 32, %v914_v47  ;;  %v919_v8 = vsub.s32 4294967266, %v914_v47  ;;  %v1106_v50 = vmul.u32 %v5075_v30, %v1090_v6  ;;  %v5165_v22 = vshrl.u32 %v1271_v58, 5 }
 0x164   : > { %v718_v18 = vmul.f32 %v717_v5, %v715_v1  ;;  %v1274_v52 = vsub.s32 32, %v1273_v26  ;;  %v916_v24 = vshll.u32 %v5105_v57, %v914_v47  ;;  %v1110_v46 = vsel %vm1108_vm9, %v1109_v9, %v5148_v7  ;;  %v5184_v9 = vpop.permute.xlu0 %601 }
 0x165   : > { %v917_v3 = vshrl.u32 %v899_v29, %v915_v10  ;;  %v920_v11 = vadd.s32 127, %v919_v8  ;;  %v1111_v40 = vadd.s32 %v1110_v46, %v1106_v50  ;;  %v1276_v45 = vshll.u32 %v7731_v38, %v1273_v26  ;;  %7767 = vst [vmem:[#allocation14_spill] sm:$0xff] %v5184_v9 }
 0x166   : > { %v719_v17 = vxor.u32 2147483648, %v718_v18  ;;  %v7765_v35 = vmov 2475754826   ;;  %v7766_v30 = vmov 2131351028   ;;  %v1283_v7 = vshrl.u32 %v7729_v51, %v1274_v52 }
 0x167   : > { %v1277_v13 = vshrl.u32 %v7765_v35, %v1274_v52  ;;  %v918_v20 = vor.u32 %v917_v3, %v916_v24  ;;  %v921_v14 = vshll.u32 %v920_v11, 23  ;;  %v1279_v27 = vshll.u32 %v7765_v35, %v1273_v26  ;;  %v5187_v11 = vpop.permute.xlu1 %606 }
 0x168   : > { %v1280_v2 = vshrl.u32 %v7766_v30, %v1274_v52  ;;  %v720_v42 = vsel %vm637_vm14, %v719_v17, %v718_v18  ;;  %v1112_v57 = vadd.s32 536870912, %v1111_v40  ;;  %v1282_v29 = vshll.u32 %v7766_v30, %v1273_v26 }
 0x169   : > { %v723_v58 = vsel %vm5079_vm15, %v4948_v62, %v720_v42  ;;  %v922_v6 = vor.u32 4788187, %v921_v14  ;;  %v1278_v1 = vor.u32 %v1277_v13, %v1276_v45  ;;  %v1285_v5 = vshll.u32 %v7729_v51, %v1273_v26 }
 0x16a   : > { %4463 = vcosq.f32 %v723_v58  ;;  %v925_v47 = vcvt.s32.f32 %v918_v20  ;;  %v5181_v10 = vshrl.u32 %v1112_v57, 30  ;;  %v1286_v8 = vshrl.u32 %v4696_v55, %v1274_v52 }
 0x16b   : > { %4465 = vsinq.f32 %v723_v58  ;;  %v923_v18 = vand.u32 2147483647, %v922_v6  ;;  %v1281_v50 = vor.u32 %v1280_v2, %v1279_v27  ;;  %v7768_v24 = vmov 1326507024  }
 0x16c   : > { %v1289_v3 = vshrl.u32 %v7768_v24, %v1274_v52  ;;  %v5191_v44 = vmul.f32 %v4929_v49, %v4935_v56  ;;  %v5195_v46 = vadd.f32 %v5184_v9, %v5055_v21  ;;  %v1114_v17 = vshll.u32 %v5181_v10, 30 }
 0x16d   : > { %v1287_v45 = vor.u32 %v1286_v8, %v1285_v5  ;;  %v5200_v13 = vadd.f32 %v5187_v11, %v5062_v25  ;;  %v926_v20 = vmul.f32 %v925_v47, %v923_v18  ;;  %v1284_v14 = vor.u32 %v1283_v7, %v1282_v29 }
 0x16e   : > { %v1288_v27 = vshll.u32 %v4696_v55, %v1273_v26  ;;  %v936_v2 = vadd.s32 3, %v932_v23  ;;  %v5203_v42 = vsub.s32 %v1111_v40, %v1114_v17  ;;  %vm1291_vm10 = vcmp.lt.s32.totalorder %v5165_v22, 1 }
 0x16f   : > { %v7769_v57 = vor.u32 8388608, %v5069_v28  ;;  %vm731_vm11 = vcmp.eq.s32.totalorder %v5155_v19, 0  ;;  %v927_v58 = vxor.u32 2147483648, %v926_v20  ;;  %vm1294_vm12 = vcmp.lt.s32.totalorder %v5165_v22, 4 }
 0x170   : > { %v1290_v6 = vor.u32 %v1289_v3, %v1288_v27  ;;  %v1299_v25 = vsel %vm1291_vm10, %v1278_v1, %v1281_v50  ;;  %vm730_vm13 = vcmp.lt.s32.totalorder %v5155_v19, 2  ;;  %v1117_v26 = vsub.s32 0, %v5203_v42 }
 0x171   : > { %v5208_v21 = vshll.u32 %v7769_v57, 8  ;;  %v1275_v23 = vshrl.u32 %v7731_v38, %v1274_v52  ;;  %vm1293_vm14 = vcmp.lt.s32.totalorder %v5165_v22, 3  ;;  %v1300_v28 = vsel %vm1294_vm12, %v1287_v45, 920167782 }
 0x172   : > { %vm727_vm15 = vweird.f32 %v4948_v62  ;;  %v928_v40 = vsel %vm845_vm3, %v927_v58, %v926_v20  ;;  %vm1053_vm0 = vcmp.lt.s32.totalorder %v4954_v0, 0  ;;  %vm1292_vm1 = vcmp.lt.s32.totalorder %v5165_v22, 2 }
 0x173   : > { %v1296_v29 = vsel %vm1294_vm12, %v1284_v14, 2102212464  ;;  %v1301_v52 = vsel %vm1293_vm14, %v1284_v14, %v1300_v28  ;;  %v931_v7 = vsel %vm5122_vm6, %v4951_v63, %v928_v40  ;;  %v4145_v5 = vmin.u32 %v1117_v26, %v5203_v42 }
 0x174   : > { %v1302_v47 = vsel %vm1292_vm1, %v1299_v25, %v1301_v52  ;;  %v1303_v8 = vsel %vm1291_vm10, %v1281_v50, %v1284_v14  ;;  %4467 = vcosq.f32 %v931_v7  ;;  %v1304_v18 = vsel %vm1294_vm12, %v1290_v6, 1326507024  ;;  %v4464_v20 = vpop.eup %4463 }
 0x175   : > { %v5241_v3 = vmul.u32.u64.low %v5208_v21, %v1302_v47  ;;  %v5242_v17 = vmul.u32.u64.high %v5208_v21, %v1302_v47, %v5241_v3  ;;  %vm734_vm2 = vcmp.eq.s32.totalorder %v5155_v19, 2  ;;  %4469 = vsinq.f32 %v931_v7  ;;  %v4466_v58 = vpop.eup %4465 }
 0x176   : > { %v5246_v4 = vand.u32 3, %v936_v2  ;;  %v7770_v27 = vand.u32 2147483647, %v4954_v0  ;;  %v1119_v14 = vclz %v4145_v5  ;;  %v735_v6 = vxor.u32 2147483648, %v4464_v20 }
 0x177   : > { %v1295_v25 = vsel %vm1291_vm10, %v1275_v23, %v1278_v1  ;;  %v1297_v26 = vsel %vm1293_vm14, %v1281_v50, %v1296_v29  ;;  %v1305_v2 = vsel %vm1293_vm14, %v1287_v45, %v1304_v18  ;;  %v732_v28 = vxor.u32 2147483648, %v4466_v58 }
 0x178   : > { %vm5250_vm3 = vcmp.le.f32.partialorder %v7770_v27, 0.7853982  ;;  %v4146_v40 = vadd.s32 4294967294, %v1119_v14  ;;  %v1137_v52 = vsub.s32 4, %v5181_v10  ;;  %v1306_v7 = vsel %vm1292_vm1, %v1303_v8, %v1305_v2 }
 0x179   : > { %v736_v5 = vsel %vm734_vm2, %v735_v6, %v4466_v58  ;;  %v1107_v47 = vadd.s32 %v5147_v16, %v5144_v59  ;;  %v5272_v1 = vmul.u32.u64.low %v5208_v21, %v1306_v7  ;;  %v5273_v23 = vmul.u32.u64.high %v5208_v21, %v1306_v7, %v5272_v1 }
 0x17a   : > { %v733_v50 = vsel %vm731_vm11, %v4464_v20, %v732_v28  ;;  %vm4147_vm4 = vcmp.lt.s32.totalorder %v4146_v40, 0  ;;  %v1298_v45 = vsel %vm1292_vm1, %v1295_v25, %v1297_v26  ;;  %v1317_v29 = vadd.s32 1, %v5242_v17 }
 0x17b   : > { %v737_v8 = vsel %vm730_vm13, %v733_v50, %v736_v5  ;;  %v1122_v18 = vsel %vm4147_vm4, 0, %v4146_v40  ;;  %v1467_v59 = vand.u32 2147483647, %v5195_v46  ;;  %v1470_v16 = vand.u32 2139095040, %v5195_v46 }
 0x17c   : > { %v738_v27 = vsel %vm727_vm15, nan, %v737_v8  ;;  %vm935_vm5 = vweird.f32 %v4951_v63  ;;  %v1123_v20 = vsub.s32 32, %v1122_v18  ;;  %v1127_v14 = vsub.s32 4294967266, %v1122_v18 }
 0x17d   : > { %v1138_v22 = vsel %vm1053_vm0, %v1137_v52, %v5181_v10  ;;  %vm938_vm6 = vcmp.lt.s32.totalorder %v5246_v4, 2  ;;  %v1314_v19 = vmul.u32 %v5208_v21, %v1298_v45  ;;  %vm1316_vm7 = vc.u32 %v5273_v23, %v5241_v3  ;;  %2299 = vst [vmem:[%s5295_s20] sm:$0xff] %v738_v27 }
 0x17e   : > { %v1471_v58 = vshrl.u32 %v1470_v16, 23  ;;  %v1124_v62 = vshll.u32 %v5203_v42, %v1122_v18  ;;  %v1125_v6 = vshrl.u32 %v1107_v47, %v1123_v20  ;;  %v1128_v25 = vadd.s32 127, %v1127_v14  ;;  %v4468_v2 = vpop.eup %4467 }
 0x17f   : > { %v1318_v26 = vsel %vm1316_vm7, %v1317_v29, %v5242_v17  ;;  %v1140_v10 = vsel %vm5250_vm3, 0, %v1138_v22  ;;  %v1474_v40 = vand.u32 8388607, %v1467_v59  ;;  %v4470_v52 = vpop.eup %4469  ;;  %vm939_vm8 = vcmp.eq.s32.totalorder %v5246_v4, 0 }
 0x180   : > { %v1319_v28 = vadd.s32 %v1318_v26, %v1314_v19  ;;  %v4160_v21 = vadd.s32 4294967169, %v1471_v58  ;;  %v943_v7 = vxor.u32 2147483648, %v4468_v2  ;;  %v1126_v5 = vor.u32 %v1125_v6, %v1124_v62  ;;  %v5309_v58 = vpop.permute.xlu0 %611 }
 0x181   : > { %v1129_v1 = vshll.u32 %v1128_v25, 23  ;;  %v940_v42 = vxor.u32 2147483648, %v4470_v52  ;;  %vm942_vm9 = vcmp.eq.s32.totalorder %v5246_v4, 2  ;;  %v1144_v29 = vadd.s32 3, %v1140_v10 }
 0x182   : > { %v1320_v47 = vadd.s32 536870912, %v1319_v28  ;;  %v1477_v17 = vadd.s32 1, %v4160_v21  ;;  %v944_v50 = vsel %vm942_vm9, %v943_v7, %v4470_v52  ;;  %v1678_v8 = vand.u32 2139095040, %v5200_v13 }
 0x183   : > { %v1130_v45 = vor.u32 4788187, %v1129_v1  ;;  %v941_v18 = vsel %vm939_vm8, %v4468_v2, %v940_v42  ;;  %v1475_v27 = vor.u32 8388608, %v1474_v40  ;;  %v1133_v22 = vcvt.s32.f32 %v1126_v5 }
 0x184   : > { %v1321_v16 = vshrl.u32 %v1320_v47, 30  ;;  %vm1478_vm10 = vcmp.gt.s32.totalorder %v1477_v17, 0  ;;  %v945_v20 = vsel %vm938_vm6, %v941_v18, %v944_v50  ;;  %v1675_v25 = vand.u32 2147483647, %v5200_v13 }
 0x185   : > { %v1131_v14 = vand.u32 2147483647, %v1130_v45  ;;  %v1479_v19 = vsel %vm1478_vm10, %v1477_v17, 0  ;;  %v946_v62 = vsel %vm935_vm5, nan, %v945_v20  ;;  %v1679_v26 = vshrl.u32 %v1678_v8, 23 }
 0x186   : > { %v1322_v6 = vshll.u32 %v1321_v16, 30  ;;  %v5316_v2 = vmul.f32 %v4931_v53, %v4935_v56  ;;  %v5320_v4 = vadd.f32 %v5309_v58, %v5191_v44  ;;  %v1481_v21 = vand.u32 31, %v1479_v19  ;;  %2301 = vst [vmem:[%s5295_s20 + $0x10] sm:$0xff] %v946_v62 }
 0x187   : > { %v1134_v10 = vmul.f32 %v1133_v22, %v1131_v14  ;;  %v5323_v40 = vand.u32 3, %v1144_v29  ;;  %vm1261_vm11 = vcmp.lt.s32.totalorder %v4970_v15, 0  ;;  %v1315_v63 = vadd.s32 %v5241_v3, %v5273_v23 }
 0x188   : > { %v5328_v52 = vsub.s32 %v1319_v28, %v1322_v6  ;;  %v1345_v5 = vsub.s32 4, %v1321_v16  ;;  %v5330_v56 = vshrl.u32 %v1479_v19, 5  ;;  %v1482_v1 = vsub.s32 32, %v1481_v21 }
 0x189   : > { %v1135_v7 = vxor.u32 2147483648, %v1134_v10  ;;  %v5333_v42 = vshll.u32 %v1475_v27, 8  ;;  %v4168_v47 = vadd.s32 4294967169, %v1679_v26  ;;  %v5337_v17 = vand.u32 8388607, %v1675_v25 }
 0x18a   : > { %v1325_v44 = vsub.s32 0, %v5328_v52  ;;  %v1484_v3 = vshll.u32 %v7731_v38, %v1481_v21  ;;  %v1485_v23 = vshrl.u32 %v7765_v35, %v1482_v1  ;;  %v1488_v28 = vshrl.u32 %v7766_v30, %v1482_v1 }
 0x18b   : > { %v1136_v50 = vsel %vm1053_vm0, %v1135_v7, %v1134_v10  ;;  %v1487_v8 = vshll.u32 %v7765_v35, %v1481_v21  ;;  %v1491_v18 = vshrl.u32 %v7729_v51, %v1482_v1  ;;  %v5352_v27 = vsel %vm1261_vm11, %v1345_v5, %v1321_v16 }
 0x18c   : > { %v1139_v45 = vsel %vm5250_vm3, %v4954_v0, %v1136_v50  ;;  %v4153_v29 = vmin.u32 %v1325_v44, %v5328_v52  ;;  %v1490_v20 = vshll.u32 %v7766_v30, %v1481_v21  ;;  %vm1499_vm12 = vcmp.lt.s32.totalorder %v5330_v56, 1 }
 0x18d   : > { %4471 = vcosq.f32 %v1139_v45  ;;  %v1486_v22 = vor.u32 %v1485_v23, %v1484_v3  ;;  %v1489_v57 = vor.u32 %v1488_v28, %v1487_v8  ;;  %v1483_v19 = vshrl.u32 %v7731_v38, %v1482_v1 }
 0x18e   : > { %4473 = vsinq.f32 %v1139_v45  ;;  %v1327_v14 = vclz %v4153_v29  ;;  %v1492_v62 = vor.u32 %v1491_v18, %v1490_v20  ;;  %v1493_v6 = vshll.u32 %v7729_v51, %v1481_v21 }
 0x18f   : > { %v1494_v26 = vshrl.u32 %v4696_v55, %v1482_v1  ;;  %v7773_v10 = vand.u32 2147483647, %v4970_v15  ;;  %v1496_v5 = vshll.u32 %v4696_v55, %v1481_v21  ;;  %v1497_v44 = vshrl.u32 %v7768_v24, %v1482_v1 }
 0x190   : > { %v4154_v7 = vadd.s32 4294967294, %v1327_v14  ;;  %vm1502_vm14 = vcmp.lt.s32.totalorder %v5330_v56, 4  ;;  %vm1150_vm15 = vcmp.eq.s32.totalorder %v5323_v40, 2  ;;  %vm1500_vm0 = vcmp.lt.s32.totalorder %v5330_v56, 2 }
 0x191   : > { %vm5361_vm13 = vcmp.le.f32.partialorder %v7773_v10, 0.7853982  ;;  %v1495_v50 = vor.u32 %v1494_v26, %v1493_v6  ;;  %vm1501_vm1 = vcmp.lt.s32.totalorder %v5330_v56, 3  ;;  %v1504_v3 = vsel %vm1502_vm14, %v1492_v62, 2102212464 }
 0x192   : > { %vm1147_vm2 = vcmp.eq.s32.totalorder %v5323_v40, 0  ;;  %vm4155_vm3 = vcmp.lt.s32.totalorder %v4154_v7, 0  ;;  %v1498_v23 = vor.u32 %v1497_v44, %v1496_v5  ;;  %v1503_v21 = vsel %vm1499_vm12, %v1483_v19, %v1486_v22 }
 0x193   : > { %v1507_v1 = vsel %vm1499_vm12, %v1486_v22, %v1489_v57  ;;  %vm1146_vm4 = vcmp.lt.s32.totalorder %v5323_v40, 2  ;;  %v1330_v28 = vsel %vm4155_vm3, 0, %v4154_v7  ;;  %v1505_v45 = vsel %vm1501_vm1, %v1489_v57, %v1504_v3 }
 0x194   : > { %v1508_v29 = vsel %vm1502_vm14, %v1495_v50, 920167782  ;;  %v1685_v8 = vadd.s32 1, %v4168_v47  ;;  %vm1143_vm5 = vweird.f32 %v4954_v0  ;;  %v1331_v18 = vsub.s32 32, %v1330_v28 }
 0x195   : > { %v1335_v20 = vsub.s32 4294967266, %v1330_v28  ;;  %v1509_v14 = vsel %vm1501_vm1, %v1492_v62, %v1508_v29  ;;  %v1511_v22 = vsel %vm1499_vm12, %v1489_v57, %v1492_v62  ;;  %v1332_v19 = vshll.u32 %v5328_v52, %v1330_v28 }
 0x196   : > { %v1510_v6 = vsel %vm1500_vm0, %v1507_v1, %v1509_v14  ;;  %v1512_v26 = vsel %vm1502_vm14, %v1498_v23, 1326507024  ;;  %vm1686_vm6 = vcmp.gt.s32.totalorder %v1685_v8, 0  ;;  %v1333_v47 = vshrl.u32 %v1315_v63, %v1331_v18 }
 0x197   : > { %v1336_v10 = vadd.s32 127, %v1335_v20  ;;  %v1513_v7 = vsel %vm1501_vm1, %v1495_v50, %v1512_v26  ;;  %v1687_v5 = vsel %vm1686_vm6, %v1685_v8, 0  ;;  %v4472_v44 = vpop.eup %4471  ;;  %v1506_v3 = vsel %vm1500_vm0, %v1503_v21, %v1505_v45 }
 0x198   : > { %v1514_v52 = vsel %vm1500_vm0, %v1511_v22, %v1513_v7  ;;  %v5400_v57 = vmul.u32.u64.low %v5333_v42, %v1510_v6  ;;  %v5401_v62 = vmul.u32.u64.high %v5333_v42, %v1510_v6, %v5400_v57  ;;  %v4474_v23 = vpop.eup %4473  ;;  %v1151_v1 = vxor.u32 2147483648, %v4472_v44 }
 0x199   : > { %v1334_v63 = vor.u32 %v1333_v47, %v1332_v19  ;;  %v1337_v28 = vshll.u32 %v1336_v10, 23  ;;  %v1689_v29 = vand.u32 31, %v1687_v5  ;;  %v1148_v18 = vxor.u32 2147483648, %v4474_v23 }
 0x19a   : > { %v1348_v50 = vsel %vm5361_vm13, 0, %v5352_v27  ;;  %v5408_v21 = vmul.u32.u64.low %v5333_v42, %v1514_v52  ;;  %v5409_v45 = vmul.u32.u64.high %v5333_v42, %v1514_v52, %v5408_v21  ;;  %v1152_v56 = vsel %vm1150_vm15, %v1151_v1, %v4474_v23 }
 0x19b   : > { %v1338_v8 = vor.u32 4788187, %v1337_v28  ;;  %v1522_v20 = vmul.u32 %v5333_v42, %v1506_v3  ;;  %v1690_v14 = vsub.s32 32, %v1689_v29  ;;  %v1149_v22 = vsel %vm1147_vm2, %v4472_v44, %v1148_v18 }
 0x19c   : > { %v1341_v19 = vcvt.s32.f32 %v1334_v63  ;;  %v1525_v6 = vadd.s32 1, %v5401_v62  ;;  %v5417_v26 = vshrl.u32 %v1687_v5, 5  ;;  %v1153_v27 = vsel %vm1146_vm4, %v1149_v22, %v1152_v56 }
 0x19d   : > { %v1339_v47 = vand.u32 2147483647, %v1338_v8  ;;  %v1692_v10 = vshll.u32 %v7731_v38, %v1689_v29  ;;  %v1693_v7 = vshrl.u32 %v7765_v35, %v1690_v14  ;;  %v1154_v42 = vsel %vm1143_vm5, nan, %v1153_v27 }
 0x19e   : > { %vm1524_vm7 = vc.u32 %v5409_v45, %v5400_v57  ;;  %v1695_v44 = vshll.u32 %v7765_v35, %v1689_v29  ;;  %v1696_v3 = vshrl.u32 %v7766_v30, %v1690_v14  ;;  %v1698_v23 = vshll.u32 %v7766_v30, %v1689_v29  ;;  %2303 = vst [vmem:[%s5295_s20 + $0x20] sm:$0xff] %v1154_v42 }
 0x19f   : > { %v1342_v5 = vmul.f32 %v1341_v19, %v1339_v47  ;;  %v1526_v52 = vsel %vm1524_vm7, %v1525_v6, %v5401_v62  ;;  %v1694_v40 = vor.u32 %v1693_v7, %v1692_v10  ;;  %v1699_v28 = vshrl.u32 %v7729_v51, %v1690_v14 }
 0x1a0   : > { %v1527_v1 = vadd.s32 %v1526_v52, %v1522_v20  ;;  %v1697_v63 = vor.u32 %v1696_v3, %v1695_v44  ;;  %v1701_v0 = vshll.u32 %v7729_v51, %v1689_v29  ;;  %v1702_v21 = vshrl.u32 %v4696_v55, %v1690_v14 }
 0x1a1   : > { %v1343_v18 = vxor.u32 2147483648, %v1342_v5  ;;  %v1704_v56 = vshll.u32 %v4696_v55, %v1689_v29  ;;  %v1705_v8 = vshrl.u32 %v7768_v24, %v1690_v14  ;;  %v1352_v22 = vadd.s32 3, %v1348_v50 }
 0x1a2   : > { %v1528_v19 = vadd.s32 536870912, %v1527_v1  ;;  %v1683_v62 = vor.u32 8388608, %v5337_v17  ;;  %v1700_v6 = vor.u32 %v1699_v28, %v1698_v23  ;;  %v1703_v27 = vor.u32 %v1702_v21, %v1701_v0 }
 0x1a3   : > { %v1344_v20 = vsel %vm1261_vm11, %v1343_v18, %v1342_v5  ;;  %v1706_v47 = vor.u32 %v1705_v8, %v1704_v56  ;;  %vm1707_vm8 = vcmp.lt.s32.totalorder %v5417_v26, 1  ;;  %v1691_v29 = vshrl.u32 %v7731_v38, %v1690_v14 }
 0x1a4   : > { %v1347_v10 = vsel %vm5361_vm13, %v4970_v15, %v1344_v20  ;;  %v1529_v7 = vshrl.u32 %v1528_v19, 30  ;;  %vm1710_vm9 = vcmp.lt.s32.totalorder %v5417_v26, 4  ;;  %vm1708_vm10 = vcmp.lt.s32.totalorder %v5417_v26, 2  ;;  %v5464_v19 = vpop.permute.xlu1 %616 }
 0x1a5   : > { %4475 = vcosq.f32 %v1347_v10  ;;  %v1715_v17 = vsel %vm1707_vm8, %v1694_v40, %v1697_v63  ;;  %v1716_v50 = vsel %vm1710_vm9, %v1703_v27, 920167782  ;;  %vm1709_vm11 = vcmp.lt.s32.totalorder %v5417_v26, 3 }
 0x1a6   : > { %4477 = vsinq.f32 %v1347_v10  ;;  %v1530_v42 = vshll.u32 %v1529_v7, 30  ;;  %v1712_v44 = vsel %vm1710_vm9, %v1700_v6, 2102212464  ;;  %v1717_v3 = vsel %vm1709_vm11, %v1700_v6, %v1716_v50 }
 0x1a7   : > { %v1719_v16 = vsel %vm1707_vm8, %v1697_v63, %v1700_v6  ;;  %v1720_v5 = vsel %vm1710_vm9, %v1706_v47, 1326507024  ;;  %v1723_v14 = vshll.u32 %v1683_v62, 8  ;;  %v1711_v23 = vsel %vm1707_vm8, %v1691_v29, %v1694_v40 }
 0x1a8   : > { %v5452_v52 = vsub.s32 %v1527_v1, %v1530_v42  ;;  %v1718_v28 = vsel %vm1708_vm10, %v1715_v17, %v1717_v3  ;;  %v1721_v0 = vsel %vm1709_vm11, %v1703_v27, %v1720_v5  ;;  %v1713_v18 = vsel %vm1709_vm11, %v1697_v63, %v1712_v44 }
 0x1a9   : > { %v1722_v21 = vsel %vm1708_vm10, %v1719_v16, %v1721_v0  ;;  %v5460_v56 = vmul.u32.u64.low %v1723_v14, %v1718_v28  ;;  %v5461_v8 = vmul.u32.u64.high %v1723_v14, %v1718_v28, %v5460_v56  ;;  %v1353_v62 = vand.u32 3, %v1352_v22 }
 0x1aa   : > { %v1533_v1 = vsub.s32 0, %v5452_v52  ;;  %v5467_v6 = vmul.u32.u64.low %v1723_v14, %v1722_v21  ;;  %v5468_v20 = vmul.u32.u64.high %v1723_v14, %v1722_v21, %v5467_v6  ;;  %v5472_v40 = vadd.f32 %v5464_v19, %v5316_v2 }
 0x1ab   : > { %v1553_v27 = vsub.s32 4, %v1529_v7  ;;  %v1714_v47 = vsel %vm1708_vm10, %v1711_v23, %v1713_v18  ;;  %v1886_v10 = vand.u32 2139095040, %v5320_v4  ;;  %vm1351_vm12 = vweird.f32 %v4970_v15 }
 0x1ac   : > { %v4161_v63 = vmin.u32 %v1533_v1, %v5452_v52  ;;  %vm5481_vm13 = vcmp.le.f32.partialorder %v1467_v59, 0.7853982  ;;  %v1733_v29 = vadd.s32 1, %v5461_v8  ;;  %v7726_v2 = vand.u32 2147483647, %v5320_v4 }
 0x1ad   : > { %vm1354_vm14 = vcmp.lt.s32.totalorder %v1353_v62, 2  ;;  %vm1355_vm15 = vcmp.eq.s32.totalorder %v1353_v62, 0  ;;  %vm1469_vm0 = vcmp.lt.s32.totalorder %v5195_v46, 0  ;;  %vm1358_vm1 = vcmp.eq.s32.totalorder %v1353_v62, 2 }
 0x1ae   : > { %v1535_v26 = vclz %v4161_v63  ;;  %v1730_v50 = vmul.u32 %v1723_v14, %v1714_v47  ;;  %vm1732_vm2 = vc.u32 %v5468_v20, %v5460_v56  ;;  %v1887_v42 = vshrl.u32 %v1886_v10, 23 }
 0x1af   : > { %v4476_v17 = vpop.eup %4475  ;;  %v1554_v16 = vsel %vm1469_vm0, %v1553_v27, %v1529_v7  ;;  %v1734_v5 = vsel %vm1732_vm2, %v1733_v29, %v5461_v8  ;;  %v1890_v18 = vand.u32 8388607, %v7726_v2  ;;  %v1523_v14 = vadd.s32 %v5400_v57, %v5409_v45 }
 0x1b0   : > { %v4478_v59 = vpop.eup %4477  ;;  %v1359_v44 = vxor.u32 2147483648, %v4476_v17  ;;  %v4162_v3 = vadd.s32 4294967294, %v1535_v26  ;;  %v1735_v28 = vadd.s32 %v1734_v5, %v1730_v50  ;;  %v4176_v0 = vadd.s32 4294967169, %v1887_v42  ;;  %v485_v26 = vld [vmem:[#allocation2] sm:$0xff] }
 0x1b1   : > { %v1356_v23 = vxor.u32 2147483648, %v4478_v59  ;;  %v2094_v1 = vand.u32 2139095040, %v5472_v40  ;;  %v1556_v29 = vsel %vm5481_vm13, 0, %v1554_v16  ;;  %v1891_v50 = vor.u32 8388608, %v1890_v18 }
 0x1b2   : > { %v1360_v21 = vsel %vm1358_vm1, %v1359_v44, %v4478_v59  ;;  %vm4163_vm3 = vcmp.lt.s32.totalorder %v4162_v3, 0  ;;  %v1736_v7 = vadd.s32 536870912, %v1735_v28  ;;  %v1893_v27 = vadd.s32 1, %v4176_v0 }
 0x1b3   : > { %v1357_v6 = vsel %vm1355_vm15, %v4476_v17, %v1356_v23  ;;  %v1538_v63 = vsel %vm4163_vm3, 0, %v4162_v3  ;;  %v2095_v5 = vshrl.u32 %v2094_v1, 23  ;;  %v5507_v23 = vmul.f32 %v485_v26, %v4911_v36 }
 0x1b4   : > { %v1361_v8 = vsel %vm1354_vm14, %v1357_v6, %v1360_v21  ;;  %v1539_v47 = vsub.s32 32, %v1538_v63  ;;  %v1543_v10 = vsub.s32 4294967266, %v1538_v63  ;;  %v1737_v45 = vshrl.u32 %v1736_v7, 30 }
 0x1b5   : > { %v1362_v57 = vsel %vm1351_vm12, nan, %v1361_v8  ;;  %vm1894_vm4 = vcmp.gt.s32.totalorder %v1893_v27, 0  ;;  %v1540_v17 = vshll.u32 %v5452_v52, %v1538_v63  ;;  %v5509_v21 = vadd.s32 3, %v1556_v29 }
 0x1b6   : > { %v1541_v42 = vshrl.u32 %v1523_v14, %v1539_v47  ;;  %v1544_v59 = vadd.s32 127, %v1543_v10  ;;  %v1895_v44 = vsel %vm1894_vm4, %v1893_v27, 0  ;;  %2305 = vst [vmem:[%s5295_s20 + $0x30] sm:$0xff] %v1362_v57  ;;  %v1738_v62 = vshll.u32 %v1737_v45, 30 }
 0x1b7   : > { %v1897_v3 = vand.u32 31, %v1895_v44  ;;  %vm1677_vm5 = vcmp.lt.s32.totalorder %v5200_v13, 0  ;;  %v1731_v14 = vadd.s32 %v5460_v56, %v5468_v20  ;;  %v1761_v6 = vsub.s32 4, %v1737_v45 }
 0x1b8   : > { %v1542_v16 = vor.u32 %v1541_v42, %v1540_v17  ;;  %v1545_v0 = vshll.u32 %v1544_v59, 23  ;;  %v5512_v15 = vsub.s32 %v1735_v28, %v1738_v62  ;;  %v5516_v63 = vshll.u32 %v1891_v50, 8 }
 0x1b9   : > { %v1898_v18 = vsub.s32 32, %v1897_v3  ;;  %v1896_v36 = vshrl.u32 %v1895_v44, 5  ;;  %v4184_v27 = vadd.s32 4294967169, %v2095_v5  ;;  %v1900_v26 = vshll.u32 %v7731_v38, %v1897_v3 }
 0x1ba   : > { %v1546_v52 = vor.u32 4788187, %v1545_v0  ;;  %v1741_v1 = vsub.s32 0, %v5512_v15  ;;  %v1549_v47 = vcvt.s32.f32 %v1542_v16  ;;  %v1903_v56 = vshll.u32 %v7765_v35, %v1897_v3 }
 0x1bb   : > { %v1901_v7 = vshrl.u32 %v7765_v35, %v1898_v18  ;;  %v1904_v10 = vshrl.u32 %v7766_v30, %v1898_v18  ;;  %v1907_v28 = vshrl.u32 %v7729_v51, %v1898_v18  ;;  %v1906_v20 = vshll.u32 %v7766_v30, %v1897_v3 }
 0x1bc   : > { %v1547_v8 = vand.u32 2147483647, %v1546_v52  ;;  %v4169_v29 = vmin.u32 %v1741_v1, %v5512_v15  ;;  %v5528_v50 = vsel %vm1677_vm5, %v1761_v6, %v1737_v45  ;;  %v1909_v17 = vshll.u32 %v7729_v51, %v1897_v3 }
 0x1bd   : > { %v1910_v42 = vshrl.u32 %v4696_v55, %v1898_v18  ;;  %v1902_v44 = vor.u32 %v1901_v7, %v1900_v26  ;;  %v1905_v62 = vor.u32 %v1904_v10, %v1903_v56  ;;  %v1908_v5 = vor.u32 %v1907_v28, %v1906_v20 }
 0x1be   : > { %v1550_v57 = vmul.f32 %v1549_v47, %v1547_v8  ;;  %v1743_v59 = vclz %v4169_v29  ;;  %v1912_v52 = vshll.u32 %v4696_v55, %v1897_v3  ;;  %v1913_v1 = vshrl.u32 %v7768_v24, %v1898_v18 }
 0x1bf   : > { %v1911_v0 = vor.u32 %v1910_v42, %v1909_v17  ;;  %v1899_v8 = vshrl.u32 %v7731_v38, %v1898_v18  ;;  %vm1915_vm6 = vcmp.lt.s32.totalorder %v1896_v36, 1  ;;  %vm1916_vm7 = vcmp.lt.s32.totalorder %v1896_v36, 2 }
 0x1c0   : > { %v1551_v16 = vxor.u32 2147483648, %v1550_v57  ;;  %v4170_v2 = vadd.s32 4294967294, %v1743_v59  ;;  %v1914_v6 = vor.u32 %v1913_v1, %v1912_v52  ;;  %vm1917_vm8 = vcmp.lt.s32.totalorder %v1896_v36, 3 }
 0x1c1   : > { %vm1918_vm9 = vcmp.lt.s32.totalorder %v1896_v36, 4  ;;  %v1919_v3 = vsel %vm1915_vm6, %v1899_v8, %v1902_v44  ;;  %v1923_v18 = vsel %vm1915_vm6, %v1902_v44, %v1905_v62  ;;  %vm5565_vm11 = vcmp.le.f32.partialorder %v1675_v25, 0.7853982 }
 0x1c2   : > { %v1552_v45 = vsel %vm1469_vm0, %v1551_v16, %v1550_v57  ;;  %vm4171_vm10 = vcmp.lt.s32.totalorder %v4170_v2, 0  ;;  %v1920_v47 = vsel %vm1918_vm9, %v1908_v5, 2102212464  ;;  %v1924_v28 = vsel %vm1918_vm9, %v1911_v0, 920167782  ;;  %v487_v16 = vld [vmem:[#allocation2 + $0x10] sm:$0xff] }
 0x1c3   : > { %v1555_v7 = vsel %vm5481_vm13, %v5195_v46, %v1552_v45  ;;  %v1746_v10 = vsel %vm4171_vm10, 0, %v4170_v2  ;;  %v1921_v56 = vsel %vm1917_vm8, %v1905_v62, %v1920_v47  ;;  %v1925_v22 = vsel %vm1917_vm8, %v1908_v5, %v1924_v28 }
 0x1c4   : > { %4479 = vcosq.f32 %v1555_v7  ;;  %v1747_v29 = vsub.s32 32, %v1746_v10  ;;  %v1751_v26 = vsub.s32 4294967266, %v1746_v10  ;;  %v1748_v20 = vshll.u32 %v5512_v15, %v1746_v10 }
 0x1c5   : > { %4481 = vsinq.f32 %v1555_v7  ;;  %v1927_v57 = vsel %vm1915_vm6, %v1905_v62, %v1908_v5  ;;  %v1928_v17 = vsel %vm1918_vm9, %v1914_v6, 1326507024  ;;  %v1926_v2 = vsel %vm1916_vm7, %v1923_v18, %v1925_v22 }
 0x1c6   : > { %v1749_v42 = vshrl.u32 %v1731_v14, %v1747_v29  ;;  %v1752_v59 = vadd.s32 127, %v1751_v26  ;;  %v1929_v44 = vsel %vm1917_vm8, %v1911_v0, %v1928_v17  ;;  %v1922_v52 = vsel %vm1916_vm7, %v1919_v3, %v1921_v56 }
 0x1c7   : > { %v1930_v1 = vsel %vm1916_vm7, %v1927_v57, %v1929_v44  ;;  %v5554_v8 = vmul.u32.u64.low %v5516_v63, %v1926_v2  ;;  %v5555_v15 = vmul.u32.u64.high %v5516_v63, %v1926_v2, %v5554_v8  ;;  %v1561_v6 = vand.u32 3, %v5509_v21 }
 0x1c8   : > { %v1750_v45 = vor.u32 %v1749_v42, %v1748_v20  ;;  %v1753_v62 = vshll.u32 %v1752_v59, 23  ;;  %v5559_v5 = vmul.u32.u64.low %v5516_v63, %v1930_v1  ;;  %v5560_v14 = vmul.u32.u64.high %v5516_v63, %v1930_v1, %v5559_v5 }
 0x1c9   : > { %v2101_v36 = vadd.s32 1, %v4184_v27  ;;  %v491_v7 = vmul.f32 %v487_v16, %v4984_v31  ;;  %vm1559_vm12 = vweird.f32 %v5195_v46  ;;  %v1764_v47 = vsel %vm5565_vm11, 0, %v5528_v50 }
 0x1ca   : > { %v1754_v3 = vor.u32 4788187, %v1753_v62  ;;  %v2091_v10 = vand.u32 2147483647, %v5472_v40  ;;  %v1938_v21 = vmul.u32 %v5516_v63, %v1922_v52  ;;  %v1941_v18 = vadd.s32 1, %v5555_v15 }
 0x1cb   : > { %vm2102_vm13 = vcmp.gt.s32.totalorder %v2101_v36, 0  ;;  %v5578_v25 = vadd.f32 %v491_v7, %v5507_v23  ;;  %v1757_v28 = vcvt.s32.f32 %v1750_v45  ;;  %vm1940_vm14 = vc.u32 %v5560_v14, %v5554_v8 }
 0x1cc   : > { %v1755_v27 = vand.u32 2147483647, %v1754_v3  ;;  %v2103_v31 = vsel %vm2102_vm13, %v2101_v36, 0  ;;  %vm1562_vm15 = vcmp.lt.s32.totalorder %v1561_v6, 2  ;;  %vm1563_vm0 = vcmp.eq.s32.totalorder %v1561_v6, 0 }
 0x1cd   : > { %v1942_v50 = vsel %vm1940_vm14, %v1941_v18, %v5555_v15  ;;  %v2105_v26 = vand.u32 31, %v2103_v31  ;;  %vm1566_vm1 = vcmp.eq.s32.totalorder %v1561_v6, 2  ;;  %v1768_v23 = vadd.s32 3, %v1764_v47 }
 0x1ce   : > { %v4480_v29 = vpop.eup %4479  ;;  %v1758_v20 = vmul.f32 %v1757_v28, %v1755_v27  ;;  %v1943_v22 = vadd.s32 %v1942_v50, %v1938_v21  ;;  %v2098_v17 = vand.u32 8388607, %v2091_v10  ;;  %v2104_v21 = vshrl.u32 %v2103_v31, 5 }
 0x1cf   : > { %v4482_v56 = vpop.eup %4481  ;;  %v1567_v63 = vxor.u32 2147483648, %v4480_v29  ;;  %v2106_v42 = vsub.s32 32, %v2105_v26  ;;  %v2108_v16 = vshll.u32 %v7731_v38, %v2105_v26  ;;  %v2111_v15 = vshll.u32 %v7765_v35, %v2105_v26 }
 0x1d0   : > { %v1564_v57 = vxor.u32 2147483648, %v4482_v56  ;;  %v1759_v2 = vxor.u32 2147483648, %v1758_v20  ;;  %v1944_v44 = vadd.s32 536870912, %v1943_v22  ;;  %v2114_v18 = vshll.u32 %v7766_v30, %v2105_v26 }
 0x1d1   : > { %v1568_v59 = vsel %vm1566_vm1, %v1567_v63, %v4482_v56  ;;  %v2109_v1 = vshrl.u32 %v7765_v35, %v2106_v42  ;;  %v2112_v45 = vshrl.u32 %v7766_v30, %v2106_v42  ;;  %v2115_v7 = vshrl.u32 %v7729_v51, %v2106_v42 }
 0x1d2   : > { %v1565_v52 = vsel %vm1563_vm0, %v4480_v29, %v1564_v57  ;;  %v1760_v5 = vsel %vm1677_vm5, %v1759_v2, %v1758_v20  ;;  %v5593_v36 = vshrl.u32 %v1944_v44, 30  ;;  %v2117_v50 = vshll.u32 %v7729_v51, %v2105_v26 }
 0x1d3   : > { %v1569_v62 = vsel %vm1562_vm15, %v1565_v52, %v1568_v59  ;;  %v1763_v47 = vsel %vm5565_vm11, %v5200_v13, %v1760_v5  ;;  %v2110_v27 = vor.u32 %v2109_v1, %v2108_v16  ;;  %v2113_v28 = vor.u32 %v2112_v45, %v2111_v15 }
 0x1d4   : > { %v1570_v3 = vsel %vm1559_vm12, nan, %v1569_v62  ;;  %4483 = vcosq.f32 %v1763_v47  ;;  %v1946_v6 = vshll.u32 %v5593_v36, 30  ;;  %v2116_v29 = vor.u32 %v2115_v7, %v2114_v18 }
 0x1d5   : > { %2307 = vst [vmem:[%s5295_s20 + $0x40] sm:$0xff] %v1570_v3  ;;  %4485 = vsinq.f32 %v1763_v47  ;;  %v2118_v46 = vshrl.u32 %v4696_v55, %v2106_v42  ;;  %v2120_v0 = vshll.u32 %v4696_v55, %v2105_v26  ;;  %v2121_v31 = vshrl.u32 %v7768_v24, %v2106_v42 }
 0x1d6   : > { %v5606_v56 = vsub.s32 %v1943_v22, %v1946_v6  ;;  %v1769_v63 = vand.u32 3, %v1768_v23  ;;  %v2099_v20 = vor.u32 8388608, %v2098_v17  ;;  %v494_v59 = vrot.slane %v5578_v25, 4 }
 0x1d7   : > { %v2119_v57 = vor.u32 %v2118_v46, %v2117_v50  ;;  %v2122_v44 = vor.u32 %v2121_v31, %v2120_v0  ;;  %vm2123_vm2 = vcmp.lt.s32.totalorder %v2104_v21, 1  ;;  %vm2126_vm3 = vcmp.lt.s32.totalorder %v2104_v21, 4 }
 0x1d8   : > { %v1949_v2 = vsub.s32 0, %v5606_v56  ;;  %vm2125_vm4 = vcmp.lt.s32.totalorder %v2104_v21, 3  ;;  %v2128_v16 = vsel %vm2126_vm3, %v2116_v29, 2102212464  ;;  %v2131_v52 = vsel %vm2123_vm2, %v2110_v27, %v2113_v28 }
 0x1d9   : > { %v2132_v22 = vsel %vm2126_vm3, %v2119_v57, 920167782  ;;  %v2107_v26 = vshrl.u32 %v7731_v38, %v2106_v42  ;;  %vm2124_vm5 = vcmp.lt.s32.totalorder %v2104_v21, 2  ;;  %v2135_v15 = vsel %vm2123_vm2, %v2113_v28, %v2116_v29 }
 0x1da   : > { %v4177_v1 = vmin.u32 %v1949_v2, %v5606_v56  ;;  %v2133_v23 = vsel %vm2125_vm4, %v2116_v29, %v2132_v22  ;;  %v2136_v45 = vsel %vm2126_vm3, %v2122_v44, 1326507024  ;;  %v2139_v62 = vshll.u32 %v2099_v20, 8 }
 0x1db   : > { %v2134_v17 = vsel %vm2124_vm5, %v2131_v52, %v2133_v23  ;;  %vm1767_vm6 = vweird.f32 %v5200_v13  ;;  %v2127_v7 = vsel %vm2123_vm2, %v2107_v26, %v2110_v27  ;;  %v2129_v3 = vsel %vm2125_vm4, %v2113_v28, %v2128_v16 }
 0x1dc   : > { %v1951_v5 = vclz %v4177_v1  ;;  %vm1770_vm7 = vcmp.lt.s32.totalorder %v1769_v63, 2  ;;  %v2137_v47 = vsel %vm2125_vm4, %v2119_v57, %v2136_v45  ;;  %vm1771_vm8 = vcmp.eq.s32.totalorder %v1769_v63, 0 }
 0x1dd   : > { %v5622_v42 = vmul.u32.u64.low %v2139_v62, %v2134_v17  ;;  %v5623_v18 = vmul.u32.u64.high %v2139_v62, %v2134_v17, %v5622_v42  ;;  %v2138_v29 = vsel %vm2124_vm5, %v2135_v15, %v2137_v47  ;;  %v495_v46 = vadd.f32 %v494_v59, %v5578_v25 }
 0x1de   : > { %v4484_v6 = vpop.eup %4483  ;;  %v4178_v50 = vadd.s32 4294967294, %v1951_v5  ;;  %v2130_v27 = vsel %vm2124_vm5, %v2127_v7, %v2129_v3  ;;  %v5629_v20 = vmul.u32.u64.low %v2139_v62, %v2138_v29  ;;  %v5630_v28 = vmul.u32.u64.high %v2139_v62, %v2138_v29, %v5629_v20 }
 0x1df   : > { %v4486_v0 = vpop.eup %4485  ;;  %v1775_v31 = vxor.u32 2147483648, %v4484_v6  ;;  %vm1774_vm9 = vcmp.eq.s32.totalorder %v1769_v63, 2  ;;  %v496_v57 = vrot.slane %v495_v46, 2  ;;  %v1939_v16 = vadd.s32 %v5554_v8, %v5560_v14 }
 0x1e0   : > { %v1772_v2 = vxor.u32 2147483648, %v4486_v0  ;;  %vm4179_vm10 = vcmp.lt.s32.totalorder %v4178_v50, 0  ;;  %v2149_v22 = vadd.s32 1, %v5623_v18  ;;  %v2146_v1 = vmul.u32 %v2139_v62, %v2130_v27 }
 0x1e1   : > { %v1776_v44 = vsel %vm1774_vm9, %v1775_v31, %v4486_v0  ;;  %v1954_v52 = vsel %vm4179_vm10, 0, %v4178_v50  ;;  %vm2148_vm11 = vc.u32 %v5630_v28, %v5622_v42  ;;  %v497_v17 = vadd.f32 %v496_v57, %v495_v46 }
 0x1e2   : > { %v1773_v25 = vsel %vm1771_vm8, %v4484_v6, %v1772_v2  ;;  %v1955_v59 = vsub.s32 32, %v1954_v52  ;;  %v1959_v21 = vsub.s32 4294967266, %v1954_v52  ;;  %v1956_v23 = vshll.u32 %v5606_v56, %v1954_v52 }
 0x1e3   : > { %v1777_v26 = vsel %vm1770_vm7, %v1773_v25, %v1776_v44  ;;  %v2150_v45 = vsel %vm2148_vm11, %v2149_v22, %v5623_v18  ;;  %v1969_v5 = vsub.s32 4, %v5593_v36  ;;  %v498_v62 = vrot.slane %v497_v17, 1 }
 0x1e4   : > { %v1778_v8 = vsel %vm1767_vm6, nan, %v1777_v26  ;;  %v1957_v14 = vshrl.u32 %v1939_v16, %v1955_v59  ;;  %v1960_v15 = vadd.s32 127, %v1959_v21  ;;  %v2151_v7 = vadd.s32 %v2150_v45, %v2146_v1 }
 0x1e5   : > { %2309 = vst [vmem:[%s5295_s20 + $0x50] sm:$0xff] %v1778_v8  ;;  %v5645_v56 = vadd.f32 %v498_v62, %v497_v17  ;;  %vm1885_vm12 = vcmp.lt.s32.totalorder %v5320_v4, 0  ;;  %v7780_v0 = vand.u32 2147483647, %v5320_v4  ;;  %vm2093_vm14 = vcmp.lt.s32.totalorder %v5472_v40, 0 }
 0x1e6   : > { %v1958_v63 = vor.u32 %v1957_v14, %v1956_v23  ;;  %v1961_v3 = vshll.u32 %v1960_v15, 23  ;;  %v2152_v47 = vadd.s32 536870912, %v2151_v7  ;;  %v1970_v13 = vsel %vm1885_vm12, %v1969_v5, %v5593_v36 }
 0x1e7   : > { %v2315_v18 = vmul.f32 %v4905_v32, %v5645_v56  ;;  %vm5655_vm13 = vcmp.le.f32.partialorder %v7780_v0, 0.7853982  ;;  %v2317_v16 = vmul.f32 %v4909_v34, %v5645_v56  ;;  %v2319_v26 = vmul.f32 %v4907_v33, %v5645_v56 }
 0x1e8   : > { %v1962_v6 = vor.u32 4788187, %v1961_v3  ;;  %v2153_v50 = vshrl.u32 %v2152_v47, 30  ;;  %v1965_v46 = vcvt.s32.f32 %v1958_v63  ;;  %v1972_v2 = vsel %vm5655_vm13, 0, %v1970_v13 }
 0x1e9   : > { %v5662_v36 = vadd.f32 %v2315_v18, %v4933_v54  ;;  %v1976_v22 = vadd.s32 3, %v1972_v2  ;;  %v5679_v14 = vadd.f32 %v2317_v16, %v4943_v60  ;;  %vm5683_vm15 = vcmp.le.f32.partialorder %v2091_v10, 0.7853982 }
 0x1ea   : > { %v1963_v29 = vand.u32 2147483647, %v1962_v6  ;;  %v2154_v27 = vshll.u32 %v2153_v50, 30  ;;  %v2177_v57 = vsub.s32 4, %v2153_v50  ;;  %v5692_v3 = vadd.f32 %v2319_v26, %v4945_v61 }
 0x1eb   : > { %v7728_v59 = vand.u32 2147483647, %v5662_v36  ;;  %v2350_v23 = vand.u32 2139095040, %v5662_v36  ;;  %v2558_v10 = vand.u32 2139095040, %v5679_v14  ;;  %vm1975_vm5 = vweird.f32 %v5320_v4 }
 0x1ec   : > { %v1966_v20 = vmul.f32 %v1965_v46, %v1963_v29  ;;  %v2155_v44 = vsub.s32 %v2151_v7, %v2154_v27  ;;  %v2178_v1 = vsel %vm2093_vm14, %v2177_v57, %v2153_v50  ;;  %v1977_v7 = vand.u32 3, %v1976_v22 }
 0x1ed   : > { %v2351_v45 = vshrl.u32 %v2350_v23, 23  ;;  %v2354_v5 = vand.u32 8388607, %v7728_v59  ;;  %v2180_v63 = vsel %vm5683_vm15, 0, %v2178_v1  ;;  %v7727_v29 = vand.u32 2147483647, %v5679_v14 }
 0x1ee   : > { %v1967_v52 = vxor.u32 2147483648, %v1966_v20  ;;  %v2157_v25 = vsub.s32 0, %v2155_v44  ;;  %v2184_v13 = vadd.s32 3, %v2180_v63  ;;  %vm1979_vm0 = vcmp.eq.s32.totalorder %v1977_v7, 0 }
 0x1ef   : > { %v4192_v47 = vadd.s32 4294967169, %v2351_v45  ;;  %v2355_v50 = vor.u32 8388608, %v2354_v5  ;;  %vm1982_vm1 = vcmp.eq.s32.totalorder %v1977_v7, 2  ;;  %vm1978_vm3 = vcmp.lt.s32.totalorder %v1977_v7, 2 }
 0x1f0   : > { %v1968_v21 = vsel %vm1885_vm12, %v1967_v52, %v1966_v20  ;;  %v4185_v8 = vmin.u32 %v2157_v25, %v2155_v44  ;;  %v2559_v0 = vshrl.u32 %v2558_v10, 23  ;;  %v2766_v31 = vand.u32 2139095040, %v5692_v3 }
 0x1f1   : > { %v1971_v17 = vsel %vm5655_vm13, %v5320_v4, %v1968_v21  ;;  %v2357_v18 = vadd.s32 1, %v4192_v47  ;;  %v2147_v27 = vadd.s32 %v5622_v42, %v5630_v28  ;;  %v5700_v16 = vand.u32 3, %v2184_v13 }
 0x1f2   : > { %4487 = vcosq.f32 %v1971_v17  ;;  %v2159_v62 = vclz %v4185_v8  ;;  %v5702_v22 = vshll.u32 %v2355_v50, 8  ;;  %v5706_v25 = vand.u32 8388607, %v7727_v29 }
 0x1f3   : > { %4489 = vsinq.f32 %v1971_v17  ;;  %vm2358_vm4 = vcmp.gt.s32.totalorder %v2357_v18, 0  ;;  %v4200_v28 = vadd.s32 4294967169, %v2559_v0  ;;  %v5709_v45 = vshrl.u32 %v2766_v31, 23 }
 0x1f4   : > { %v4186_v6 = vadd.s32 4294967294, %v2159_v62  ;;  %v2359_v57 = vsel %vm2358_vm4, %v2357_v18, 0  ;;  %v5748_v15 = vmul.f32 %v4923_v41, %v5645_v56  ;;  %vm2190_vm11 = vcmp.eq.s32.totalorder %v5700_v16, 2 }
 0x1f5   : > { %v2361_v52 = vand.u32 31, %v2359_v57  ;;  %v2360_v23 = vshrl.u32 %v2359_v57, 5  ;;  %vm2187_vm13 = vcmp.eq.s32.totalorder %v5700_v16, 0 }
 0x1f6   : > { %vm4187_vm2 = vcmp.lt.s32.totalorder %v4186_v6, 0 }
 0x1f7   : > { %v2162_v46 = vsel %vm4187_vm2, 0, %v4186_v6  ;;  %v2362_v8 = vsub.s32 32, %v2361_v52  ;;  %v2364_v42 = vshll.u32 %v7731_v38, %v2361_v52  ;;  %v2367_v6 = vshll.u32 %v7765_v35, %v2361_v52 }
 0x1f8   : > { %v2163_v20 = vsub.s32 32, %v2162_v46  ;;  %v2167_v2 = vsub.s32 4294967266, %v2162_v46  ;;  %v2164_v21 = vshll.u32 %v2155_v44, %v2162_v46  ;;  %v2370_v50 = vshll.u32 %v7766_v30, %v2361_v52 }
 0x1f9   : > { %v2365_v13 = vshrl.u32 %v7765_v35, %v2362_v8  ;;  %v2368_v44 = vshrl.u32 %v7766_v30, %v2362_v8  ;;  %v2371_v0 = vshrl.u32 %v7729_v51, %v2362_v8  ;;  %v2373_v31 = vshll.u32 %v7729_v51, %v2361_v52 }
 0x1fa   : > { %v2165_v1 = vshrl.u32 %v2147_v27, %v2163_v20  ;;  %v2168_v26 = vadd.s32 127, %v2167_v2  ;;  %v2374_v57 = vshrl.u32 %v4696_v55, %v2362_v8  ;;  %v2377_v59 = vshrl.u32 %v7768_v24, %v2362_v8 }
 0x1fb   : > { %v2366_v20 = vor.u32 %v2365_v13, %v2364_v42  ;;  %v2369_v2 = vor.u32 %v2368_v44, %v2367_v6  ;;  %v2372_v29 = vor.u32 %v2371_v0, %v2370_v50  ;;  %vm2379_vm6 = vcmp.lt.s32.totalorder %v2360_v23, 1 }
 0x1fc   : > { %v4488_v17 = vpop.eup %4487  ;;  %v2166_v63 = vor.u32 %v2165_v1, %v2164_v21  ;;  %v2169_v47 = vshll.u32 %v2168_v26, 23  ;;  %vm2382_vm7 = vcmp.lt.s32.totalorder %v2360_v23, 4  ;;  %vm2380_vm8 = vcmp.lt.s32.totalorder %v2360_v23, 2 }
 0x1fd   : > { %v4490_v5 = vpop.eup %4489  ;;  %v1983_v62 = vxor.u32 2147483648, %v4488_v17  ;;  %v2384_v7 = vsel %vm2382_vm7, %v2372_v29, 2102212464  ;;  %v2387_v6 = vsel %vm2379_vm6, %v2366_v20, %v2369_v2  ;;  %vm2381_vm9 = vcmp.lt.s32.totalorder %v2360_v23, 3 }
 0x1fe   : > { %v1980_v10 = vxor.u32 2147483648, %v4490_v5  ;;  %v2170_v46 = vor.u32 4788187, %v2169_v47  ;;  %v2173_v26 = vcvt.s32.f32 %v2166_v63  ;;  %v2376_v47 = vshll.u32 %v4696_v55, %v2361_v52  ;;  %v5727_v63 = vpop.f32.mrb[3].mxu0 }
 0x1ff   : > { %v1984_v18 = vsel %vm1982_vm1, %v1983_v62, %v4490_v5  ;;  %v2375_v62 = vor.u32 %v2374_v57, %v2373_v31  ;;  %v2391_v13 = vsel %vm2379_vm6, %v2369_v2, %v2372_v29 }
 0x200   : > { %v1981_v27 = vsel %vm1979_vm0, %v4488_v17, %v1980_v10  ;;  %v2171_v1 = vand.u32 2147483647, %v2170_v46  ;;  %v2363_v17 = vshrl.u32 %v7731_v38, %v2362_v8  ;;  %v2378_v42 = vor.u32 %v2377_v59, %v2376_v47 }
 0x201   : > { %v1985_v21 = vsel %vm1978_vm3, %v1981_v27, %v1984_v18  ;;  %v2388_v4 = vsel %vm2382_vm7, %v2375_v62, 920167782  ;;  %v2565_v18 = vadd.s32 1, %v4200_v28  ;;  %v2385_v8 = vsel %vm2381_vm9, %v2369_v2, %v2384_v7 }
 0x202   : > { %v1986_v5 = vsel %vm1975_vm5, nan, %v1985_v21  ;;  %v2174_v51 = vmul.f32 %v2173_v26, %v2171_v1  ;;  %v2383_v44 = vsel %vm2379_vm6, %v2363_v17, %v2366_v20  ;;  %v2389_v52 = vsel %vm2381_vm9, %v2372_v29, %v2388_v4 }
 0x203   : > { %2311 = vst [vmem:[%s5295_s20 + $0x60] sm:$0xff] %v1986_v5  ;;  %v2392_v50 = vsel %vm2382_vm7, %v2378_v42, 1326507024  ;;  %v2390_v0 = vsel %vm2380_vm8, %v2387_v6, %v2389_v52  ;;  %vm2566_vm10 = vcmp.gt.s32.totalorder %v2565_v18, 0  ;;  %v5752_v1 = vmul.f32 %v4925_v43, %v5645_v56 }
 0x204   : > { %v2175_v10 = vxor.u32 2147483648, %v2174_v51  ;;  %v2393_v59 = vsel %vm2381_vm9, %v2375_v62, %v2392_v50  ;;  %v5737_v57 = vmul.u32.u64.low %v5702_v22, %v2390_v0  ;;  %v5738_v21 = vmul.u32.u64.high %v5702_v22, %v2390_v0, %v5737_v57 }
 0x205   : > { %v2394_v27 = vsel %vm2380_vm8, %v2391_v13, %v2393_v59  ;;  %v2567_v20 = vsel %vm2566_vm10, %v2565_v18, 0  ;;  %v2563_v5 = vor.u32 8388608, %v5706_v25  ;;  %v7733_v62 = vand.u32 2147483647, %v5692_v3 }
 0x206   : > { %v2176_v46 = vsel %vm2093_vm14, %v2175_v10, %v2174_v51  ;;  %v5742_v29 = vmul.u32.u64.low %v5702_v22, %v2394_v27  ;;  %v5743_v28 = vmul.u32.u64.high %v5702_v22, %v2394_v27, %v5742_v29  ;;  %v2386_v51 = vsel %vm2380_vm8, %v2383_v44, %v2385_v8 }
 0x207   : > { %v2179_v31 = vsel %vm5683_vm15, %v5472_v40, %v2176_v46  ;;  %v2569_v2 = vand.u32 31, %v2567_v20  ;;  %v2405_v26 = vadd.s32 1, %v5738_v21  ;;  %v2402_v23 = vmul.u32 %v5702_v22, %v2386_v51 }
 0x208   : > { %4491 = vcosq.f32 %v2179_v31  ;;  %vm2404_vm12 = vc.u32 %v5743_v28, %v5737_v57  ;;  %v4208_v17 = vadd.s32 4294967169, %v5709_v45  ;;  %v2568_v7 = vshrl.u32 %v2567_v20, 5 }
 0x209   : > { %4493 = vsinq.f32 %v2179_v31  ;;  %v2570_v47 = vsub.s32 32, %v2569_v2  ;;  %v2406_v42 = vsel %vm2404_vm12, %v2405_v26, %v5738_v21  ;;  %v2572_v6 = vshll.u32 %v7731_v38, %v2569_v2 }
 0x20a   : > { %v2575_v25 = vshll.u32 %v7765_v35, %v2569_v2  ;;  %vm2186_vm14 = vcmp.lt.s32.totalorder %v5700_v16, 2  ;;  %v2407_v10 = vadd.s32 %v2406_v42, %v2402_v23  ;;  %v2578_v13 = vshll.u32 %v7766_v30, %v2569_v2 }
 0x20b   : > { %v2573_v22 = vshrl.u32 %v7765_v35, %v2570_v47  ;;  %v2576_v4 = vshrl.u32 %v7766_v30, %v2570_v47  ;;  %vm2183_vm15 = vweird.f32 %v5472_v40  ;;  %v7785_v45 = vmov 2102212464  }
 0x20c   : > { %v2579_v44 = vshrl.u32 %v7785_v45, %v2570_v47  ;;  %v2581_v52 = vshll.u32 %v7785_v45, %v2569_v2  ;;  %v2582_v50 = vshrl.u32 %v4696_v55, %v2570_v47  ;;  %v2585_v18 = vshrl.u32 %v7768_v24, %v2570_v47 }
 0x20d   : > { %v2408_v46 = vadd.s32 536870912, %v2407_v10  ;;  %v2574_v8 = vor.u32 %v2573_v22, %v2572_v6  ;;  %v2577_v0 = vor.u32 %v2576_v4, %v2575_v25  ;;  %v5775_v59 = vshll.u32 %v2563_v5, 8 }
 0x20e   : > { %v2580_v31 = vor.u32 %v2579_v44, %v2578_v13  ;;  %v2583_v27 = vor.u32 %v2582_v50, %v2581_v52  ;;  %v2584_v21 = vshll.u32 %v4696_v55, %v2569_v2  ;;  %v2770_v29 = vand.u32 8388607, %v7733_v62 }
 0x20f   : > { %v2409_v20 = vshrl.u32 %v2408_v46, 30  ;;  %vm2587_vm0 = vcmp.lt.s32.totalorder %v2568_v7, 1  ;;  %vm2590_vm1 = vcmp.lt.s32.totalorder %v2568_v7, 4  ;;  %v2773_v26 = vadd.s32 1, %v4208_v17 }
 0x210   : > { %v2586_v38 = vor.u32 %v2585_v18, %v2584_v21  ;;  %v2595_v6 = vsel %vm2587_vm0, %v2574_v8, %v2577_v0  ;;  %v2596_v5 = vsel %vm2590_vm1, %v2583_v27, 920167782  ;;  %v7786_v4 = vmov 683565275  }
 0x211   : > { %v2410_v22 = vshll.u32 %v2409_v20, 30  ;;  %v2571_v13 = vshrl.u32 %v7786_v4, %v2570_v47  ;;  %vm2589_vm2 = vcmp.lt.s32.totalorder %v2568_v7, 3  ;;  %vm2588_vm3 = vcmp.lt.s32.totalorder %v2568_v7, 2 }
 0x212   : > { %v4492_v51 = vpop.eup %4491  ;;  %v2592_v44 = vsel %vm2590_vm1, %v2580_v31, 2102212464  ;;  %v2597_v17 = vsel %vm2589_vm2, %v2580_v31, %v2596_v5  ;;  %v2599_v46 = vsel %vm2587_vm0, %v2577_v0, %v2580_v31  ;;  %v2433_v21 = vsub.s32 4, %v2409_v20 }
 0x213   : > { %v4494_v23 = vpop.eup %4493  ;;  %v2191_v42 = vxor.u32 2147483648, %v4492_v51  ;;  %v5789_v50 = vsub.s32 %v2407_v10, %v2410_v22  ;;  %v2598_v18 = vsel %vm2588_vm3, %v2595_v6, %v2597_v17  ;;  %v2593_v10 = vsel %vm2589_vm2, %v2577_v0, %v2592_v44 }
 0x214   : > { %v2188_v25 = vxor.u32 2147483648, %v4494_v23  ;;  %v5805_v16 = vmul.u32.u64.low %v5775_v59, %v2598_v18  ;;  %v5806_v6 = vmul.u32.u64.high %v5775_v59, %v2598_v18, %v5805_v16  ;;  %vm2774_vm4 = vcmp.gt.s32.totalorder %v2773_v26, 0 }
 0x215   : > { %v2192_v2 = vsel %vm2190_vm11, %v2191_v42, %v4494_v23  ;;  %v2591_v23 = vsel %vm2587_vm0, %v2571_v13, %v2574_v8  ;;  %v2600_v42 = vsel %vm2590_vm1, %v2586_v38, 1326507024  ;;  %v2413_v62 = vsub.s32 0, %v5789_v50 }
 0x216   : > { %v2189_v52 = vsel %vm2187_vm13, %v4492_v51, %v2188_v25  ;;  %v2601_v51 = vsel %vm2589_vm2, %v2583_v27, %v2600_v42  ;;  %v5811_v38 = vadd.f32 %v5748_v15, %v4967_v12  ;;  %v5820_v27 = vmul.f32 %v4927_v48, %v5645_v56 }
 0x217   : > { %v2193_v47 = vsel %vm2186_vm14, %v2189_v52, %v2192_v2  ;;  %v2602_v31 = vsel %vm2588_vm3, %v2599_v46, %v2601_v51  ;;  %v4193_v40 = vmin.u32 %v2413_v62, %v5789_v50  ;;  %v2594_v25 = vsel %vm2588_vm3, %v2591_v23, %v2593_v10 }
 0x218   : > { %v2194_v5 = vsel %vm2183_vm15, nan, %v2193_v47  ;;  %v5815_v8 = vmul.u32.u64.low %v5775_v59, %v2602_v31  ;;  %v5816_v0 = vmul.u32.u64.high %v5775_v59, %v2602_v31, %v5815_v8  ;;  %v2771_v22 = vor.u32 8388608, %v2770_v29 }
 0x219   : > { %2313 = vst [vmem:[%s5295_s20 + $0x70] sm:$0xff] %v2194_v5  ;;  %v2775_v13 = vsel %vm2774_vm4, %v2773_v26, 0  ;;  %v5825_v2 = vmul.f32 %v4929_v49, %v5645_v56  ;;  %v5829_v15 = vadd.f32 %v5752_v1, %v5184_v9  ;;  %vm2349_vm5 = vcmp.lt.s32.totalorder %v5662_v36, 0 }
 0x21a   : > { %v2415_v62 = vclz %v4193_v40  ;;  %v7787_v44 = vand.u32 2147483647, %v5662_v36  ;;  %v2434_v7 = vsel %vm2349_vm5, %v2433_v21, %v2409_v20  ;;  %v2613_v29 = vadd.s32 1, %v5806_v6 }
 0x21b   : > { %v2777_v26 = vand.u32 31, %v2775_v13  ;;  %v2610_v18 = vmul.u32 %v5775_v59, %v2594_v25  ;;  %vm2612_vm7 = vc.u32 %v5816_v0, %v5805_v16  ;;  %v2403_v46 = vadd.s32 %v5737_v57, %v5743_v28 }
 0x21c   : > { %vm5834_vm6 = vcmp.le.f32.partialorder %v7787_v44, 0.7853982  ;;  %v4194_v52 = vadd.s32 4294967294, %v2415_v62  ;;  %v2614_v47 = vsel %vm2612_vm7, %v2613_v29, %v5806_v6  ;;  %v5848_v42 = vshll.u32 %v2771_v22, 8 }
 0x21d   : > { %v2778_v23 = vsub.s32 32, %v2777_v26  ;;  %v2436_v20 = vsel %vm5834_vm6, 0, %v2434_v7  ;;  %v2615_v21 = vadd.s32 %v2614_v47, %v2610_v18  ;;  %v2974_v59 = vand.u32 2139095040, %v5811_v38 }
 0x21e   : > { %vm4195_vm8 = vcmp.lt.s32.totalorder %v4194_v52, 0  ;;  %v5853_v10 = vshrl.u32 %v2775_v13, 5  ;;  %v2780_v51 = vshll.u32 %v7786_v4, %v2777_v26  ;;  %v2783_v8 = vshll.u32 %v7765_v35, %v2777_v26 }
 0x21f   : > { %v2418_v5 = vsel %vm4195_vm8, 0, %v4194_v52  ;;  %v2781_v31 = vshrl.u32 %v7765_v35, %v2778_v23  ;;  %v2616_v6 = vadd.s32 536870912, %v2615_v21  ;;  %v2784_v40 = vshrl.u32 %v7766_v30, %v2778_v23 }
 0x220   : > { %v2419_v57 = vsub.s32 32, %v2418_v5  ;;  %v2423_v28 = vsub.s32 4294967266, %v2418_v5  ;;  %v2786_v25 = vshll.u32 %v7766_v30, %v2777_v26  ;;  %v2787_v22 = vshrl.u32 %v7785_v45, %v2778_v23 }
 0x221   : > { %v2790_v62 = vshrl.u32 %v4696_v55, %v2778_v23  ;;  %v2420_v13 = vshll.u32 %v5789_v50, %v2418_v5  ;;  %v2617_v29 = vshrl.u32 %v2616_v6, 30  ;;  %vm2557_vm9 = vcmp.lt.s32.totalorder %v5679_v14, 0 }
 0x222   : > { %v2421_v44 = vshrl.u32 %v2403_v46, %v2419_v57  ;;  %v2424_v7 = vadd.s32 127, %v2423_v28  ;;  %v2782_v52 = vor.u32 %v2781_v31, %v2780_v51  ;;  %v2789_v18 = vshll.u32 %v7785_v45, %v2777_v26 }
 0x223   : > { %v2792_v47 = vshll.u32 %v4696_v55, %v2777_v26  ;;  %v2793_v1 = vshrl.u32 %v7768_v24, %v2778_v23  ;;  %v2618_v49 = vshll.u32 %v2617_v29, 30  ;;  %v2785_v48 = vor.u32 %v2784_v40, %v2783_v8 }
 0x224   : > { %v2422_v39 = vor.u32 %v2421_v44, %v2420_v13  ;;  %v2425_v9 = vshll.u32 %v2424_v7, 23  ;;  %v2440_v43 = vadd.s32 3, %v2436_v20  ;;  %v2788_v12 = vor.u32 %v2787_v22, %v2786_v25 }
 0x225   : > { %v2791_v41 = vor.u32 %v2790_v62, %v2789_v18  ;;  %v2794_v50 = vor.u32 %v2793_v1, %v2792_v47  ;;  %v5867_v5 = vsub.s32 %v2615_v21, %v2618_v49  ;;  %vm2795_vm10 = vcmp.lt.s32.totalorder %v5853_v10, 1 }
 0x226   : > { %v2426_v46 = vor.u32 4788187, %v2425_v9  ;;  %v2975_v51 = vshrl.u32 %v2974_v59, 23  ;;  %v2641_v31 = vsub.s32 4, %v2617_v29  ;;  %vm2796_vm11 = vcmp.lt.s32.totalorder %v5853_v10, 2 }
 0x227   : > { %vm2797_vm12 = vcmp.lt.s32.totalorder %v5853_v10, 3  ;;  %vm2798_vm13 = vcmp.lt.s32.totalorder %v5853_v10, 4  ;;  %v2429_v57 = vcvt.s32.f32 %v2422_v39  ;;  %v2621_v20 = vsub.s32 0, %v5867_v5 }
 0x228   : > { %v2427_v26 = vand.u32 2147483647, %v2426_v46  ;;  %v2803_v1 = vsel %vm2795_vm10, %v2782_v52, %v2785_v48  ;;  %v2779_v49 = vshrl.u32 %v7786_v4, %v2778_v23  ;;  %v2800_v9 = vsel %vm2798_vm13, %v2788_v12, 2102212464 }
 0x229   : > { %v2804_v21 = vsel %vm2798_vm13, %v2791_v41, 920167782  ;;  %v2808_v28 = vsel %vm2798_vm13, %v2794_v50, 1326507024  ;;  %v4201_v6 = vmin.u32 %v2621_v20, %v5867_v5  ;;  %v2807_v8 = vsel %vm2795_vm10, %v2785_v48, %v2788_v12 }
 0x22a   : > { %v2430_v59 = vmul.f32 %v2429_v57, %v2427_v26  ;;  %v2805_v40 = vsel %vm2797_vm12, %v2788_v12, %v2804_v21  ;;  %v2809_v25 = vsel %vm2797_vm12, %v2791_v41, %v2808_v28  ;;  %v4216_v22 = vadd.s32 4294967169, %v2975_v51 }
 0x22b   : > { %v2806_v39 = vsel %vm2796_vm11, %v2803_v1, %v2805_v40  ;;  %v7790_v23 = vand.u32 2147483647, %v5811_v38  ;;  %v2623_v44 = vclz %v4201_v6  ;;  %v2642_v7 = vsel %vm2557_vm9, %v2641_v31, %v2617_v29 }
 0x22c   : > { %v2431_v13 = vxor.u32 2147483648, %v2430_v59  ;;  %v2799_v18 = vsel %vm2795_vm10, %v2779_v49, %v2782_v52  ;;  %v2801_v12 = vsel %vm2797_vm12, %v2785_v48, %v2800_v9  ;;  %v2810_v47 = vsel %vm2796_vm11, %v2807_v8, %v2809_v25 }
 0x22d   : > { %v2978_v62 = vand.u32 8388607, %v7790_v23  ;;  %v5897_v41 = vmul.u32.u64.low %v5848_v42, %v2806_v39  ;;  %v5898_v50 = vmul.u32.u64.high %v5848_v42, %v2806_v39, %v5897_v41  ;;  %v4202_v51 = vadd.s32 4294967294, %v2623_v44 }
 0x22e   : > { %v2432_v46 = vsel %vm2349_vm5, %v2431_v13, %v2430_v59  ;;  %v5904_v29 = vmul.u32.u64.low %v5848_v42, %v2810_v47  ;;  %v5905_v31 = vmul.u32.u64.high %v5848_v42, %v2810_v47, %v5904_v29  ;;  %v5910_v52 = vand.u32 3, %v2440_v43 }
 0x22f   : > { %v2435_v48 = vsel %vm5834_vm6, %v5662_v36, %v2432_v46  ;;  %v7791_v26 = vand.u32 2147483647, %v5679_v14  ;;  %v2981_v20 = vadd.s32 1, %v4216_v22  ;;  %vm4203_vm15 = vcmp.lt.s32.totalorder %v4202_v51, 0 }
 0x230   : > { %4495 = vcosq.f32 %v2435_v48  ;;  %v2802_v49 = vsel %vm2796_vm11, %v2799_v18, %v2801_v12  ;;  %v2626_v17 = vsel %vm4203_vm15, 0, %v4202_v51  ;;  %v2821_v43 = vadd.s32 1, %v5898_v50 }
 0x231   : > { %vm5914_vm14 = vcmp.le.f32.partialorder %v7791_v26, 0.7853982  ;;  %4497 = vsinq.f32 %v2435_v48  ;;  %vm2982_vm0 = vcmp.gt.s32.totalorder %v2981_v20, 0  ;;  %v2611_v9 = vadd.s32 %v5805_v16, %v5816_v0 }
 0x232   : > { %v2644_v1 = vsel %vm5914_vm14, 0, %v2642_v7  ;;  %v2627_v21 = vsub.s32 32, %v2626_v17  ;;  %v2631_v28 = vsub.s32 4294967266, %v2626_v17  ;;  %v2979_v59 = vor.u32 8388608, %v2978_v62 }
 0x233   : > { %v2648_v6 = vadd.s32 3, %v2644_v1  ;;  %v2818_v40 = vmul.u32 %v5848_v42, %v2802_v49  ;;  %vm2820_vm1 = vc.u32 %v5905_v31, %v5897_v41  ;;  %v2983_v8 = vsel %vm2982_vm0, %v2981_v20, 0 }
 0x234   : > { %v2628_v10 = vshll.u32 %v5867_v5, %v2626_v17  ;;  %v2629_v39 = vshrl.u32 %v2611_v9, %v2627_v21  ;;  %v2632_v25 = vadd.s32 127, %v2631_v28  ;;  %v2822_v22 = vsel %vm2820_vm1, %v2821_v43, %v5898_v50 }
 0x235   : > { %v5932_v23 = vmul.f32 %v4931_v53, %v5645_v56  ;;  %v5936_v16 = vadd.f32 %v5820_v27, %v5187_v11  ;;  %v2823_v0 = vadd.s32 %v2822_v22, %v2818_v40  ;;  %v2985_v42 = vand.u32 31, %v2983_v8 }
 0x236   : > { %v5940_v62 = vadd.f32 %v5825_v2, %v5309_v58  ;;  %vm2442_vm2 = vcmp.lt.s32.totalorder %v5910_v52, 2  ;;  %v2630_v5 = vor.u32 %v2629_v39, %v2628_v10  ;;  %v2633_v13 = vshll.u32 %v2632_v25, 23 }
 0x237   : > { %vm2439_vm3 = vweird.f32 %v5662_v36  ;;  %vm2443_vm4 = vcmp.eq.s32.totalorder %v5910_v52, 0  ;;  %vm2446_vm5 = vcmp.eq.s32.totalorder %v5910_v52, 2  ;;  %v2824_v56 = vadd.s32 536870912, %v2823_v0 }
 0x238   : > { %v2986_v44 = vsub.s32 32, %v2985_v42  ;;  %v2634_v27 = vor.u32 4788187, %v2633_v13  ;;  %v5946_v7 = vand.u32 3, %v2648_v6  ;;  %v5948_v18 = vshll.u32 %v2979_v59, 8 }
 0x239   : > { %v3182_v2 = vand.u32 2139095040, %v5829_v15  ;;  %v5951_v12 = vshrl.u32 %v2824_v56, 30  ;;  %v5953_v47 = vshrl.u32 %v2983_v8, 5  ;;  %v2637_v48 = vcvt.s32.f32 %v2630_v5 }
 0x23a   : > { %v2989_v50 = vshrl.u32 %v7765_v35, %v2986_v44  ;;  %v2992_v46 = vshrl.u32 %v7766_v30, %v2986_v44  ;;  %v4496_v51 = vpop.eup %4495  ;;  %v2635_v29 = vand.u32 2147483647, %v2634_v27  ;;  %v2988_v26 = vshll.u32 %v7786_v4, %v2985_v42 }
 0x23b   : > { %v2998_v20 = vshrl.u32 %v4696_v55, %v2986_v44  ;;  %v4498_v1 = vpop.eup %4497  ;;  %v2447_v49 = vxor.u32 2147483648, %v4496_v51  ;;  %v2826_v17 = vshll.u32 %v5951_v12, 30  ;;  %v2991_v43 = vshll.u32 %v7765_v35, %v2985_v42 }
 0x23c   : > { %v2995_v9 = vshrl.u32 %v7785_v45, %v2986_v44  ;;  %v2444_v21 = vxor.u32 2147483648, %v4498_v1  ;;  %v2638_v28 = vmul.f32 %v2637_v48, %v2635_v29  ;;  %v2994_v59 = vshll.u32 %v7766_v30, %v2985_v42 }
 0x23d   : > { %v2997_v6 = vshll.u32 %v7785_v45, %v2985_v42  ;;  %v2448_v40 = vsel %vm2446_vm5, %v2447_v49, %v4498_v1  ;;  %v5966_v8 = vsub.s32 %v2823_v0, %v2826_v17  ;;  %v2990_v10 = vor.u32 %v2989_v50, %v2988_v26 }
 0x23e   : > { %v2993_v39 = vor.u32 %v2992_v46, %v2991_v43  ;;  %v2445_v25 = vsel %vm2443_vm4, %v4496_v51, %v2444_v21  ;;  %v2639_v22 = vxor.u32 2147483648, %v2638_v28  ;;  %v3001_v13 = vshrl.u32 %v7768_v24, %v2986_v44 }
 0x23f   : > { %v2999_v5 = vor.u32 %v2998_v20, %v2997_v6  ;;  %v2449_v56 = vsel %vm2442_vm2, %v2445_v25, %v2448_v40  ;;  %v2829_v27 = vsub.s32 0, %v5966_v8  ;;  %v2996_v29 = vor.u32 %v2995_v9, %v2994_v59 }
 0x240   : > { %v3000_v48 = vshll.u32 %v4696_v55, %v2985_v42  ;;  %v2450_v0 = vsel %vm2439_vm3, nan, %v2449_v56  ;;  %v2640_v50 = vsel %vm2557_vm9, %v2639_v22, %v2638_v28  ;;  %vm3003_vm6 = vcmp.lt.s32.totalorder %v5953_v47, 1 }
 0x241   : > { %v3183_v46 = vshrl.u32 %v3182_v2, 23  ;;  %v2643_v51 = vsel %vm5914_vm14, %v5679_v14, %v2640_v50  ;;  %vm2765_vm7 = vcmp.lt.s32.totalorder %v5692_v3, 0  ;;  %v4209_v52 = vmin.u32 %v2829_v27, %v5966_v8  ;;  %4011 = vst [vmem:[%s5295_s20 + $0x80] sm:$0xff] %v2450_v0 }
 0x242   : > { %v3002_v26 = vor.u32 %v3001_v13, %v3000_v48  ;;  %vm3006_vm8 = vcmp.lt.s32.totalorder %v5953_v47, 4  ;;  %4499 = vcosq.f32 %v2643_v51  ;;  %v2987_v36 = vshrl.u32 %v7786_v4, %v2986_v44 }
 0x243   : > { %v3011_v42 = vsel %vm3003_vm6, %v2990_v10, %v2993_v39  ;;  %v3012_v2 = vsel %vm3006_vm8, %v2999_v5, 920167782  ;;  %4501 = vsinq.f32 %v2643_v51  ;;  %v2831_v57 = vclz %v4209_v52 }
 0x244   : > { %vm3005_vm9 = vcmp.lt.s32.totalorder %v5953_v47, 3  ;;  %v3008_v20 = vsel %vm3006_vm8, %v2996_v29, 2102212464  ;;  %v2849_v1 = vsub.s32 4, %v5951_v12  ;;  %vm3004_vm10 = vcmp.lt.s32.totalorder %v5953_v47, 2 }
 0x245   : > { %v3013_v49 = vsel %vm3005_vm9, %v2996_v29, %v3012_v2  ;;  %v3015_v44 = vsel %vm3003_vm6, %v2993_v39, %v2996_v29  ;;  %v4210_v17 = vadd.s32 4294967294, %v2831_v57  ;;  %v3007_v43 = vsel %vm3003_vm6, %v2987_v36, %v2990_v10 }
 0x246   : > { %v3014_v9 = vsel %vm3004_vm10, %v3011_v42, %v3013_v49  ;;  %v3016_v21 = vsel %vm3006_vm8, %v3002_v26, 1326507024  ;;  %v3009_v28 = vsel %vm3005_vm9, %v2993_v39, %v3008_v20  ;;  %v3179_v22 = vand.u32 2147483647, %v5829_v15 }
 0x247   : > { %v3017_v59 = vsel %vm3005_vm9, %v2999_v5, %v3016_v21  ;;  %v6006_v6 = vmul.u32.u64.low %v5948_v18, %v3014_v9  ;;  %v6007_v40 = vmul.u32.u64.high %v5948_v18, %v3014_v9, %v6006_v6  ;;  %vm4211_vm11 = vcmp.lt.s32.totalorder %v4210_v17, 0 }
 0x248   : > { %v3018_v25 = vsel %vm3004_vm10, %v3015_v44, %v3017_v59  ;;  %v4224_v10 = vadd.s32 4294967169, %v3183_v46  ;;  %v2819_v13 = vadd.s32 %v5897_v41, %v5905_v31  ;;  %v2834_v56 = vsel %vm4211_vm11, 0, %v4210_v17 }
 0x249   : > { %v6016_v27 = vmul.u32.u64.low %v5948_v18, %v3018_v25  ;;  %v6017_v39 = vmul.u32.u64.high %v5948_v18, %v3018_v25, %v6016_v27  ;;  %v2835_v5 = vsub.s32 32, %v2834_v56  ;;  %v2839_v29 = vsub.s32 4294967266, %v2834_v56 }
 0x24a   : > { %v3010_v48 = vsel %vm3004_vm10, %v3007_v43, %v3009_v28  ;;  %v3189_v0 = vadd.s32 1, %v4224_v10  ;;  %vm2654_vm12 = vcmp.eq.s32.totalorder %v5946_v7, 2  ;;  %v7794_v50 = vand.u32 2147483647, %v5692_v3 }
 0x24b   : > { %v2850_v41 = vsel %vm2765_vm7, %v2849_v1, %v5951_v12  ;;  %v3029_v31 = vadd.s32 1, %v6007_v40  ;;  %v2836_v51 = vshll.u32 %v5966_v8, %v2834_v56  ;;  %v2837_v52 = vshrl.u32 %v2819_v13, %v2835_v5 }
 0x24c   : > { %vm6024_vm13 = vcmp.le.f32.partialorder %v7794_v50, 0.7853982  ;;  %v2840_v47 = vadd.s32 127, %v2839_v29  ;;  %vm3190_vm14 = vcmp.gt.s32.totalorder %v3189_v0, 0  ;;  %v4500_v26 = vpop.eup %4499  ;;  %v3026_v36 = vmul.u32 %v5948_v18, %v3010_v48 }
 0x24d   : > { %vm3028_vm15 = vc.u32 %v6017_v39, %v6006_v6  ;;  %v3186_v42 = vand.u32 8388607, %v3179_v22  ;;  %v3191_v2 = vsel %vm3190_vm14, %v3189_v0, 0  ;;  %v4502_v57 = vpop.eup %4501  ;;  %v2655_v20 = vxor.u32 2147483648, %v4500_v26 }
 0x24e   : > { %v2838_v12 = vor.u32 %v2837_v52, %v2836_v51  ;;  %v2841_v1 = vshll.u32 %v2840_v47, 23  ;;  %v3030_v49 = vsel %vm3028_vm15, %v3029_v31, %v6007_v40  ;;  %v2652_v8 = vxor.u32 2147483648, %v4502_v57 }
 0x24f   : > { %v2852_v44 = vsel %vm6024_vm13, 0, %v2850_v41  ;;  %v3031_v17 = vadd.s32 %v3030_v49, %v3026_v36  ;;  %v3193_v43 = vand.u32 31, %v3191_v2  ;;  %vm2647_vm0 = vweird.f32 %v5679_v14 }
 0x250   : > { %vm2651_vm1 = vcmp.eq.s32.totalorder %v5946_v7, 0  ;;  %v2656_v18 = vsel %vm2654_vm12, %v2655_v20, %v4502_v57  ;;  %v2842_v9 = vor.u32 4788187, %v2841_v1  ;;  %vm2650_vm2 = vcmp.lt.s32.totalorder %v5946_v7, 2 }
 0x251   : > { %v2653_v21 = vsel %vm2651_vm1, %v4500_v26, %v2652_v8  ;;  %v3032_v28 = vadd.s32 536870912, %v3031_v17  ;;  %v3194_v59 = vsub.s32 32, %v3193_v43  ;;  %v2845_v10 = vcvt.s32.f32 %v2838_v12 }
 0x252   : > { %v2657_v40 = vsel %vm2650_vm2, %v2653_v21, %v2656_v18  ;;  %v2843_v25 = vand.u32 2147483647, %v2842_v9  ;;  %v2856_v13 = vadd.s32 3, %v2852_v44  ;;  %vm2973_vm3 = vcmp.lt.s32.totalorder %v5811_v38, 0 }
 0x253   : > { %v2658_v56 = vsel %vm2647_vm0, nan, %v2657_v40  ;;  %v3033_v14 = vshrl.u32 %v3032_v28, 30  ;;  %v3187_v27 = vor.u32 8388608, %v3186_v42  ;;  %v3197_v5 = vshrl.u32 %v7765_v35, %v3194_v59 }
 0x254   : > { %v2846_v29 = vmul.f32 %v2845_v10, %v2843_v25  ;;  %v6048_v48 = vshrl.u32 %v3191_v2, 5  ;;  %v3200_v7 = vshrl.u32 %v7766_v30, %v3194_v59  ;;  %v3390_v0 = vand.u32 2139095040, %v5936_v16  ;;  %4013 = vst [vmem:[%s5295_s20 + $0x90] sm:$0xff] %v2658_v56 }
 0x255   : > { %v3034_v50 = vshll.u32 %v3033_v14, 30  ;;  %v3196_v41 = vshll.u32 %v7786_v4, %v3193_v43  ;;  %v3203_v31 = vshrl.u32 %v7785_v45, %v3194_v59  ;;  %v3206_v51 = vshrl.u32 %v4696_v55, %v3194_v59 }
 0x256   : > { %v2847_v52 = vxor.u32 2147483648, %v2846_v29  ;;  %v3199_v47 = vshll.u32 %v7765_v35, %v3193_v43  ;;  %v3202_v26 = vshll.u32 %v7766_v30, %v3193_v43  ;;  %v3205_v36 = vshll.u32 %v7785_v45, %v3193_v43 }
 0x257   : > { %v6059_v42 = vsub.s32 %v3031_v17, %v3034_v50  ;;  %v3057_v2 = vsub.s32 4, %v3033_v14  ;;  %v3198_v57 = vor.u32 %v3197_v5, %v3196_v41  ;;  %v3209_v20 = vshrl.u32 %v7768_v24, %v3194_v59 }
 0x258   : > { %v2848_v12 = vsel %vm2765_vm7, %v2847_v52, %v2846_v29  ;;  %v3201_v1 = vor.u32 %v3200_v7, %v3199_v47  ;;  %v3207_v49 = vor.u32 %v3206_v51, %v3205_v36  ;;  %v3208_v8 = vshll.u32 %v4696_v55, %v3193_v43 }
 0x259   : > { %v2851_v44 = vsel %vm6024_vm13, %v5692_v3, %v2848_v12  ;;  %v6068_v18 = vand.u32 3, %v2856_v13  ;;  %v3037_v17 = vsub.s32 0, %v6059_v42  ;;  %v3204_v9 = vor.u32 %v3203_v31, %v3202_v26 }
 0x25a   : > { %4503 = vcosq.f32 %v2851_v44  ;;  %v3210_v21 = vor.u32 %v3209_v20, %v3208_v8  ;;  %v3227_v28 = vshll.u32 %v3187_v27, 8  ;;  %v3391_v40 = vshrl.u32 %v3390_v0, 23 }
 0x25b   : > { %4505 = vsinq.f32 %v2851_v44  ;;  %v7797_v25 = vand.u32 2147483647, %v5811_v38  ;;  %v4217_v43 = vmin.u32 %v3037_v17, %v6059_v42  ;;  %vm3211_vm5 = vcmp.lt.s32.totalorder %v6048_v48, 1 }
 0x25c   : > { %vm3214_vm6 = vcmp.lt.s32.totalorder %v6048_v48, 4  ;;  %v3058_v46 = vsel %vm2973_vm3, %v3057_v2, %v3033_v14  ;;  %v3195_v13 = vshrl.u32 %v7786_v4, %v3194_v59  ;;  %v3219_v56 = vsel %vm3211_vm5, %v3198_v57, %v3201_v1 }
 0x25d   : > { %vm6073_vm4 = vcmp.le.f32.partialorder %v7797_v25, 0.7853982  ;;  %v3220_v27 = vsel %vm3214_vm6, %v3207_v49, 920167782  ;;  %v3039_v5 = vclz %v4217_v43  ;;  %vm3213_vm7 = vcmp.lt.s32.totalorder %v6048_v48, 3 }
 0x25e   : > { %v3216_v29 = vsel %vm3214_vm6, %v3204_v9, 2102212464  ;;  %v3223_v7 = vsel %vm3211_vm5, %v3201_v1, %v3204_v9  ;;  %vm3212_vm8 = vcmp.lt.s32.totalorder %v6048_v48, 2  ;;  %v3221_v0 = vsel %vm3213_vm7, %v3204_v9, %v3220_v27 }
 0x25f   : > { %v3224_v50 = vsel %vm3214_vm6, %v3210_v21, 1326507024  ;;  %v4232_v41 = vadd.s32 4294967169, %v3391_v40  ;;  %v4218_v31 = vadd.s32 4294967294, %v3039_v5  ;;  %v3215_v51 = vsel %vm3211_vm5, %v3195_v13, %v3198_v57 }
 0x260   : > { %v3222_v52 = vsel %vm3212_vm8, %v3219_v56, %v3221_v0  ;;  %v3225_v14 = vsel %vm3213_vm7, %v3207_v49, %v3224_v50  ;;  %v3217_v47 = vsel %vm3213_vm7, %v3201_v1, %v3216_v29  ;;  %vm2859_vm10 = vcmp.eq.s32.totalorder %v6068_v18, 0 }
 0x261   : > { %v3226_v59 = vsel %vm3212_vm8, %v3223_v7, %v3225_v14  ;;  %v6089_v26 = vmul.u32.u64.low %v3227_v28, %v3222_v52  ;;  %v6090_v36 = vmul.u32.u64.high %v3227_v28, %v3222_v52, %v6089_v26  ;;  %vm4219_vm9 = vcmp.lt.s32.totalorder %v4218_v31, 0 }
 0x262   : > { %v6093_v2 = vmul.u32.u64.low %v3227_v28, %v3226_v59  ;;  %v6094_v20 = vmul.u32.u64.high %v3227_v28, %v3226_v59, %v6093_v2  ;;  %v3397_v12 = vadd.s32 1, %v4232_v41  ;;  %vm2862_vm11 = vcmp.eq.s32.totalorder %v6068_v18, 2 }
 0x263   : > { %v3027_v57 = vadd.s32 %v6006_v6, %v6017_v39  ;;  %v3042_v1 = vsel %vm4219_vm9, 0, %v4218_v31  ;;  %v3218_v44 = vsel %vm3212_vm8, %v3215_v51, %v3217_v47  ;;  %v3060_v9 = vsel %vm6073_vm4, 0, %v3058_v46 }
 0x264   : > { %v3043_v49 = vsub.s32 32, %v3042_v1  ;;  %v3047_v8 = vsub.s32 4294967266, %v3042_v1  ;;  %vm3398_vm12 = vcmp.gt.s32.totalorder %v3397_v12, 0  ;;  %v4504_v17 = vpop.eup %4503  ;;  %v3237_v21 = vadd.s32 1, %v6090_v36 }
 0x265   : > { %v3387_v40 = vand.u32 2147483647, %v5936_v16  ;;  %v3399_v25 = vsel %vm3398_vm12, %v3397_v12, 0  ;;  %v4506_v43 = vpop.eup %4505  ;;  %v2863_v13 = vxor.u32 2147483648, %v4504_v17  ;;  %v3044_v6 = vshll.u32 %v6059_v42, %v3042_v1 }
 0x266   : > { %v3045_v39 = vshrl.u32 %v3027_v57, %v3043_v49  ;;  %v3048_v56 = vadd.s32 127, %v3047_v8  ;;  %v2860_v27 = vxor.u32 2147483648, %v4506_v43  ;;  %v3234_v5 = vmul.u32 %v3227_v28, %v3218_v44 }
 0x267   : > { %vm3236_vm13 = vc.u32 %v6094_v20, %v6089_v26  ;;  %v3401_v48 = vand.u32 31, %v3399_v25  ;;  %v2864_v46 = vsel %vm2862_vm11, %v2863_v13, %v4506_v43  ;;  %vm2858_vm14 = vcmp.lt.s32.totalorder %v6068_v18, 2 }
 0x268   : > { %v3046_v29 = vor.u32 %v3045_v39, %v3044_v6  ;;  %v3049_v7 = vshll.u32 %v3048_v56, 23  ;;  %v3238_v0 = vsel %vm3236_vm13, %v3237_v21, %v6090_v36  ;;  %v2861_v42 = vsel %vm2859_vm10, %v4504_v17, %v2860_v27 }
 0x269   : > { %v3239_v50 = vadd.s32 %v3238_v0, %v3234_v5  ;;  %v3402_v41 = vsub.s32 32, %v3401_v48  ;;  %v6117_v28 = vadd.f32 %v5932_v23, %v5464_v19  ;;  %vm2855_vm15 = vweird.f32 %v5692_v3 }
 0x26a   : > { %v2865_v31 = vsel %vm2858_vm14, %v2861_v42, %v2864_v46  ;;  %v3050_v51 = vor.u32 4788187, %v3049_v7  ;;  %v3064_v14 = vadd.s32 3, %v3060_v9  ;;  %v3053_v2 = vcvt.s32.f32 %v3046_v29 }
 0x26b   : > { %v2866_v52 = vsel %vm2855_vm15, nan, %v2865_v31  ;;  %v3240_v47 = vadd.s32 536870912, %v3239_v50  ;;  %v3405_v59 = vshrl.u32 %v7765_v35, %v3402_v41  ;;  %v3394_v18 = vand.u32 8388607, %v3387_v40 }
 0x26c   : > { %v3051_v36 = vand.u32 2147483647, %v3050_v51  ;;  %v3408_v12 = vshrl.u32 %v7766_v30, %v3402_v41  ;;  %4015 = vst [vmem:[%s5295_s20 + $0xa0] sm:$0xff] %v2866_v52  ;;  %v3404_v23 = vshll.u32 %v7786_v4, %v3401_v48  ;;  %v3411_v3 = vshrl.u32 %v7785_v45, %v3402_v41 }
 0x26d   : > { %v3241_v57 = vshrl.u32 %v3240_v47, 30  ;;  %v3414_v1 = vshrl.u32 %v4696_v55, %v3402_v41  ;;  %v3400_v8 = vshrl.u32 %v3399_v25, 5  ;;  %v3407_v44 = vshll.u32 %v7765_v35, %v3401_v48 }
 0x26e   : > { %v3054_v49 = vmul.f32 %v3053_v2, %v3051_v36  ;;  %v3413_v17 = vshll.u32 %v7785_v45, %v3401_v48  ;;  %v3406_v21 = vor.u32 %v3405_v59, %v3404_v23  ;;  %v3410_v43 = vshll.u32 %v7766_v30, %v3401_v48 }
 0x26f   : > { %v3242_v9 = vshll.u32 %v3241_v57, 30  ;;  %v3417_v13 = vshrl.u32 %v7768_v24, %v3402_v41  ;;  %v3409_v39 = vor.u32 %v3408_v12, %v3407_v44  ;;  %v3416_v27 = vshll.u32 %v4696_v55, %v3401_v48 }
 0x270   : > { %v3055_v6 = vxor.u32 2147483648, %v3054_v49  ;;  %v3415_v56 = vor.u32 %v3414_v1, %v3413_v17  ;;  %v6133_v5 = vand.u32 3, %v3064_v14  ;;  %v3395_v25 = vor.u32 8388608, %v3394_v18 }
 0x271   : > { %v6135_v46 = vsub.s32 %v3239_v50, %v3242_v9  ;;  %v3412_v29 = vor.u32 %v3411_v3, %v3410_v43  ;;  %v3403_v0 = vshrl.u32 %v7786_v4, %v3402_v41  ;;  %v3418_v42 = vor.u32 %v3417_v13, %v3416_v27 }
 0x272   : > { %v3056_v7 = vsel %vm2973_vm3, %v3055_v6, %v3054_v49  ;;  %vm3419_vm0 = vcmp.lt.s32.totalorder %v3400_v8, 1  ;;  %vm3420_vm1 = vcmp.lt.s32.totalorder %v3400_v8, 2  ;;  %vm3422_vm2 = vcmp.lt.s32.totalorder %v3400_v8, 4 }
 0x273   : > { %v3059_v31 = vsel %vm6073_vm4, %v5811_v38, %v3056_v7  ;;  %v3245_v51 = vsub.s32 0, %v6135_v46  ;;  %vm3421_vm5 = vcmp.lt.s32.totalorder %v3400_v8, 3  ;;  %v3427_v48 = vsel %vm3419_vm0, %v3406_v21, %v3409_v39 }
 0x274   : > { %4507 = vcosq.f32 %v3059_v31  ;;  %v3428_v50 = vsel %vm3422_vm2, %v3415_v56, 920167782  ;;  %v3424_v14 = vsel %vm3422_vm2, %v3412_v29, 2102212464  ;;  %v3431_v10 = vsel %vm3419_vm0, %v3409_v39, %v3412_v29 }
 0x275   : > { %4509 = vsinq.f32 %v3059_v31  ;;  %v4225_v52 = vmin.u32 %v3245_v51, %v6135_v46  ;;  %v3429_v41 = vsel %vm3421_vm5, %v3412_v29, %v3428_v50  ;;  %v3432_v59 = vsel %vm3422_vm2, %v3418_v42, 1326507024 }
 0x276   : > { %v3430_v47 = vsel %vm3420_vm1, %v3427_v48, %v3429_v41  ;;  %v3435_v36 = vshll.u32 %v3395_v25, 8  ;;  %vm3181_vm3 = vcmp.lt.s32.totalorder %v5829_v15, 0  ;;  %v3265_v18 = vsub.s32 4, %v3241_v57 }
 0x277   : > { %v3247_v2 = vclz %v4225_v52  ;;  %v3423_v12 = vsel %vm3419_vm0, %v3403_v0, %v3406_v21  ;;  %v3425_v23 = vsel %vm3421_vm5, %v3409_v39, %v3424_v14  ;;  %v3433_v3 = vsel %vm3421_vm5, %v3415_v56, %v3432_v59 }
 0x278   : > { %v6153_v1 = vmul.u32.u64.low %v3435_v36, %v3430_v47  ;;  %v6154_v49 = vmul.u32.u64.high %v3435_v36, %v3430_v47, %v6153_v1  ;;  %vm6158_vm4 = vcmp.le.f32.partialorder %v3179_v22, 0.7853982  ;;  %v3434_v9 = vsel %vm3420_vm1, %v3431_v10, %v3433_v3 }
 0x279   : > { %v4226_v17 = vadd.s32 4294967294, %v3247_v2  ;;  %v3598_v43 = vand.u32 2139095040, %v5940_v62  ;;  %vm3066_vm6 = vcmp.lt.s32.totalorder %v6133_v5, 2  ;;  %vm3070_vm7 = vcmp.eq.s32.totalorder %v6133_v5, 2 }
 0x27a   : > { %v6166_v21 = vmul.u32.u64.low %v3435_v36, %v3434_v9  ;;  %v6167_v13 = vmul.u32.u64.high %v3435_v36, %v3434_v9, %v6166_v21  ;;  %vm3063_vm8 = vweird.f32 %v5811_v38  ;;  %v3266_v22 = vsel %vm3181_vm3, %v3265_v18, %v3241_v57 }
 0x27b   : > { %vm4227_vm9 = vcmp.lt.s32.totalorder %v4226_v17, 0  ;;  %v3426_v6 = vsel %vm3420_vm1, %v3423_v12, %v3425_v23  ;;  %v3599_v39 = vshrl.u32 %v3598_v43, 23  ;;  %v3445_v27 = vadd.s32 1, %v6154_v49 }
 0x27c   : > { %v3250_v56 = vsel %vm4227_vm9, 0, %v4226_v17  ;;  %v3595_v25 = vand.u32 2147483647, %v5940_v62  ;;  %v3806_v29 = vand.u32 2139095040, %v6117_v28  ;;  %v3235_v7 = vadd.s32 %v6089_v26, %v6094_v20 }
 0x27d   : > { %v3251_v0 = vsub.s32 32, %v3250_v56  ;;  %v3255_v42 = vsub.s32 4294967266, %v3250_v56  ;;  %v4240_v31 = vadd.s32 4294967169, %v3599_v39  ;;  %v3252_v48 = vshll.u32 %v6135_v46, %v3250_v56 }
 0x27e   : > { %v4508_v51 = vpop.eup %4507  ;;  %v3268_v57 = vsel %vm6158_vm4, 0, %v3266_v22  ;;  %v3442_v8 = vmul.u32 %v3435_v36, %v3426_v6  ;;  %vm3444_vm10 = vc.u32 %v6167_v13, %v6153_v1  ;;  %v3807_v59 = vshrl.u32 %v3806_v29, 23 }
 0x27f   : > { %v4510_v50 = vpop.eup %4509  ;;  %v3071_v52 = vxor.u32 2147483648, %v4508_v51  ;;  %v3253_v14 = vshrl.u32 %v3235_v7, %v3251_v0  ;;  %v3256_v41 = vadd.s32 127, %v3255_v42  ;;  %v3446_v47 = vsel %vm3444_vm10, %v3445_v27, %v6154_v49 }
 0x280   : > { %v3068_v10 = vxor.u32 2147483648, %v4510_v50  ;;  %v3447_v26 = vadd.s32 %v3446_v47, %v3442_v8  ;;  %v3605_v20 = vadd.s32 1, %v4240_v31  ;;  %vm3067_vm11 = vcmp.eq.s32.totalorder %v6133_v5, 0 }
 0x281   : > { %v3072_v46 = vsel %vm3070_vm7, %v3071_v52, %v4510_v50  ;;  %v3254_v2 = vor.u32 %v3253_v14, %v3252_v48  ;;  %v3257_v36 = vshll.u32 %v3256_v41, 23  ;;  %v3272_v12 = vadd.s32 3, %v3268_v57 }
 0x282   : > { %v3069_v18 = vsel %vm3067_vm11, %v4508_v51, %v3068_v10  ;;  %v3448_v23 = vadd.s32 536870912, %v3447_v26  ;;  %vm3606_vm12 = vcmp.gt.s32.totalorder %v3605_v20, 0  ;;  %v3602_v17 = vand.u32 8388607, %v3595_v25 }
 0x283   : > { %v3073_v3 = vsel %vm3066_vm6, %v3069_v18, %v3072_v46  ;;  %v3258_v49 = vor.u32 4788187, %v3257_v36  ;;  %v3607_v9 = vsel %vm3606_vm12, %v3605_v20, 0  ;;  %v4248_v6 = vadd.s32 4294967169, %v3807_v59 }
 0x284   : > { %v3074_v43 = vsel %vm3063_vm8, nan, %v3073_v3  ;;  %v6192_v21 = vshrl.u32 %v3448_v23, 30  ;;  %v3609_v22 = vand.u32 31, %v3607_v9  ;;  %v3261_v56 = vcvt.s32.f32 %v3254_v2 }
 0x285   : > { %v3259_v39 = vand.u32 2147483647, %v3258_v49  ;;  %4017 = vst [vmem:[%s5295_s20 + $0xb0] sm:$0xff] %v3074_v43  ;;  %v6196_v7 = vand.u32 3, %v3272_v12  ;;  %v3603_v0 = vor.u32 8388608, %v3602_v17  ;;  %v3443_v31 = vadd.s32 %v6153_v1, %v6167_v13 }
 0x286   : > { %v3450_v27 = vshll.u32 %v6192_v21, 30  ;;  %v3610_v29 = vsub.s32 32, %v3609_v22  ;;  %v3803_v42 = vand.u32 2147483647, %v6117_v28  ;;  %v3813_v48 = vadd.s32 1, %v4248_v6 }
 0x287   : > { %v3262_v5 = vmul.f32 %v3261_v56, %v3259_v39  ;;  %v3612_v8 = vshll.u32 %v7786_v4, %v3609_v22  ;;  %v3615_v41 = vshll.u32 %v7765_v35, %v3609_v22  ;;  %v3618_v47 = vshll.u32 %v7766_v30, %v3609_v22 }
 0x288   : > { %v6200_v38 = vsub.s32 %v3447_v26, %v3450_v27  ;;  %v3613_v51 = vshrl.u32 %v7765_v35, %v3610_v29  ;;  %v3616_v50 = vshrl.u32 %v7766_v30, %v3610_v29  ;;  %v3619_v52 = vshrl.u32 %v7785_v45, %v3610_v29 }
 0x289   : > { %v3263_v57 = vxor.u32 2147483648, %v3262_v5  ;;  %v3622_v1 = vshrl.u32 %v4696_v55, %v3610_v29  ;;  %v3608_v10 = vshrl.u32 %v3607_v9, 5  ;;  %v3621_v20 = vshll.u32 %v7785_v45, %v3609_v22 }
 0x28a   : > { %v3453_v14 = vsub.s32 0, %v6200_v38  ;;  %v3614_v26 = vor.u32 %v3613_v51, %v3612_v8  ;;  %v3617_v2 = vor.u32 %v3616_v50, %v3615_v41  ;;  %v3620_v36 = vor.u32 %v3619_v52, %v3618_v47 }
 0x28b   : > { %v3264_v13 = vsel %vm3181_vm3, %v3263_v57, %v3262_v5  ;;  %v3623_v18 = vor.u32 %v3622_v1, %v3621_v20  ;;  %v3624_v12 = vshll.u32 %v4696_v55, %v3609_v22  ;;  %v3625_v23 = vshrl.u32 %v7768_v24, %v3610_v29 }
 0x28c   : > { %v3267_v59 = vsel %vm6158_vm4, %v5829_v15, %v3264_v13  ;;  %v4233_v46 = vmin.u32 %v3453_v14, %v6200_v38  ;;  %vm3389_vm13 = vcmp.lt.s32.totalorder %v5936_v16, 0  ;;  %v3643_v49 = vshll.u32 %v3603_v0, 8 }
 0x28d   : > { %4511 = vcosq.f32 %v3267_v59  ;;  %vm3814_vm14 = vcmp.gt.s32.totalorder %v3813_v48, 0  ;;  %v3473_v17 = vsub.s32 4, %v6192_v21  ;;  %v3611_v44 = vshrl.u32 %v7786_v4, %v3610_v29 }
 0x28e   : > { %4513 = vsinq.f32 %v3267_v59  ;;  %v3455_v3 = vclz %v4233_v46  ;;  %v3626_v9 = vor.u32 %v3625_v23, %v3624_v12  ;;  %vm3627_vm15 = vcmp.lt.s32.totalorder %v3608_v10, 1 }
 0x28f   : > { %vm3629_vm0 = vcmp.lt.s32.totalorder %v3608_v10, 3  ;;  %vm3630_vm1 = vcmp.lt.s32.totalorder %v3608_v10, 4  ;;  %v3635_v6 = vsel %vm3627_vm15, %v3614_v26, %v3617_v2  ;;  %v3639_v56 = vsel %vm3627_vm15, %v3617_v2, %v3620_v36 }
 0x290   : > { %v4234_v43 = vadd.s32 4294967294, %v3455_v3  ;;  %v3632_v39 = vsel %vm3630_vm1, %v3620_v36, 2102212464  ;;  %v3636_v22 = vsel %vm3630_vm1, %v3623_v18, 920167782  ;;  %vm3628_vm3 = vcmp.lt.s32.totalorder %v3608_v10, 2 }
 0x291   : > { %v3640_v27 = vsel %vm3630_vm1, %v3626_v9, 1326507024  ;;  %vm6224_vm2 = vcmp.le.f32.partialorder %v3387_v40, 0.7853982  ;;  %v3637_v29 = vsel %vm3629_vm0, %v3620_v36, %v3636_v22  ;;  %v3631_v57 = vsel %vm3627_vm15, %v3611_v44, %v3614_v26 }
 0x292   : > { %vm4235_vm5 = vcmp.lt.s32.totalorder %v4234_v43, 0  ;;  %v3641_v0 = vsel %vm3629_vm0, %v3623_v18, %v3640_v27  ;;  %v3638_v8 = vsel %vm3628_vm3, %v3635_v6, %v3637_v29  ;;  %vm3271_vm4 = vweird.f32 %v5829_v15 }
 0x293   : > { %v3458_v51 = vsel %vm4235_vm5, 0, %v4234_v43  ;;  %v3642_v50 = vsel %vm3628_vm3, %v3639_v56, %v3641_v0  ;;  %v3633_v40 = vsel %vm3629_vm0, %v3617_v2, %v3632_v39  ;;  %v3815_v41 = vsel %vm3814_vm14, %v3813_v48, 0 }
 0x294   : > { %v3459_v52 = vsub.s32 32, %v3458_v51  ;;  %v3463_v14 = vsub.s32 4294967266, %v3458_v51  ;;  %v6235_v47 = vmul.u32.u64.low %v3643_v49, %v3642_v50  ;;  %v6236_v1 = vmul.u32.u64.high %v3643_v49, %v3642_v50, %v6235_v47 }
 0x295   : > { %v6238_v13 = vmul.u32.u64.low %v3643_v49, %v3638_v8  ;;  %v6239_v20 = vmul.u32.u64.high %v3643_v49, %v3638_v8, %v6238_v13  ;;  %v3460_v26 = vshll.u32 %v6200_v38, %v3458_v51  ;;  %v3817_v36 = vand.u32 31, %v3815_v41 }
 0x296   : > { %v3461_v59 = vshrl.u32 %v3443_v31, %v3459_v52  ;;  %v3464_v46 = vadd.s32 127, %v3463_v14  ;;  %vm3274_vm6 = vcmp.lt.s32.totalorder %v6196_v7, 2  ;;  %vm3275_vm7 = vcmp.eq.s32.totalorder %v6196_v7, 0  ;;  %v464_v52 = vld [vmem:[%s7710_s3 + $0x8] sm:$0xff] }
 0x297   : > { %v4512_v18 = vpop.eup %4511  ;;  %v3474_v48 = vsel %vm3389_vm13, %v3473_v17, %v6192_v21  ;;  %v3634_v2 = vsel %vm3628_vm3, %v3631_v57, %v3633_v40  ;;  %v6249_v9 = vsub.s32 32, %v3817_v36  ;;  %vm3278_vm8 = vcmp.eq.s32.totalorder %v6196_v7, 2 }
 0x298   : > { %v4514_v12 = vpop.eup %4513  ;;  %v3279_v23 = vxor.u32 2147483648, %v4512_v18  ;;  %v3462_v3 = vor.u32 %v3461_v59, %v3460_v26  ;;  %v3465_v44 = vshll.u32 %v3464_v46, 23  ;;  %vm3652_vm9 = vc.u32 %v6236_v1, %v6238_v13 }
 0x299   : > { %v3276_v31 = vxor.u32 2147483648, %v4514_v12  ;;  %v3653_v38 = vadd.s32 1, %v6239_v20  ;;  %v3650_v39 = vmul.u32 %v3643_v49, %v3634_v2  ;;  %v3810_v21 = vand.u32 8388607, %v3803_v42  ;;  %v466_v2 = vld [vmem:[%s7710_s3 + $0x18] sm:$0xff] }
 0x29a   : > { %v3280_v43 = vsel %vm3278_vm8, %v3279_v23, %v4514_v12  ;;  %v3466_v6 = vor.u32 4788187, %v3465_v44  ;;  %v3476_v17 = vsel %vm6224_vm2, 0, %v3474_v48  ;;  %v3821_v56 = vshrl.u32 %v7765_v35, %v6249_v9 }
 0x29b   : > { %v3277_v10 = vsel %vm3275_vm7, %v4512_v18, %v3276_v31  ;;  %v3654_v22 = vsel %vm3652_vm9, %v3653_v38, %v6239_v20  ;;  %v3469_v49 = vcvt.s32.f32 %v3462_v3  ;;  %v3816_v57 = vshrl.u32 %v3815_v41, 5 }
 0x29c   : > { %v3281_v27 = vsel %vm3274_vm6, %v3277_v10, %v3280_v43  ;;  %v3467_v29 = vand.u32 2147483647, %v3466_v6  ;;  %v3655_v0 = vadd.s32 %v3654_v22, %v3650_v39  ;;  %v3820_v8 = vshll.u32 %v7786_v4, %v3817_v36 }
 0x29d   : > { %v3282_v51 = vsel %vm3271_vm4, nan, %v3281_v27  ;;  %v3824_v50 = vshrl.u32 %v7766_v30, %v6249_v9  ;;  %v3823_v7 = vshll.u32 %v7765_v35, %v3817_v36  ;;  %v3827_v47 = vshrl.u32 %v7785_v45, %v6249_v9 }
 0x29e   : > { %v3470_v14 = vmul.f32 %v3469_v49, %v3467_v29  ;;  %v3656_v40 = vadd.s32 536870912, %v3655_v0  ;;  %4019 = vst [vmem:[%s5295_s20 + $0xc0] sm:$0xff] %v3282_v51  ;;  %v3822_v15 = vor.u32 %v3821_v56, %v3820_v8  ;;  %v3829_v41 = vshll.u32 %v7785_v45, %v3817_v36 }
 0x29f   : > { %v3830_v20 = vshrl.u32 %v4696_v55, %v6249_v9  ;;  %v3833_v26 = vshrl.u32 %v7768_v24, %v6249_v9  ;;  %v3825_v18 = vor.u32 %v3824_v50, %v3823_v7  ;;  %v3826_v48 = vshll.u32 %v7766_v30, %v3817_v36 }
 0x2a0   : > { %v3471_v59 = vxor.u32 2147483648, %v3470_v14  ;;  %v6283_v46 = vshrl.u32 %v3656_v40, 30  ;;  %v468_v12 = vmul.f32 %v464_v52, %v4913_v37  ;;  %v3811_v23 = vor.u32 8388608, %v3810_v21 }
 0x2a1   : > { %v3831_v3 = vor.u32 %v3830_v20, %v3829_v41  ;;  %v3832_v44 = vshll.u32 %v4696_v55, %v3817_v36  ;;  %v3480_v38 = vadd.s32 3, %v3476_v17  ;;  %v3828_v6 = vor.u32 %v3827_v47, %v3826_v48 }
 0x2a2   : > { %v3472_v31 = vsel %vm3389_vm13, %v3471_v59, %v3470_v14  ;;  %v3658_v43 = vshll.u32 %v6283_v46, 30  ;;  %vm3835_vm10 = vcmp.lt.s32.totalorder %v3816_v57, 1  ;;  %v470_v22 = vmul.f32 %v466_v2, %v5727_v63 }
 0x2a3   : > { %v3475_v39 = vsel %vm6224_vm2, %v5936_v16, %v3472_v31  ;;  %v3834_v10 = vor.u32 %v3833_v26, %v3832_v44  ;;  %vm3838_vm11 = vcmp.lt.s32.totalorder %v3816_v57, 4  ;;  %v3843_v36 = vsel %vm3835_vm10, %v3822_v15, %v3825_v18 }
 0x2a4   : > { %4515 = vcosq.f32 %v3475_v39  ;;  %v3659_v37 = vsub.s32 %v3655_v0, %v3658_v43  ;;  %vm3837_vm12 = vcmp.lt.s32.totalorder %v3816_v57, 3  ;;  %v3844_v21 = vsel %vm3838_vm11, %v3831_v3, 920167782 }
 0x2a5   : > { %4517 = vsinq.f32 %v3475_v39  ;;  %v3851_v17 = vshll.u32 %v3811_v23, 8  ;;  %vm3836_vm13 = vcmp.lt.s32.totalorder %v3816_v57, 2  ;;  %v3845_v27 = vsel %vm3837_vm12, %v3828_v6, %v3844_v21 }
 0x2a6   : > { %v3661_v56 = vsub.s32 0, %v3659_v37  ;;  %v3847_v5 = vsel %vm3835_vm10, %v3825_v18, %v3828_v6  ;;  %v3840_v29 = vsel %vm3838_vm11, %v3828_v6, 2102212464  ;;  %v3846_v49 = vsel %vm3836_vm13, %v3843_v36, %v3845_v27 }
 0x2a7   : > { %v3848_v51 = vsel %vm3838_vm11, %v3834_v10, 1326507024  ;;  %v478_v63 = vadd.f32 %v470_v22, %v468_v12  ;;  %v3819_v0 = vshrl.u32 %v7786_v4, %v6249_v9  ;;  %v3481_v47 = vand.u32 3, %v3480_v38 }
 0x2a8   : > { %v4241_v8 = vmin.u32 %v3661_v56, %v3659_v37  ;;  %v3849_v50 = vsel %vm3837_vm12, %v3831_v3, %v3848_v51  ;;  %v6306_v14 = vmul.u32.u64.low %v3851_v17, %v3846_v49  ;;  %v6307_v40 = vmul.u32.u64.high %v3851_v17, %v3846_v49, %v6306_v14 }
 0x2a9   : > { %v3850_v52 = vsel %vm3836_vm13, %v3847_v5, %v3849_v50  ;;  %v479_v7 = vrot.slane %v478_v63, 4  ;;  %v3839_v20 = vsel %vm3835_vm10, %v3819_v0, %v3822_v15  ;;  %v3841_v26 = vsel %vm3837_vm12, %v3825_v18, %v3840_v29 }
 0x2aa   : > { %v3663_v41 = vclz %v4241_v8  ;;  %v6312_v59 = vmul.u32.u64.low %v3851_v17, %v3850_v52  ;;  %v6313_v48 = vmul.u32.u64.high %v3851_v17, %v3850_v52, %v6312_v59  ;;  %v3842_v12 = vsel %vm3836_vm13, %v3839_v20, %v3841_v26 }
 0x2ab   : > { %v480_v2 = vadd.f32 %v479_v7, %v478_v63  ;;  %v3861_v23 = vadd.s32 1, %v6307_v40  ;;  %vm3482_vm14 = vcmp.lt.s32.totalorder %v3481_v47, 2  ;;  %vm3483_vm15 = vcmp.eq.s32.totalorder %v3481_v47, 0 }
 0x2ac   : > { %v4242_v9 = vadd.s32 4294967294, %v3663_v41  ;;  %vm3486_vm0 = vcmp.eq.s32.totalorder %v3481_v47, 2  ;;  %v3651_v15 = vadd.s32 %v6238_v13, %v6236_v1  ;;  %vm3860_vm2 = vc.u32 %v6313_v48, %v6306_v14 }
 0x2ad   : > { %v481_v3 = vrot.slane %v480_v2, 2  ;;  %v3858_v39 = vmul.u32 %v3851_v17, %v3842_v12  ;;  %v3862_v36 = vsel %vm3860_vm2, %v3861_v23, %v6307_v40  ;;  %vm3479_vm5 = vweird.f32 %v5936_v16 }
 0x2ae   : > { %v4516_v44 = vpop.eup %4515  ;;  %vm4243_vm1 = vcmp.lt.s32.totalorder %v4242_v9, 0  ;;  %v3681_v13 = vsub.s32 4, %v6283_v46  ;;  %vm3597_vm3 = vcmp.lt.s32.totalorder %v5940_v62, 0  ;;  %vm6337_vm4 = vcmp.le.f32.partialorder %v3595_v25, 0.7853982 }
 0x2af   : > { %v4518_v31 = vpop.eup %4517  ;;  %v3487_v38 = vxor.u32 2147483648, %v4516_v44  ;;  %v3666_v18 = vsel %vm4243_vm1, 0, %v4242_v9  ;;  %v482_v21 = vadd.f32 %v481_v3, %v480_v2  ;;  %v3863_v29 = vadd.s32 %v3862_v36, %v3858_v39 }
 0x2b0   : > { %v3484_v43 = vxor.u32 2147483648, %v4518_v31  ;;  %v3667_v57 = vsub.s32 32, %v3666_v18  ;;  %v3671_v6 = vsub.s32 4294967266, %v3666_v18  ;;  %v3668_v22 = vshll.u32 %v3659_v37, %v3666_v18 }
 0x2b1   : > { %v3488_v10 = vsel %vm3486_vm0, %v3487_v38, %v4518_v31  ;;  %v483_v49 = vrot.slane %v482_v21, 1  ;;  %v3864_v8 = vadd.s32 536870912, %v3863_v29  ;;  %v3682_v16 = vsel %vm3597_vm3, %v3681_v13, %v6283_v46 }
 0x2b2   : > { %v3485_v56 = vsel %vm3483_vm15, %v4516_v44, %v3484_v43  ;;  %v3669_v27 = vshrl.u32 %v3651_v15, %v3667_v57  ;;  %v3672_v5 = vadd.s32 127, %v3671_v6  ;;  %v3684_v46 = vsel %vm6337_vm4, 0, %v3682_v16 }
 0x2b3   : > { %v3489_v1 = vsel %vm3482_vm14, %v3485_v56, %v3488_v10  ;;  %v6327_v37 = vadd.f32 %v483_v49, %v482_v21  ;;  %v3865_v50 = vshrl.u32 %v3864_v8, 30  ;;  %vm3805_vm6 = vcmp.lt.s32.totalorder %v6117_v28, 0 }
 0x2b4   : > { %v3490_v51 = vsel %vm3479_vm5, nan, %v3489_v1  ;;  %v3670_v17 = vor.u32 %v3669_v27, %v3668_v22  ;;  %v3673_v63 = vshll.u32 %v3672_v5, 23  ;;  %v3688_v25 = vadd.s32 3, %v3684_v46 }
 0x2b5   : > { %4021 = vst [vmem:[%s5295_s20 + $0xd0] sm:$0xff] %v3490_v51  ;;  %v564_v52 = vmul.f32 %v4905_v32, %v6327_v37  ;;  %v3866_v47 = vshll.u32 %v3865_v50, 30  ;;  %v3889_v20 = vsub.s32 4, %v3865_v50  ;;  %v566_v9 = vmul.f32 %v4909_v34, %v6327_v37 }
 0x2b6   : > { %v3674_v0 = vor.u32 4788187, %v3673_v63  ;;  %v3677_v7 = vcvt.s32.f32 %v3670_v17  ;;  %vm6363_vm7 = vcmp.le.f32.partialorder %v3803_v42, 0.7853982  ;;  %v568_v10 = vmul.f32 %v4907_v33, %v6327_v37 }
 0x2b7   : > { %v6342_v26 = vadd.f32 %v4933_v54, %v564_v52  ;;  %v3867_v2 = vsub.s32 %v3863_v29, %v3866_v47  ;;  %v3890_v3 = vsel %vm3805_vm6, %v3889_v20, %v3865_v50  ;;  %v6355_v15 = vadd.f32 %v4943_v60, %v566_v9 }
 0x2b8   : > { %v3675_v40 = vand.u32 2147483647, %v3674_v0  ;;  %v3892_v39 = vsel %vm6363_vm7, 0, %v3890_v3  ;;  %v3689_v22 = vand.u32 3, %v3688_v25  ;;  %v6376_v1 = vadd.f32 %v4945_v61, %v568_v10 }
 0x2b9   : > { %v3869_v23 = vsub.s32 0, %v3867_v2  ;;  %v739_v44 = vand.u32 2147483647, %v6342_v26  ;;  %v742_v18 = vand.u32 2139095040, %v6342_v26  ;;  %v947_v42 = vand.u32 2147483647, %v6355_v15 }
 0x2ba   : > { %v3678_v59 = vmul.f32 %v3677_v7, %v3675_v40  ;;  %v950_v27 = vand.u32 2139095040, %v6355_v15  ;;  %v3896_v5 = vadd.s32 3, %v3892_v39  ;;  %vm3691_vm9 = vcmp.eq.s32.totalorder %v3689_v22, 0 }
 0x2bb   : > { %v4249_v38 = vmin.u32 %v3869_v23, %v3867_v2  ;;  %v743_v36 = vshrl.u32 %v742_v18, 23  ;;  %v746_v21 = vand.u32 8388607, %v739_v44  ;;  %v6380_v63 = vand.u32 8388607, %v947_v42 }
 0x2bc   : > { %v3679_v12 = vxor.u32 2147483648, %v3678_v59  ;;  %v951_v13 = vshrl.u32 %v950_v27, 23  ;;  %vm3690_vm10 = vcmp.lt.s32.totalorder %v3689_v22, 2  ;;  %v3859_v8 = vadd.s32 %v6306_v14, %v6313_v48 }
 0x2bd   : > { %v3871_v6 = vclz %v4249_v38  ;;  %v4132_v29 = vadd.s32 4294967169, %v743_v36  ;;  %v747_v51 = vor.u32 8388608, %v746_v21  ;;  %vm3687_vm11 = vweird.f32 %v5940_v62 }
 0x2be   : > { %v3680_v31 = vsel %vm3597_vm3, %v3679_v12, %v3678_v59  ;;  %v4140_v16 = vadd.s32 4294967169, %v951_v13  ;;  %vm3694_vm12 = vcmp.eq.s32.totalorder %v3689_v22, 2  ;;  %v6385_v40 = vand.u32 3, %v3896_v5 }
 0x2bf   : > { %v3683_v43 = vsel %vm6337_vm4, %v5940_v62, %v3680_v31  ;;  %v4250_v56 = vadd.s32 4294967294, %v3871_v6  ;;  %v749_v17 = vadd.s32 1, %v4132_v29  ;;  %v6389_v46 = vshll.u32 %v747_v51, 8 }
 0x2c0   : > { %4519 = vcosq.f32 %v3683_v43  ;;  %v6387_v20 = vadd.s32 1, %v4140_v16  ;;  %v955_v14 = vor.u32 8388608, %v6380_v63  ;;  %v7747_v48 = vand.u32 2147483647, %v6376_v1 }
 0x2c1   : > { %4521 = vsinq.f32 %v3683_v43  ;;  %vm4251_vm8 = vcmp.lt.s32.totalorder %v4250_v56, 0  ;;  %vm750_vm13 = vcmp.gt.s32.totalorder %v749_v17, 0  ;;  %vm3902_vm5 = vcmp.eq.s32.totalorder %v6385_v40, 2 }
 0x2c2   : > { %v3874_v49 = vsel %vm4251_vm8, 0, %v4250_v56  ;;  %v751_v41 = vsel %vm750_vm13, %v749_v17, 0  ;;  %vm958_vm14 = vcmp.gt.s32.totalorder %v6387_v20, 0  ;;  %vm3899_vm3 = vcmp.eq.s32.totalorder %v6385_v40, 0 }
 0x2c3   : > { %v3875_v0 = vsub.s32 32, %v3874_v49  ;;  %v3879_v50 = vsub.s32 4294967266, %v3874_v49  ;;  %v3876_v52 = vshll.u32 %v3867_v2, %v3874_v49  ;;  %v753_v59 = vand.u32 31, %v751_v41 }
 0x2c4   : > { %v752_v25 = vshrl.u32 %v751_v41, 5  ;;  %v1158_v2 = vand.u32 2139095040, %v6376_v1  ;;  %v959_v57 = vsel %vm958_vm14, %v6387_v20, 0  ;;  %vm3898_vm4 = vcmp.lt.s32.totalorder %v6385_v40, 2 }
 0x2c5   : > { %v3877_v7 = vshrl.u32 %v3859_v8, %v3875_v0  ;;  %v3880_v47 = vadd.s32 127, %v3879_v50  ;;  %v754_v38 = vsub.s32 32, %v753_v59  ;;  %v756_v18 = vshll.u32 %v7786_v4, %v753_v59 }
 0x2c6   : > { %v759_v43 = vshll.u32 %v7765_v35, %v753_v59  ;;  %v762_v36 = vshll.u32 %v7766_v30, %v753_v59  ;;  %v765_v51 = vshll.u32 %v7785_v45, %v753_v59  ;;  %vm771_vm15 = vcmp.lt.s32.totalorder %v752_v25, 1 }
 0x2c7   : > { %v3878_v12 = vor.u32 %v3877_v7, %v3876_v52  ;;  %v3881_v23 = vshll.u32 %v3880_v47, 23  ;;  %v755_v56 = vshrl.u32 %v7786_v4, %v754_v38  ;;  %v757_v27 = vshrl.u32 %v7765_v35, %v754_v38 }
 0x2c8   : > { %v760_v5 = vshrl.u32 %v7766_v30, %v754_v38  ;;  %v763_v49 = vshrl.u32 %v7785_v45, %v754_v38  ;;  %v766_v50 = vshrl.u32 %v4696_v55, %v754_v38  ;;  %v768_v47 = vshll.u32 %v4696_v55, %v753_v59 }
 0x2c9   : > { %v3882_v39 = vor.u32 4788187, %v3881_v23  ;;  %v3885_v10 = vcvt.s32.f32 %v3878_v12  ;;  %v758_v8 = vor.u32 %v757_v27, %v756_v18  ;;  %vm772_vm0 = vcmp.lt.s32.totalorder %v752_v25, 2 }
 0x2ca   : > { %v4520_v9 = vpop.eup %4519  ;;  %v761_v0 = vor.u32 %v760_v5, %v759_v43  ;;  %v764_v7 = vor.u32 %v763_v49, %v762_v36  ;;  %v767_v41 = vor.u32 %v766_v50, %v765_v51  ;;  %vm773_vm1 = vcmp.lt.s32.totalorder %v752_v25, 3 }
 0x2cb   : > { %v4522_v3 = vpop.eup %4521  ;;  %v3695_v31 = vxor.u32 2147483648, %v4520_v9  ;;  %v3883_v13 = vand.u32 2147483647, %v3882_v39  ;;  %vm774_vm2 = vcmp.lt.s32.totalorder %v752_v25, 4  ;;  %v775_v22 = vsel %vm771_vm15, %v755_v56, %v758_v8  ;;  %v6416_v39 = vpop.f32.mrb[3].mxu1 }
 0x2cc   : > { %v3692_v6 = vxor.u32 2147483648, %v4522_v3  ;;  %v780_v18 = vsel %vm774_vm2, %v767_v41, 920167782  ;;  %v6437_v51 = vshrl.u32 %v959_v57, 5  ;;  %v6445_v50 = vshll.u32 %v955_v14, 8 }
 0x2cd   : > { %v3696_v21 = vsel %vm3694_vm12, %v3695_v31, %v4522_v3  ;;  %v3886_v52 = vmul.f32 %v3885_v10, %v3883_v13  ;;  %v776_v3 = vsel %vm774_vm2, %v764_v7, 2102212464  ;;  %v779_v31 = vsel %vm771_vm15, %v758_v8, %v761_v0  ;;  %v7808_v8 = vld [vmem:[#allocation9_spill] sm:$0xff] }
 0x2ce   : > { %v3693_v29 = vsel %vm3691_vm9, %v4520_v9, %v3692_v6  ;;  %v769_v9 = vshrl.u32 %v7768_v24, %v754_v38  ;;  %v777_v43 = vsel %vm773_vm1, %v761_v0, %v776_v3  ;;  %v781_v59 = vsel %vm773_vm1, %v764_v7, %v780_v18 }
 0x2cf   : > { %v3697_v17 = vsel %vm3690_vm10, %v3693_v29, %v3696_v21  ;;  %v3887_v12 = vxor.u32 2147483648, %v3886_v52  ;;  %v783_v6 = vsel %vm771_vm15, %v761_v0, %v764_v7  ;;  %v782_v10 = vsel %vm772_vm0, %v779_v31, %v781_v59 }
 0x2d0   : > { %v3698_v16 = vsel %vm3687_vm11, nan, %v3697_v17  ;;  %v770_v23 = vor.u32 %v769_v9, %v768_v47  ;;  %v1159_v21 = vshrl.u32 %v1158_v2, 23  ;;  %v778_v29 = vsel %vm772_vm0, %v775_v22, %v777_v43 }
 0x2d1   : > { %4023 = vst [vmem:[%s5295_s20 + $0xe0] sm:$0xff] %v3698_v16  ;;  %v3888_v62 = vsel %vm3805_vm6, %v3887_v12, %v3886_v52  ;;  %v6424_v27 = vmul.u32.u64.low %v6389_v46, %v782_v10  ;;  %v6425_v5 = vmul.u32.u64.high %v6389_v46, %v782_v10, %v6424_v27  ;;  %v961_v17 = vand.u32 31, %v959_v57 }
 0x2d2   : > { %v3891_v38 = vsel %vm6363_vm7, %v6117_v28, %v3888_v62  ;;  %v784_v36 = vsel %vm774_vm2, %v770_v23, 1326507024  ;;  %v6441_v0 = vmul.f32 %v7808_v8, %v6327_v37  ;;  %v6449_v25 = vand.u32 8388607, %v7747_v48 }
 0x2d3   : > { %4523 = vcosq.f32 %v3891_v38  ;;  %v785_v56 = vsel %vm773_vm1, %v767_v41, %v784_v36  ;;  %v794_v20 = vmul.u32 %v6389_v46, %v778_v29  ;;  %v797_v16 = vadd.s32 1, %v6425_v5 }
 0x2d4   : > { %4525 = vsinq.f32 %v3891_v38  ;;  %v786_v13 = vsel %vm772_vm0, %v783_v6, %v785_v56  ;;  %v962_v52 = vsub.s32 32, %v961_v17  ;;  %v4148_v7 = vadd.s32 4294967169, %v1159_v21 }
 0x2d5   : > { %v6434_v49 = vmul.u32.u64.low %v6389_v46, %v786_v13  ;;  %v6435_v2 = vmul.u32.u64.high %v6389_v46, %v786_v13, %v6434_v49  ;;  %v964_v47 = vshll.u32 %v7786_v4, %v961_v17  ;;  %v967_v63 = vshll.u32 %v7765_v35, %v961_v17 }
 0x2d6   : > { %v970_v14 = vshll.u32 %v7766_v30, %v961_v17  ;;  %v973_v41 = vshll.u32 %v7785_v45, %v961_v17  ;;  %v965_v46 = vshrl.u32 %v7765_v35, %v962_v52  ;;  %v976_v9 = vshll.u32 %v4696_v55, %v961_v17 }
 0x2d7   : > { %vm796_vm6 = vc.u32 %v6435_v2, %v6424_v27  ;;  %vm979_vm7 = vcmp.lt.s32.totalorder %v6437_v51, 1  ;;  %vm3895_vm8 = vweird.f32 %v6117_v28  ;;  %vm741_vm9 = vcmp.lt.s32.totalorder %v6342_v26, 0 }
 0x2d8   : > { %v798_v12 = vsel %vm796_vm6, %v797_v16, %v6425_v5  ;;  %v968_v22 = vshrl.u32 %v7766_v30, %v962_v52  ;;  %v971_v23 = vshrl.u32 %v7785_v45, %v962_v52  ;;  %v974_v3 = vshrl.u32 %v4696_v55, %v962_v52 }
 0x2d9   : > { %v799_v31 = vadd.s32 %v798_v12, %v794_v20  ;;  %v963_v18 = vshrl.u32 %v7786_v4, %v962_v52  ;;  %v966_v62 = vor.u32 %v965_v46, %v964_v47  ;;  %v977_v43 = vshrl.u32 %v7768_v24, %v962_v52 }
 0x2da   : > { %v969_v59 = vor.u32 %v968_v22, %v967_v63  ;;  %v972_v6 = vor.u32 %v971_v23, %v970_v14  ;;  %v975_v38 = vor.u32 %v974_v3, %v973_v41  ;;  %vm980_vm10 = vcmp.lt.s32.totalorder %v6437_v51, 2 }
 0x2db   : > { %v800_v36 = vadd.s32 536870912, %v799_v31  ;;  %v978_v21 = vor.u32 %v977_v43, %v976_v9  ;;  %vm981_vm11 = vcmp.lt.s32.totalorder %v6437_v51, 3  ;;  %vm982_vm12 = vcmp.lt.s32.totalorder %v6437_v51, 4 }
 0x2dc   : > { %v984_v29 = vsel %vm982_vm12, %v972_v6, 2102212464  ;;  %v987_v13 = vsel %vm979_vm7, %v966_v62, %v969_v59  ;;  %v988_v57 = vsel %vm982_vm12, %v975_v38, 920167782  ;;  %v983_v20 = vsel %vm979_vm7, %v963_v18, %v966_v62 }
 0x2dd   : > { %v4524_v10 = vpop.eup %4523  ;;  %v801_v17 = vshrl.u32 %v800_v36, 30  ;;  %v989_v16 = vsel %vm981_vm11, %v972_v6, %v988_v57  ;;  %v985_v47 = vsel %vm981_vm11, %v969_v59, %v984_v29  ;;  %v991_v14 = vsel %vm979_vm7, %v969_v59, %v972_v6  ;;  %v7809_v6 = vld [vmem:[#allocation13_spill] sm:$0xff] }
 0x2de   : > { %v4526_v56 = vpop.eup %4525  ;;  %v3903_v5 = vxor.u32 2147483648, %v4524_v10  ;;  %v990_v63 = vsel %vm980_vm10, %v987_v13, %v989_v16  ;;  %v992_v12 = vsel %vm982_vm12, %v978_v21, 1326507024  ;;  %vm6522_vm13 = vcmp.le.f32.partialorder %v739_v44, 0.7853982 }
 0x2df   : > { %v3900_v49 = vxor.u32 2147483648, %v4526_v56  ;;  %v802_v46 = vshll.u32 %v801_v17, 30  ;;  %v825_v9 = vsub.s32 4, %v801_v17  ;;  %v993_v23 = vsel %vm981_vm11, %v975_v38, %v992_v12 }
 0x2e0   : > { %v3904_v52 = vsel %vm3902_vm5, %v3903_v5, %v4526_v56  ;;  %v6503_v3 = vmul.u32.u64.low %v6445_v50, %v990_v63  ;;  %v6504_v18 = vmul.u32.u64.high %v6445_v50, %v990_v63, %v6503_v3  ;;  %v994_v40 = vsel %vm980_vm10, %v991_v14, %v993_v23 }
 0x2e1   : > { %v3901_v41 = vsel %vm3899_vm3, %v4524_v10, %v3900_v49  ;;  %v6509_v43 = vsub.s32 %v799_v31, %v802_v46  ;;  %v826_v59 = vsel %vm741_vm9, %v825_v9, %v801_v17  ;;  %v6518_v38 = vadd.f32 %v7809_v6, %v6441_v0  ;;  %v7812_v17 = vld [vmem:[#allocation10_spill] sm:$0xff] }
 0x2e2   : > { %v3905_v22 = vsel %vm3898_vm4, %v3901_v41, %v3904_v52  ;;  %v6527_v28 = vmul.u32.u64.low %v6445_v50, %v994_v40  ;;  %v6528_v31 = vmul.u32.u64.high %v6445_v50, %v994_v40, %v6527_v28  ;;  %v828_v21 = vsel %vm6522_vm13, 0, %v826_v59  ;;  %v7813_v52 = vld [vmem:[#allocation11_spill] sm:$0xff] }
 0x2e3   : > { %v3906_v62 = vsel %vm3895_vm8, nan, %v3905_v22  ;;  %v805_v36 = vsub.s32 0, %v6509_v43  ;;  %v1165_v56 = vadd.s32 1, %v4148_v7  ;;  %v986_v0 = vsel %vm980_vm10, %v983_v20, %v985_v47  ;;  %v7814_v47 = vld [vmem:[#allocation12_spill] sm:$0xff] }
 0x2e4   : > { %4025 = vst [vmem:[%s5295_s20 + $0xf0] sm:$0xff] %v3906_v62  ;;  %v1005_v5 = vadd.s32 1, %v6504_v18  ;;  %v1163_v29 = vor.u32 8388608, %v6449_v25  ;;  %v832_v13 = vadd.s32 3, %v828_v21  ;;  %vm1004_vm15 = vc.u32 %v6528_v31, %v6503_v3 }
 0x2e5   : > { %v4133_v44 = vmin.u32 %v805_v36, %v6509_v43  ;;  %vm1166_vm14 = vcmp.gt.s32.totalorder %v1165_v56, 0  ;;  %v7746_v49 = vand.u32 2147483647, %v6518_v38  ;;  %v6543_v7 = vmul.f32 %v7812_v17, %v6327_v37 }
 0x2e6   : > { %v1167_v57 = vsel %vm1166_vm14, %v1165_v56, 0  ;;  %v1002_v20 = vmul.u32 %v6445_v50, %v986_v0  ;;  %v1366_v16 = vand.u32 2139095040, %v6518_v38  ;;  %v6549_v25 = vmul.f32 %v7813_v52, %v6327_v37 }
 0x2e7   : > { %v807_v51 = vclz %v4133_v44  ;;  %v6553_v63 = vmul.f32 %v7814_v47, %v6327_v37  ;;  %v1006_v14 = vsel %vm1004_vm15, %v1005_v5, %v6504_v18  ;;  %v1169_v41 = vand.u32 31, %v1167_v57 }
 0x2e8   : > { %vm949_vm0 = vcmp.lt.s32.totalorder %v6355_v15, 0  ;;  %v1007_v9 = vadd.s32 %v1006_v14, %v1002_v20  ;;  %v6557_v12 = vshll.u32 %v1163_v29, 8  ;;  %v795_v50 = vadd.s32 %v6424_v27, %v6435_v2 }
 0x2e9   : > { %v4134_v46 = vadd.s32 4294967294, %v807_v51  ;;  %v6561_v22 = vand.u32 3, %v832_v13  ;;  %v1170_v23 = vsub.s32 32, %v1169_v41  ;;  %v6565_v62 = vand.u32 8388607, %v7746_v49 }
 0x2ea   : > { %vm6569_vm2 = vcmp.le.f32.partialorder %v947_v42, 0.7853982  ;;  %v1008_v59 = vadd.s32 536870912, %v1007_v9  ;;  %v6573_v40 = vshrl.u32 %v1167_v57, 5  ;;  %v1367_v28 = vshrl.u32 %v1366_v16, 23 }
 0x2eb   : > { %vm4135_vm1 = vcmp.lt.s32.totalorder %v4134_v46, 0  ;;  %v1172_v27 = vshll.u32 %v7786_v4, %v1169_v41  ;;  %v1175_v2 = vshll.u32 %v7765_v35, %v1169_v41  ;;  %v1178_v21 = vshll.u32 %v7766_v30, %v1169_v41 }
 0x2ec   : > { %v810_v36 = vsel %vm4135_vm1, 0, %v4134_v46  ;;  %v1009_v5 = vshrl.u32 %v1008_v59, 30  ;;  %v1173_v44 = vshrl.u32 %v7765_v35, %v1170_v23  ;;  %v1176_v29 = vshrl.u32 %v7766_v30, %v1170_v23 }
 0x2ed   : > { %v811_v56 = vsub.s32 32, %v810_v36  ;;  %v815_v0 = vsub.s32 4294967266, %v810_v36  ;;  %v812_v42 = vshll.u32 %v6509_v43, %v810_v36  ;;  %v1179_v13 = vshrl.u32 %v7785_v45, %v1170_v23 }
 0x2ee   : > { %v1182_v57 = vshrl.u32 %v4696_v55, %v1170_v23  ;;  %v1010_v16 = vshll.u32 %v1009_v5, 30  ;;  %v1033_v14 = vsub.s32 4, %v1009_v5  ;;  %v1181_v49 = vshll.u32 %v7785_v45, %v1169_v41 }
 0x2ef   : > { %v813_v51 = vshrl.u32 %v795_v50, %v811_v56  ;;  %v816_v20 = vadd.s32 127, %v815_v0  ;;  %v1180_v46 = vor.u32 %v1179_v13, %v1178_v21  ;;  %v1184_v48 = vshll.u32 %v4696_v55, %v1169_v41 }
 0x2f0   : > { %v1185_v59 = vshrl.u32 %v7768_v24, %v1170_v23  ;;  %v1011_v43 = vsub.s32 %v1007_v9, %v1010_v16  ;;  %v1034_v36 = vsel %vm949_vm0, %v1033_v14, %v1009_v5  ;;  %v1174_v6 = vor.u32 %v1173_v44, %v1172_v27 }
 0x2f1   : > { %v814_v47 = vor.u32 %v813_v51, %v812_v42  ;;  %v817_v52 = vshll.u32 %v816_v20, 23  ;;  %v1177_v17 = vor.u32 %v1176_v29, %v1175_v2  ;;  %v1183_v8 = vor.u32 %v1182_v57, %v1181_v49 }
 0x2f2   : > { %v1186_v50 = vor.u32 %v1185_v59, %v1184_v48  ;;  %v1013_v0 = vsub.s32 0, %v1011_v43  ;;  %v1171_v21 = vshrl.u32 %v7786_v4, %v1170_v23  ;;  %v4156_v13 = vadd.s32 4294967169, %v1367_v28 }
 0x2f3   : > { %v818_v56 = vor.u32 4788187, %v817_v52  ;;  %v1036_v41 = vsel %vm6569_vm2, 0, %v1034_v36  ;;  %vm1187_vm5 = vcmp.lt.s32.totalorder %v6573_v40, 1  ;;  %vm1188_vm3 = vcmp.lt.s32.totalorder %v6573_v40, 2 }
 0x2f4   : > { %vm1190_vm4 = vcmp.lt.s32.totalorder %v6573_v40, 4  ;;  %v821_v5 = vcvt.s32.f32 %v814_v47  ;;  %v4141_v27 = vmin.u32 %v1013_v0, %v1011_v43  ;;  %v1195_v49 = vsel %vm1187_vm5, %v1174_v6, %v1177_v17 }
 0x2f5   : > { %v819_v9 = vand.u32 2147483647, %v818_v56  ;;  %v1192_v2 = vsel %vm1190_vm4, %v1180_v46, 2102212464  ;;  %v1196_v48 = vsel %vm1190_vm4, %v1183_v8, 920167782  ;;  %v1199_v52 = vsel %vm1187_vm5, %v1177_v17, %v1180_v46 }
 0x2f6   : > { %v1200_v44 = vsel %vm1190_vm4, %v1186_v50, 1326507024  ;;  %v1015_v23 = vclz %v4141_v27  ;;  %vm1189_vm6 = vcmp.lt.s32.totalorder %v6573_v40, 3  ;;  %v1373_v28 = vadd.s32 1, %v4156_v13 }
 0x2f7   : > { %v822_v42 = vmul.f32 %v821_v5, %v819_v9  ;;  %v1191_v29 = vsel %vm1187_vm5, %v1171_v21, %v1174_v6  ;;  %v1193_v57 = vsel %vm1189_vm6, %v1177_v17, %v1192_v2  ;;  %v1197_v51 = vsel %vm1189_vm6, %v1180_v46, %v1196_v48 }
 0x2f8   : > { %v1201_v20 = vsel %vm1189_vm6, %v1183_v8, %v1200_v44  ;;  %v4142_v14 = vadd.s32 4294967294, %v1015_v23  ;;  %v1198_v47 = vsel %vm1188_vm3, %v1195_v49, %v1197_v51  ;;  %v1194_v6 = vsel %vm1188_vm3, %v1191_v29, %v1193_v57 }
 0x2f9   : > { %v823_v16 = vxor.u32 2147483648, %v822_v42  ;;  %v1202_v59 = vsel %vm1188_vm3, %v1199_v52, %v1201_v20  ;;  %v6604_v56 = vmul.u32.u64.low %v6557_v12, %v1198_v47  ;;  %v6605_v0 = vmul.u32.u64.high %v6557_v12, %v1198_v47, %v6604_v56 }
 0x2fa   : > { %v6600_v36 = vmul.u32.u64.low %v6557_v12, %v1202_v59  ;;  %v6601_v50 = vmul.u32.u64.high %v6557_v12, %v1202_v59, %v6600_v36  ;;  %vm4143_vm7 = vcmp.lt.s32.totalorder %v4142_v14, 0  ;;  %vm1374_vm8 = vcmp.gt.s32.totalorder %v1373_v28, 0 }
 0x2fb   : > { %v824_v8 = vsel %vm741_vm9, %v823_v16, %v822_v42  ;;  %v1003_v46 = vadd.s32 %v6503_v3, %v6528_v31  ;;  %v1018_v21 = vsel %vm4143_vm7, 0, %v4142_v14  ;;  %v1375_v13 = vsel %vm1374_vm8, %v1373_v28, 0  ;;  %v7817_v3 = vld [vmem:[#allocation14_spill] sm:$0xff] }
 0x2fc   : > { %v827_v17 = vsel %vm6522_vm13, %v6342_v26, %v824_v8  ;;  %v1019_v9 = vsub.s32 32, %v1018_v21  ;;  %v1023_v5 = vsub.s32 4294967266, %v1018_v21  ;;  %v1040_v27 = vadd.s32 3, %v1036_v41 }
 0x2fd   : > { %4527 = vcosq.f32 %v827_v17  ;;  %v1210_v2 = vmul.u32 %v6557_v12, %v1194_v6  ;;  %vm1212_vm9 = vc.u32 %v6601_v50, %v6604_v56  ;;  %v1213_v40 = vadd.s32 1, %v6605_v0 }
 0x2fe   : > { %4529 = vsinq.f32 %v827_v17  ;;  %v1020_v49 = vshll.u32 %v1011_v43, %v1018_v21  ;;  %v1021_v10 = vshrl.u32 %v1003_v46, %v1019_v9  ;;  %v1024_v48 = vadd.s32 127, %v1023_v5 }
 0x2ff   : > { %v1377_v52 = vand.u32 31, %v1375_v13  ;;  %v6623_v31 = vadd.f32 %v7817_v3, %v6543_v7  ;;  %v1214_v44 = vsel %vm1212_vm9, %v1213_v40, %v6605_v0  ;;  %v1371_v41 = vor.u32 8388608, %v6565_v62 }
 0x300   : > { %v1022_v42 = vor.u32 %v1021_v10, %v1020_v49  ;;  %v1025_v23 = vshll.u32 %v1024_v48, 23  ;;  %v1215_v12 = vadd.s32 %v1214_v44, %v1210_v2  ;;  %v6629_v29 = vadd.f32 %v5187_v11, %v6549_v25 }
 0x301   : > { %v1378_v28 = vsub.s32 32, %v1377_v52  ;;  %v6633_v43 = vadd.f32 %v5309_v58, %v6553_v63  ;;  %vm835_vm10 = vcmp.eq.s32.totalorder %v6561_v22, 0  ;;  %vm834_vm11 = vcmp.lt.s32.totalorder %v6561_v22, 2 }
 0x302   : > { %vm838_vm12 = vcmp.eq.s32.totalorder %v6561_v22, 2  ;;  %v1026_v7 = vor.u32 4788187, %v1025_v23  ;;  %v6638_v62 = vand.u32 3, %v1040_v27  ;;  %v1216_v57 = vadd.s32 536870912, %v1215_v12 }
 0x303   : > { %vm831_vm13 = vweird.f32 %v6342_v26  ;;  %v6641_v51 = vshrl.u32 %v1375_v13, 5  ;;  %v1380_v25 = vshll.u32 %v7786_v4, %v1377_v52  ;;  %v6644_v20 = vshll.u32 %v1371_v41, 8 }
 0x304   : > { %v1574_v63 = vand.u32 2139095040, %v6623_v31  ;;  %v1027_v16 = vand.u32 2147483647, %v1026_v7  ;;  %v1029_v14 = vcvt.s32.f32 %v1022_v42  ;;  %v6647_v47 = vshrl.u32 %v1216_v57, 30 }
 0x305   : > { %v1387_v59 = vshrl.u32 %v7785_v45, %v1378_v28  ;;  %v1381_v36 = vshrl.u32 %v7765_v35, %v1378_v28  ;;  %v1383_v0 = vshll.u32 %v7765_v35, %v1377_v52  ;;  %v1384_v8 = vshrl.u32 %v7766_v30, %v1378_v28 }
 0x306   : > { %v1390_v6 = vshrl.u32 %v4696_v55, %v1378_v28  ;;  %v1030_v46 = vmul.f32 %v1029_v14, %v1027_v16  ;;  %v1218_v21 = vshll.u32 %v6647_v47, 30  ;;  %v1386_v13 = vshll.u32 %v7766_v30, %v1377_v52 }
 0x307   : > { %v4528_v17 = vpop.eup %4527  ;;  %v1393_v9 = vshrl.u32 %v7768_v24, %v1378_v28  ;;  %v1379_v2 = vshrl.u32 %v7786_v4, %v1378_v28  ;;  %v1389_v40 = vshll.u32 %v7785_v45, %v1377_v52  ;;  %v1392_v49 = vshll.u32 %v4696_v55, %v1377_v52 }
 0x308   : > { %v4530_v5 = vpop.eup %4529  ;;  %v839_v27 = vxor.u32 2147483648, %v4528_v17  ;;  %v1031_v48 = vxor.u32 2147483648, %v1030_v46  ;;  %v6660_v44 = vsub.s32 %v1215_v12, %v1218_v21  ;;  %v1388_v41 = vor.u32 %v1387_v59, %v1386_v13 }
 0x309   : > { %v836_v10 = vxor.u32 2147483648, %v4530_v5  ;;  %v1382_v23 = vor.u32 %v1381_v36, %v1380_v25  ;;  %v1385_v7 = vor.u32 %v1384_v8, %v1383_v0  ;;  %v1391_v57 = vor.u32 %v1390_v6, %v1389_v40 }
 0x30a   : > { %v840_v42 = vsel %vm838_vm12, %v839_v27, %v4530_v5  ;;  %v1032_v28 = vsel %vm949_vm0, %v1031_v48, %v1030_v46  ;;  %v1221_v52 = vsub.s32 0, %v6660_v44  ;;  %v1394_v14 = vor.u32 %v1393_v9, %v1392_v49 }
 0x30b   : > { %v837_v16 = vsel %vm835_vm10, %v4528_v17, %v836_v10  ;;  %v1035_v59 = vsel %vm6569_vm2, %v6355_v15, %v1032_v28  ;;  %vm1395_vm14 = vcmp.lt.s32.totalorder %v6641_v51, 1  ;;  %vm1398_vm15 = vcmp.lt.s32.totalorder %v6641_v51, 4 }
 0x30c   : > { %v841_v12 = vsel %vm834_vm11, %v837_v16, %v840_v42  ;;  %4531 = vcosq.f32 %v1035_v59  ;;  %v4149_v36 = vmin.u32 %v1221_v52, %v6660_v44  ;;  %v1400_v0 = vsel %vm1398_vm15, %v1388_v41, 2102212464 }
 0x30d   : > { %v842_v25 = vsel %vm831_vm13, nan, %v841_v12  ;;  %4533 = vsinq.f32 %v1035_v59  ;;  %vm1396_vm0 = vcmp.lt.s32.totalorder %v6641_v51, 2  ;;  %v1403_v22 = vsel %vm1395_vm14, %v1382_v23, %v1385_v7 }
 0x30e   : > { %v1404_v18 = vsel %vm1398_vm15, %v1391_v57, 920167782  ;;  %2300 = vst [vmem:[%s5295_s20 + $0x8] sm:$0xff] %v842_v25  ;;  %v7818_v8 = vand.u32 2147483647, %v6376_v1  ;;  %v1223_v26 = vclz %v4149_v36  ;;  %vm1397_vm2 = vcmp.lt.s32.totalorder %v6641_v51, 3 }
 0x30f   : > { %v1399_v17 = vsel %vm1395_vm14, %v1379_v2, %v1382_v23  ;;  %v1407_v46 = vsel %vm1395_vm14, %v1385_v7, %v1388_v41  ;;  %v1401_v21 = vsel %vm1397_vm2, %v1385_v7, %v1400_v0  ;;  %v1405_v13 = vsel %vm1397_vm2, %v1388_v41, %v1404_v18 }
 0x310   : > { %vm6687_vm1 = vcmp.le.f32.partialorder %v7818_v8, 0.7853982  ;;  %v1408_v9 = vsel %vm1398_vm15, %v1394_v14, 1326507024  ;;  %v1575_v5 = vshrl.u32 %v1574_v63, 23  ;;  %v4150_v27 = vadd.s32 4294967294, %v1223_v26 }
 0x311   : > { %v1241_v40 = vsub.s32 4, %v6647_v47  ;;  %v1406_v49 = vsel %vm1396_vm0, %v1403_v22, %v1405_v13  ;;  %v1409_v10 = vsel %vm1397_vm2, %v1391_v57, %v1408_v9  ;;  %v1402_v63 = vsel %vm1396_vm0, %v1399_v17, %v1401_v21 }
 0x312   : > { %v1410_v48 = vsel %vm1396_vm0, %v1407_v46, %v1409_v10  ;;  %v6700_v42 = vmul.u32.u64.low %v6644_v20, %v1406_v49  ;;  %v6701_v2 = vmul.u32.u64.high %v6644_v20, %v1406_v49, %v6700_v42  ;;  %v4164_v41 = vadd.s32 4294967169, %v1575_v5 }
 0x313   : > { %vm4151_vm5 = vcmp.lt.s32.totalorder %v4150_v27, 0  ;;  %v6707_v23 = vmul.u32.u64.low %v6644_v20, %v1410_v48  ;;  %v6708_v7 = vmul.u32.u64.high %v6644_v20, %v1410_v48, %v6707_v23  ;;  %vm1157_vm3 = vcmp.lt.s32.totalorder %v6376_v1, 0 }
 0x314   : > { %v1226_v57 = vsel %vm4151_vm5, 0, %v4150_v27  ;;  %v1571_v16 = vand.u32 2147483647, %v6623_v31  ;;  %v1581_v28 = vadd.s32 1, %v4164_v41  ;;  %v1211_v52 = vadd.s32 %v6604_v56, %v6601_v50 }
 0x315   : > { %v1227_v14 = vsub.s32 32, %v1226_v57  ;;  %v1231_v12 = vsub.s32 4294967266, %v1226_v57  ;;  %v1242_v51 = vsel %vm1157_vm3, %v1241_v40, %v6647_v47  ;;  %vm1046_vm4 = vcmp.eq.s32.totalorder %v6638_v62, 2 }
 0x316   : > { %v1418_v59 = vmul.u32 %v6644_v20, %v1402_v63  ;;  %v1421_v25 = vadd.s32 1, %v6701_v2  ;;  %vm1582_vm6 = vcmp.gt.s32.totalorder %v1581_v28, 0  ;;  %v4532_v36 = vpop.eup %4531  ;;  %v1228_v0 = vshll.u32 %v6660_v44, %v1226_v57 }
 0x317   : > { %v1229_v22 = vshrl.u32 %v1211_v52, %v1227_v14  ;;  %v1232_v18 = vadd.s32 127, %v1231_v12  ;;  %vm1420_vm7 = vc.u32 %v6708_v7, %v6700_v42  ;;  %v4534_v50 = vpop.eup %4533  ;;  %v1047_v56 = vxor.u32 2147483648, %v4532_v36 }
 0x318   : > { %v1244_v47 = vsel %vm6687_vm1, 0, %v1242_v51  ;;  %v1422_v8 = vsel %vm1420_vm7, %v1421_v25, %v6701_v2  ;;  %v1583_v26 = vsel %vm1582_vm6, %v1581_v28, 0  ;;  %v1044_v20 = vxor.u32 2147483648, %v4534_v50 }
 0x319   : > { %v1230_v17 = vor.u32 %v1229_v22, %v1228_v0  ;;  %v1233_v46 = vshll.u32 %v1232_v18, 23  ;;  %v1423_v21 = vadd.s32 %v1422_v8, %v1418_v59  ;;  %vm1043_vm8 = vcmp.eq.s32.totalorder %v6638_v62, 0 }
 0x31a   : > { %v1048_v44 = vsel %vm1046_vm4, %v1047_v56, %v4534_v50  ;;  %v1578_v13 = vand.u32 8388607, %v1571_v16  ;;  %v1585_v9 = vand.u32 31, %v1583_v26  ;;  %vm1042_vm9 = vcmp.lt.s32.totalorder %v6638_v62, 2 }
 0x31b   : > { %v1045_v5 = vsel %vm1043_vm8, %v4532_v36, %v1044_v20  ;;  %v1234_v27 = vor.u32 4788187, %v1233_v46  ;;  %v1424_v40 = vadd.s32 536870912, %v1423_v21  ;;  %vm1039_vm10 = vweird.f32 %v6355_v15 }
 0x31c   : > { %v1049_v49 = vsel %vm1042_vm9, %v1045_v5, %v1048_v44  ;;  %v1248_v10 = vadd.s32 3, %v1244_v47  ;;  %v1586_v48 = vsub.s32 32, %v1585_v9  ;;  %v1237_v63 = vcvt.s32.f32 %v1230_v17 }
 0x31d   : > { %v1050_v2 = vsel %vm1039_vm10, nan, %v1049_v49  ;;  %v1235_v41 = vand.u32 2147483647, %v1234_v27  ;;  %v6733_v23 = vshrl.u32 %v1424_v40, 30  ;;  %v1579_v57 = vor.u32 8388608, %v1578_v13 }
 0x31e   : > { %v1589_v28 = vshrl.u32 %v7765_v35, %v1586_v48  ;;  %v1592_v52 = vshrl.u32 %v7766_v30, %v1586_v48  ;;  %v1595_v62 = vshrl.u32 %v7785_v45, %v1586_v48  ;;  %2302 = vst [vmem:[%s5295_s20 + $0x18] sm:$0xff] %v1050_v2  ;;  %v1588_v15 = vshll.u32 %v7786_v4, %v1585_v9 }
 0x31f   : > { %v1238_v14 = vmul.f32 %v1237_v63, %v1235_v41  ;;  %v1426_v12 = vshll.u32 %v6733_v23, 30  ;;  %v1591_v51 = vshll.u32 %v7765_v35, %v1585_v9  ;;  %v1584_v59 = vshrl.u32 %v1583_v26, 5 }
 0x320   : > { %v1594_v25 = vshll.u32 %v7766_v30, %v1585_v9  ;;  %v1597_v36 = vshll.u32 %v7785_v45, %v1585_v9  ;;  %v1598_v0 = vshrl.u32 %v4696_v55, %v1586_v48  ;;  %v1590_v50 = vor.u32 %v1589_v28, %v1588_v15 }
 0x321   : > { %v1239_v22 = vxor.u32 2147483648, %v1238_v14  ;;  %v6745_v18 = vsub.s32 %v1423_v21, %v1426_v12  ;;  %v1593_v56 = vor.u32 %v1592_v52, %v1591_v51  ;;  %v1600_v20 = vshll.u32 %v4696_v55, %v1585_v9 }
 0x322   : > { %v1596_v47 = vor.u32 %v1595_v62, %v1594_v25  ;;  %v1599_v8 = vor.u32 %v1598_v0, %v1597_v36  ;;  %v1601_v17 = vshrl.u32 %v7768_v24, %v1586_v48  ;;  %v6751_v46 = vand.u32 3, %v1248_v10 }
 0x323   : > { %v1240_v26 = vsel %vm1157_vm3, %v1239_v22, %v1238_v14  ;;  %v1429_v44 = vsub.s32 0, %v6745_v18  ;;  %v1619_v13 = vshll.u32 %v1579_v57, 8  ;;  %v1587_v5 = vshrl.u32 %v7786_v4, %v1586_v48 }
 0x324   : > { %v1243_v21 = vsel %vm6687_vm1, %v6376_v1, %v1240_v26  ;;  %v1602_v27 = vor.u32 %v1601_v17, %v1600_v20  ;;  %v1782_v40 = vand.u32 2139095040, %v6629_v29  ;;  %vm1603_vm11 = vcmp.lt.s32.totalorder %v1584_v59, 1 }
 0x325   : > { %4535 = vcosq.f32 %v1243_v21  ;;  %v4157_v9 = vmin.u32 %v1429_v44, %v6745_v18  ;;  %vm1606_vm12 = vcmp.lt.s32.totalorder %v1584_v59, 4  ;;  %v1611_v10 = vsel %vm1603_vm11, %v1590_v50, %v1593_v56 }
 0x326   : > { %4537 = vsinq.f32 %v1243_v21  ;;  %v1608_v49 = vsel %vm1606_vm12, %v1596_v47, 2102212464  ;;  %v1612_v2 = vsel %vm1606_vm12, %v1599_v8, 920167782  ;;  %vm1604_vm13 = vcmp.lt.s32.totalorder %v1584_v59, 2 }
 0x327   : > { %v1431_v41 = vclz %v4157_v9  ;;  %vm1605_vm14 = vcmp.lt.s32.totalorder %v1584_v59, 3  ;;  %v1607_v63 = vsel %vm1603_vm11, %v1587_v5, %v1590_v50  ;;  %v1615_v28 = vsel %vm1603_vm11, %v1593_v56, %v1596_v47 }
 0x328   : > { %v1609_v6 = vsel %vm1605_vm14, %v1593_v56, %v1608_v49  ;;  %v1613_v57 = vsel %vm1605_vm14, %v1596_v47, %v1612_v2  ;;  %v1616_v48 = vsel %vm1606_vm12, %v1602_v27, 1326507024  ;;  %v1449_v62 = vsub.s32 4, %v6733_v23 }
 0x329   : > { %v4158_v52 = vadd.s32 4294967294, %v1431_v41  ;;  %v1614_v14 = vsel %vm1604_vm13, %v1611_v10, %v1613_v57  ;;  %v1617_v12 = vsel %vm1605_vm14, %v1599_v8, %v1616_v48  ;;  %v1610_v15 = vsel %vm1604_vm13, %v1607_v63, %v1609_v6 }
 0x32a   : > { %v1618_v51 = vsel %vm1604_vm13, %v1615_v28, %v1617_v12  ;;  %v6761_v25 = vmul.u32.u64.low %v1619_v13, %v1614_v14  ;;  %v6762_v36 = vmul.u32.u64.high %v1619_v13, %v1614_v14, %v6761_v25  ;;  %v1783_v59 = vshrl.u32 %v1782_v40, 23  ;;  %v486_v14 = vld [vmem:[#allocation2 + $0x8] sm:$0xff] }
 0x32b   : > { %vm4159_vm15 = vcmp.lt.s32.totalorder %v4158_v52, 0  ;;  %v6765_v0 = vmul.u32.u64.low %v1619_v13, %v1618_v51  ;;  %v6766_v22 = vmul.u32.u64.high %v1619_v13, %v1618_v51, %v6765_v0  ;;  %vm1247_vm0 = vweird.f32 %v6376_v1 }
 0x32c   : > { %v7821_v50 = vand.u32 2147483647, %v6518_v38  ;;  %vm1365_vm2 = vcmp.lt.s32.totalorder %v6518_v38, 0  ;;  %v1419_v47 = vadd.s32 %v6700_v42, %v6708_v7  ;;  %v1434_v8 = vsel %vm4159_vm15, 0, %v4158_v52 }
 0x32d   : > { %v1435_v20 = vsub.s32 32, %v1434_v8  ;;  %v1439_v17 = vsub.s32 4294967266, %v1434_v8  ;;  %v1450_v26 = vsel %vm1365_vm2, %v1449_v62, %v6733_v23  ;;  %v4172_v44 = vadd.s32 4294967169, %v1783_v59 }
 0x32e   : > { %vm6771_vm1 = vcmp.le.f32.partialorder %v7821_v50, 0.7853982  ;;  %vm1254_vm5 = vcmp.eq.s32.totalorder %v6751_v46, 2  ;;  %v1626_v21 = vmul.u32 %v1619_v13, %v1610_v15  ;;  %v1629_v5 = vadd.s32 1, %v6762_v36 }
 0x32f   : > { %v1779_v27 = vand.u32 2147483647, %v6629_v29  ;;  %v4536_v40 = vpop.eup %4535  ;;  %v1436_v9 = vshll.u32 %v6745_v18, %v1434_v8  ;;  %v1437_v49 = vshrl.u32 %v1419_v47, %v1435_v20  ;;  %v1440_v42 = vadd.s32 127, %v1439_v17  ;;  %v7824_v8 = vld [vmem:[#allocation8_spill] sm:$0xff] }
 0x330   : > { %vm1628_vm3 = vc.u32 %v6766_v22, %v6761_v25  ;;  %v4538_v7 = vpop.eup %4537  ;;  %v1255_v10 = vxor.u32 2147483648, %v4536_v40  ;;  %v1452_v23 = vsel %vm6771_vm1, 0, %v1450_v26  ;;  %v1789_v13 = vadd.s32 1, %v4172_v44 }
 0x331   : > { %v1630_v2 = vsel %vm1628_vm3, %v1629_v5, %v6762_v36  ;;  %v1252_v41 = vxor.u32 2147483648, %v4538_v7  ;;  %v1438_v63 = vor.u32 %v1437_v49, %v1436_v9  ;;  %v1441_v6 = vshll.u32 %v1440_v42, 23 }
 0x332   : > { %v1631_v57 = vadd.s32 %v1630_v2, %v1626_v21  ;;  %vm1250_vm4 = vcmp.lt.s32.totalorder %v6751_v46, 2  ;;  %vm1251_vm6 = vcmp.eq.s32.totalorder %v6751_v46, 0  ;;  %v1256_v18 = vsel %vm1254_vm5, %v1255_v10, %v4538_v7 }
 0x333   : > { %vm1790_vm7 = vcmp.gt.s32.totalorder %v1789_v13, 0  ;;  %v1253_v28 = vsel %vm1251_vm6, %v4536_v40, %v1252_v41  ;;  %v1442_v48 = vor.u32 4788187, %v1441_v6  ;;  %v1456_v52 = vadd.s32 3, %v1452_v23 }
 0x334   : > { %v1632_v62 = vadd.s32 536870912, %v1631_v57  ;;  %v1257_v12 = vsel %vm1250_vm4, %v1253_v28, %v1256_v18  ;;  %v1786_v15 = vand.u32 8388607, %v1779_v27  ;;  %v1791_v51 = vsel %vm1790_vm7, %v1789_v13, 0 }
 0x335   : > { %v1990_v36 = vand.u32 2139095040, %v6633_v43  ;;  %v1258_v0 = vsel %vm1247_vm0, nan, %v1257_v12  ;;  %v1443_v59 = vand.u32 2147483647, %v1442_v48  ;;  %v1445_v46 = vcvt.s32.f32 %v1438_v63 }
 0x336   : > { %v6799_v50 = vshrl.u32 %v1632_v62, 30  ;;  %v1793_v47 = vand.u32 31, %v1791_v51  ;;  %2304 = vst [vmem:[%s5295_s20 + $0x28] sm:$0xff] %v1258_v0  ;;  %v6803_v20 = vmul.f32 %v486_v14, %v7824_v8  ;;  %v6808_v44 = vmul.f32 %v4931_v53, %v6327_v37 }
 0x337   : > { %v1446_v17 = vmul.f32 %v1445_v46, %v1443_v59  ;;  %v6810_v21 = vand.u32 3, %v1456_v52  ;;  %v1787_v1 = vor.u32 8388608, %v1786_v15  ;;  %v6814_v49 = vshrl.u32 %v1791_v51, 5 }
 0x338   : > { %v1634_v26 = vshll.u32 %v6799_v50, 30  ;;  %v1794_v5 = vsub.s32 32, %v1793_v47  ;;  %v1991_v42 = vshrl.u32 %v1990_v36, 23  ;;  %v1796_v7 = vshll.u32 %v7786_v4, %v1793_v47 }
 0x339   : > { %v1447_v40 = vxor.u32 2147483648, %v1446_v17  ;;  %v1799_v23 = vshll.u32 %v7765_v35, %v1793_v47  ;;  %v1802_v41 = vshll.u32 %v7766_v30, %v1793_v47  ;;  %v1805_v18 = vshll.u32 %v7785_v45, %v1793_v47 }
 0x33a   : > { %v6812_v9 = vsub.s32 %v1631_v57, %v1634_v26  ;;  %v1797_v10 = vshrl.u32 %v7765_v35, %v1794_v5  ;;  %v1800_v2 = vshrl.u32 %v7766_v30, %v1794_v5  ;;  %v1803_v63 = vshrl.u32 %v7785_v45, %v1794_v5 }
 0x33b   : > { %v1448_v37 = vsel %vm1365_vm2, %v1447_v40, %v1446_v17  ;;  %v1806_v28 = vshrl.u32 %v4696_v55, %v1794_v5  ;;  %v1808_v12 = vshll.u32 %v4696_v55, %v1793_v47  ;;  %v1809_v15 = vshrl.u32 %v7768_v24, %v1794_v5 }
 0x33c   : > { %v1637_v13 = vsub.s32 0, %v6812_v9  ;;  %v1451_v6 = vsel %vm6771_vm1, %v6518_v38, %v1448_v37  ;;  %v1798_v57 = vor.u32 %v1797_v10, %v1796_v7  ;;  %v1801_v52 = vor.u32 %v1800_v2, %v1799_v23 }
 0x33d   : > { %4539 = vcosq.f32 %v1451_v6  ;;  %v1804_v62 = vor.u32 %v1803_v63, %v1802_v41  ;;  %v1807_v14 = vor.u32 %v1806_v28, %v1805_v18  ;;  %v1627_v56 = vadd.s32 %v6761_v25, %v6766_v22 }
 0x33e   : > { %v4165_v48 = vmin.u32 %v1637_v13, %v6812_v9  ;;  %4541 = vsinq.f32 %v1451_v6  ;;  %v6835_v36 = vshll.u32 %v1787_v1, 8  ;;  %v4180_v0 = vadd.s32 4294967169, %v1991_v42 }
 0x33f   : > { %v1657_v59 = vsub.s32 4, %v6799_v50  ;;  %v1795_v46 = vshrl.u32 %v7786_v4, %v1794_v5  ;;  %v1810_v8 = vor.u32 %v1809_v15, %v1808_v12  ;;  %vm1811_vm8 = vcmp.lt.s32.totalorder %v6814_v49, 1 }
 0x340   : > { %v1639_v51 = vclz %v4165_v48  ;;  %vm1573_vm9 = vcmp.lt.s32.totalorder %v6623_v31, 0  ;;  %vm1813_vm10 = vcmp.lt.s32.totalorder %v6814_v49, 3  ;;  %vm1814_vm11 = vcmp.lt.s32.totalorder %v6814_v49, 4 }
 0x341   : > { %v1819_v25 = vsel %vm1811_vm8, %v1798_v57, %v1801_v52  ;;  %vm1459_vm12 = vcmp.eq.s32.totalorder %v6810_v21, 0  ;;  %v1816_v22 = vsel %vm1814_vm11, %v1804_v62, 2102212464  ;;  %v1820_v47 = vsel %vm1814_vm11, %v1807_v14, 920167782 }
 0x342   : > { %v4166_v17 = vadd.s32 4294967294, %v1639_v51  ;;  %v1823_v26 = vsel %vm1811_vm8, %v1801_v52, %v1804_v62  ;;  %v1824_v1 = vsel %vm1814_vm11, %v1810_v8, 1326507024  ;;  %vm1458_vm13 = vcmp.lt.s32.totalorder %v6810_v21, 2 }
 0x343   : > { %vm1812_vm15 = vcmp.lt.s32.totalorder %v6814_v49, 2  ;;  %v1821_v5 = vsel %vm1813_vm10, %v1804_v62, %v1820_v47  ;;  %v1825_v40 = vsel %vm1813_vm10, %v1807_v14, %v1824_v1  ;;  %vm1455_vm0 = vweird.f32 %v6518_v38 }
 0x344   : > { %vm4167_vm14 = vcmp.lt.s32.totalorder %v4166_v17, 0  ;;  %v1815_v7 = vsel %vm1811_vm8, %v1795_v46, %v1798_v57  ;;  %v1822_v10 = vsel %vm1812_vm15, %v1819_v25, %v1821_v5  ;;  %v1826_v23 = vsel %vm1812_vm15, %v1823_v26, %v1825_v40 }
 0x345   : > { %v1642_v42 = vsel %vm4167_vm14, 0, %v4166_v17  ;;  %vm6863_vm1 = vcmp.le.f32.partialorder %v1571_v16, 0.7853982  ;;  %v1817_v41 = vsel %vm1813_vm10, %v1801_v52, %v1816_v22  ;;  %v1997_v63 = vadd.s32 1, %v4180_v0 }
 0x346   : > { %v1643_v37 = vsub.s32 32, %v1642_v42  ;;  %v1647_v13 = vsub.s32 4294967266, %v1642_v42  ;;  %v6870_v6 = vmul.u32.u64.low %v6835_v36, %v1826_v23  ;;  %v6871_v57 = vmul.u32.u64.high %v6835_v36, %v1826_v23, %v6870_v6 }
 0x347   : > { %v6874_v18 = vmul.u32.u64.low %v6835_v36, %v1822_v10  ;;  %v6875_v28 = vmul.u32.u64.high %v6835_v36, %v1822_v10, %v6874_v18  ;;  %v4540_v48 = vpop.eup %4539  ;;  %v1644_v16 = vshll.u32 %v6812_v9, %v1642_v42  ;;  %vm1998_vm2 = vcmp.gt.s32.totalorder %v1997_v63, 0 }
 0x348   : > { %v1645_v62 = vshrl.u32 %v1627_v56, %v1643_v37  ;;  %v1648_v14 = vadd.s32 127, %v1647_v13  ;;  %v4542_v12 = vpop.eup %4541  ;;  %v1463_v15 = vxor.u32 2147483648, %v4540_v48  ;;  %v1818_v52 = vsel %vm1812_vm15, %v1815_v7, %v1817_v41 }
 0x349   : > { %v1987_v51 = vand.u32 2147483647, %v6633_v43  ;;  %v1999_v0 = vsel %vm1998_vm2, %v1997_v63, 0  ;;  %v1460_v46 = vxor.u32 2147483648, %v4542_v12  ;;  %vm1462_vm5 = vcmp.eq.s32.totalorder %v6810_v21, 2 }
 0x34a   : > { %v1646_v8 = vor.u32 %v1645_v62, %v1644_v16  ;;  %v1649_v17 = vshll.u32 %v1648_v14, 23  ;;  %v1464_v25 = vsel %vm1462_vm5, %v1463_v15, %v4542_v12  ;;  %v1658_v9 = vsel %vm1573_vm9, %v1657_v59, %v6799_v50 }
 0x34b   : > { %vm1836_vm3 = vc.u32 %v6871_v57, %v6874_v18  ;;  %v1837_v56 = vadd.s32 1, %v6875_v28  ;;  %v1461_v49 = vsel %vm1459_vm12, %v4540_v48, %v1460_v46  ;;  %v1834_v47 = vmul.u32 %v6835_v36, %v1818_v52 }
 0x34c   : > { %v1650_v22 = vor.u32 4788187, %v1649_v17  ;;  %v2001_v26 = vand.u32 31, %v1999_v0  ;;  %v1465_v1 = vsel %vm1458_vm13, %v1461_v49, %v1464_v25  ;;  %v1653_v5 = vcvt.s32.f32 %v1646_v8 }
 0x34d   : > { %v1838_v40 = vsel %vm1836_vm3, %v1837_v56, %v6875_v28  ;;  %v1994_v50 = vand.u32 8388607, %v1987_v51  ;;  %v1466_v59 = vsel %vm1455_vm0, nan, %v1465_v1  ;;  %v1660_v23 = vsel %vm6863_vm1, 0, %v1658_v9 }
 0x34e   : > { %v1651_v42 = vand.u32 2147483647, %v1650_v22  ;;  %v1839_v7 = vadd.s32 %v1838_v40, %v1834_v47  ;;  %v2002_v10 = vsub.s32 32, %v2001_v26  ;;  %v6901_v36 = vshrl.u32 %v1999_v0, 5  ;;  %2306 = vst [vmem:[%s5295_s20 + $0x38] sm:$0xff] %v1466_v59 }
 0x34f   : > { %v2004_v21 = vshll.u32 %v7786_v4, %v2001_v26  ;;  %v2007_v37 = vshll.u32 %v7765_v35, %v2001_v26  ;;  %v2010_v38 = vshll.u32 %v7766_v30, %v2001_v26  ;;  %v2013_v48 = vshll.u32 %v7785_v45, %v2001_v26 }
 0x350   : > { %v1654_v13 = vmul.f32 %v1653_v5, %v1651_v42  ;;  %v1840_v41 = vadd.s32 536870912, %v1839_v7  ;;  %v2005_v63 = vshrl.u32 %v7765_v35, %v2002_v10  ;;  %v2008_v6 = vshrl.u32 %v7766_v30, %v2002_v10 }
 0x351   : > { %v2011_v28 = vshrl.u32 %v7785_v45, %v2002_v10  ;;  %v2014_v16 = vshrl.u32 %v4696_v55, %v2002_v10  ;;  %v2017_v15 = vshrl.u32 %v7768_v24, %v2002_v10  ;;  %v6917_v52 = vadd.f32 %v5464_v19, %v6808_v44 }
 0x352   : > { %v1655_v62 = vxor.u32 2147483648, %v1654_v13  ;;  %v6912_v14 = vshrl.u32 %v1840_v41, 30  ;;  %v2006_v12 = vor.u32 %v2005_v63, %v2004_v21  ;;  %v2009_v0 = vor.u32 %v2008_v6, %v2007_v37 }
 0x353   : > { %v2015_v46 = vor.u32 %v2014_v16, %v2013_v48  ;;  %v2016_v8 = vshll.u32 %v4696_v55, %v2001_v26  ;;  %v1995_v9 = vor.u32 8388608, %v1994_v50  ;;  %v2012_v56 = vor.u32 %v2011_v28, %v2010_v38  ;;  %v488_v48 = vld [vmem:[#allocation2 + $0x18] sm:$0xff] }
 0x354   : > { %v1656_v17 = vsel %vm1573_vm9, %v1655_v62, %v1654_v13  ;;  %v1842_v25 = vshll.u32 %v6912_v14, 30  ;;  %v1664_v22 = vadd.s32 3, %v1660_v23  ;;  %vm2019_vm4 = vcmp.lt.s32.totalorder %v6901_v36, 1 }
 0x355   : > { %v1659_v49 = vsel %vm6863_vm1, %v6623_v31, %v1656_v17  ;;  %v2018_v47 = vor.u32 %v2017_v15, %v2016_v8  ;;  %vm2022_vm6 = vcmp.lt.s32.totalorder %v6901_v36, 4  ;;  %v2027_v26 = vsel %vm2019_vm4, %v2006_v12, %v2009_v0 }
 0x356   : > { %4543 = vcosq.f32 %v1659_v49  ;;  %v6927_v44 = vsub.s32 %v1839_v7, %v1842_v25  ;;  %vm2021_vm7 = vcmp.lt.s32.totalorder %v6901_v36, 3  ;;  %v2028_v1 = vsel %vm2022_vm6, %v2015_v46, 920167782 }
 0x357   : > { %4545 = vsinq.f32 %v1659_v49  ;;  %v2198_v5 = vand.u32 2139095040, %v6917_v52  ;;  %vm2020_vm8 = vcmp.lt.s32.totalorder %v6901_v36, 2  ;;  %v2029_v40 = vsel %vm2021_vm7, %v2012_v56, %v2028_v1 }
 0x358   : > { %v1845_v2 = vsub.s32 0, %v6927_v44  ;;  %v2035_v50 = vshll.u32 %v1995_v9, 8  ;;  %v2024_v59 = vsel %vm2022_vm6, %v2012_v56, 2102212464  ;;  %v2030_v42 = vsel %vm2020_vm8, %v2027_v26, %v2029_v40 }
 0x359   : > { %v2031_v7 = vsel %vm2019_vm4, %v2009_v0, %v2012_v56  ;;  %v2032_v23 = vsel %vm2022_vm6, %v2018_v47, 1326507024  ;;  %v1665_v21 = vand.u32 3, %v1664_v22  ;;  %v2003_v13 = vshrl.u32 %v7786_v4, %v2002_v10 }
 0x35a   : > { %v4173_v37 = vmin.u32 %v1845_v2, %v6927_v44  ;;  %v2033_v41 = vsel %vm2021_vm7, %v2015_v46, %v2032_v23  ;;  %v6948_v38 = vmul.u32.u64.low %v2035_v50, %v2030_v42  ;;  %v6949_v6 = vmul.u32.u64.high %v2035_v50, %v2030_v42, %v6948_v38 }
 0x35b   : > { %v2034_v63 = vsel %vm2020_vm8, %v2031_v7, %v2033_v41  ;;  %v2199_v28 = vshrl.u32 %v2198_v5, 23  ;;  %vm1781_vm9 = vcmp.lt.s32.totalorder %v6629_v29, 0  ;;  %v2023_v62 = vsel %vm2019_vm4, %v2003_v13, %v2006_v12 }
 0x35c   : > { %v1847_v16 = vclz %v4173_v37  ;;  %v2025_v10 = vsel %vm2021_vm7, %v2009_v0, %v2024_v59  ;;  %v1865_v15 = vsub.s32 4, %v6912_v14  ;;  %vm1666_vm10 = vcmp.lt.s32.totalorder %v1665_v21, 2 }
 0x35d   : > { %v6958_v46 = vmul.u32.u64.low %v2035_v50, %v2034_v63  ;;  %v6959_v8 = vmul.u32.u64.high %v2035_v50, %v2034_v63, %v6958_v46  ;;  %v4188_v17 = vadd.s32 4294967169, %v2199_v28  ;;  %vm1667_vm11 = vcmp.eq.s32.totalorder %v1665_v21, 0 }
 0x35e   : > { %v4174_v25 = vadd.s32 4294967294, %v1847_v16  ;;  %v492_v9 = vmul.f32 %v488_v48, %v6416_v39  ;;  %vm1670_vm12 = vcmp.eq.s32.totalorder %v1665_v21, 2  ;;  %v2026_v56 = vsel %vm2020_vm8, %v2023_v62, %v2025_v10 }
 0x35f   : > { %v2045_v12 = vadd.s32 1, %v6949_v6  ;;  %v2205_v49 = vadd.s32 1, %v4188_v17  ;;  %v1835_v0 = vadd.s32 %v6874_v18, %v6871_v57  ;;  %v2195_v47 = vand.u32 2147483647, %v6917_v52 }
 0x360   : > { %v4544_v22 = vpop.eup %4543  ;;  %vm4175_vm13 = vcmp.lt.s32.totalorder %v4174_v25, 0  ;;  %v6969_v26 = vadd.f32 %v492_v9, %v6803_v20  ;;  %v1866_v36 = vsel %vm1781_vm9, %v1865_v15, %v6912_v14  ;;  %vm2044_vm14 = vc.u32 %v6959_v8, %v6948_v38 }
 0x361   : > { %v4546_v1 = vpop.eup %4545  ;;  %v1671_v5 = vxor.u32 2147483648, %v4544_v22  ;;  %v1850_v39 = vsel %vm4175_vm13, 0, %v4174_v25  ;;  %v2042_v57 = vmul.u32 %v2035_v50, %v2026_v56  ;;  %v2046_v20 = vsel %vm2044_vm14, %v2045_v12, %v6949_v6 }
 0x362   : > { %v1668_v2 = vxor.u32 2147483648, %v4546_v1  ;;  %v1851_v40 = vsub.s32 32, %v1850_v39  ;;  %v1855_v59 = vsub.s32 4294967266, %v1850_v39  ;;  %v1852_v42 = vshll.u32 %v6927_v44, %v1850_v39 }
 0x363   : > { %v1672_v18 = vsel %vm1670_vm12, %v1671_v5, %v4546_v1  ;;  %vm2206_vm15 = vcmp.gt.s32.totalorder %v2205_v49, 0  ;;  %v2047_v14 = vadd.s32 %v2046_v20, %v2042_v57  ;;  %vm1663_vm0 = vweird.f32 %v6623_v31 }
 0x364   : > { %v1669_v7 = vsel %vm1667_vm11, %v4544_v22, %v1668_v2  ;;  %v1853_v23 = vshrl.u32 %v1835_v0, %v1851_v40  ;;  %v1856_v37 = vadd.s32 127, %v1855_v59  ;;  %vm6984_vm1 = vcmp.le.f32.partialorder %v1779_v27, 0.7853982 }
 0x365   : > { %v1673_v13 = vsel %vm1666_vm10, %v1669_v7, %v1672_v18  ;;  %v2207_v44 = vsel %vm2206_vm15, %v2205_v49, 0  ;;  %v2048_v28 = vadd.s32 536870912, %v2047_v14  ;;  %v1868_v48 = vsel %vm6984_vm1, 0, %v1866_v36 }
 0x366   : > { %v1674_v41 = vsel %vm1663_vm0, nan, %v1673_v13  ;;  %v1854_v63 = vor.u32 %v1853_v23, %v1852_v42  ;;  %v1857_v6 = vshll.u32 %v1856_v37, 23  ;;  %v2202_v16 = vand.u32 8388607, %v2195_v47 }
 0x367   : > { %v2209_v31 = vand.u32 31, %v2207_v44  ;;  %2308 = vst [vmem:[%s5295_s20 + $0x48] sm:$0xff] %v1674_v41  ;;  %v6993_v62 = vshrl.u32 %v2048_v28, 30  ;;  %v1872_v46 = vadd.s32 3, %v1868_v48  ;;  %v2208_v5 = vshrl.u32 %v2207_v44, 5 }
 0x368   : > { %v1858_v21 = vor.u32 4788187, %v1857_v6  ;;  %v1861_v15 = vcvt.s32.f32 %v1854_v63  ;;  %v2203_v25 = vor.u32 8388608, %v2202_v16  ;;  %v501_v2 = vrot.slane %v6969_v26, 4 }
 0x369   : > { %v2210_v27 = vsub.s32 32, %v2209_v31  ;;  %v2050_v17 = vshll.u32 %v6993_v62, 30  ;;  %v2212_v0 = vshll.u32 %v7786_v4, %v2209_v31  ;;  %v2215_v39 = vshll.u32 %v7765_v35, %v2209_v31 }
 0x36a   : > { %v1859_v10 = vand.u32 2147483647, %v1858_v21  ;;  %v2218_v36 = vshll.u32 %v7766_v30, %v2209_v31  ;;  %v2221_v18 = vshll.u32 %v7785_v45, %v2209_v31  ;;  %v2224_v7 = vshll.u32 %v4696_v55, %v2209_v31 }
 0x36b   : > { %v2213_v9 = vshrl.u32 %v7765_v35, %v2210_v27  ;;  %v2216_v56 = vshrl.u32 %v7766_v30, %v2210_v27  ;;  %v2219_v12 = vshrl.u32 %v7785_v45, %v2210_v27  ;;  %v6999_v22 = vsub.s32 %v2047_v14, %v2050_v17 }
 0x36c   : > { %v1862_v49 = vmul.f32 %v1861_v15, %v1859_v10  ;;  %v2222_v1 = vshrl.u32 %v4696_v55, %v2210_v27  ;;  %v2225_v23 = vshrl.u32 %v7768_v24, %v2210_v27  ;;  %v2243_v44 = vshll.u32 %v2203_v25, 8 }
 0x36d   : > { %v2053_v59 = vsub.s32 0, %v6999_v22  ;;  %v2214_v57 = vor.u32 %v2213_v9, %v2212_v0  ;;  %v2217_v42 = vor.u32 %v2216_v56, %v2215_v39  ;;  %v2220_v20 = vor.u32 %v2219_v12, %v2218_v36 }
 0x36e   : > { %v1863_v40 = vxor.u32 2147483648, %v1862_v49  ;;  %v2223_v13 = vor.u32 %v2222_v1, %v2221_v18  ;;  %v2211_v63 = vshrl.u32 %v7786_v4, %v2210_v27  ;;  %v2226_v6 = vor.u32 %v2225_v23, %v2224_v7 }
 0x36f   : > { %v4181_v14 = vmin.u32 %v2053_v59, %v6999_v22  ;;  %v502_v28 = vadd.f32 %v501_v2, %v6969_v26  ;;  %vm2227_vm2 = vcmp.lt.s32.totalorder %v2208_v5, 1  ;;  %vm2230_vm5 = vcmp.lt.s32.totalorder %v2208_v5, 4 }
 0x370   : > { %v1864_v37 = vsel %vm1781_vm9, %v1863_v40, %v1862_v49  ;;  %vm2228_vm3 = vcmp.lt.s32.totalorder %v2208_v5, 2  ;;  %v2232_v16 = vsel %vm2230_vm5, %v2220_v20, 2102212464  ;;  %v2235_v31 = vsel %vm2227_vm2, %v2214_v57, %v2217_v42 }
 0x371   : > { %v1867_v41 = vsel %vm6984_vm1, %v6629_v29, %v1864_v37  ;;  %v2055_v48 = vclz %v4181_v14  ;;  %vm2229_vm4 = vcmp.lt.s32.totalorder %v2208_v5, 3  ;;  %v2236_v10 = vsel %vm2230_vm5, %v2223_v13, 920167782 }
 0x372   : > { %4547 = vcosq.f32 %v1867_v41  ;;  %v2239_v15 = vsel %vm2227_vm2, %v2217_v42, %v2220_v20  ;;  %v2231_v17 = vsel %vm2227_vm2, %v2211_v63, %v2214_v57  ;;  %v2237_v50 = vsel %vm2229_vm4, %v2220_v20, %v2236_v10 }
 0x373   : > { %4549 = vsinq.f32 %v1867_v41  ;;  %v4182_v21 = vadd.s32 4294967294, %v2055_v48  ;;  %v2240_v25 = vsel %vm2230_vm5, %v2226_v6, 1326507024  ;;  %v503_v9 = vrot.slane %v502_v28, 2 }
 0x374   : > { %v2233_v27 = vsel %vm2229_vm4, %v2217_v42, %v2232_v16  ;;  %v2238_v26 = vsel %vm2228_vm3, %v2235_v31, %v2237_v50  ;;  %v2241_v56 = vsel %vm2229_vm4, %v2223_v13, %v2240_v25  ;;  %v2043_v39 = vadd.s32 %v6948_v38, %v6959_v8 }
 0x375   : > { %vm4183_vm6 = vcmp.lt.s32.totalorder %v4182_v21, 0  ;;  %v2242_v49 = vsel %vm2228_vm3, %v2239_v15, %v2241_v56  ;;  %v7020_v0 = vmul.u32.u64.low %v2243_v44, %v2238_v26  ;;  %v7021_v1 = vmul.u32.u64.high %v2243_v44, %v2238_v26, %v7020_v0 }
 0x376   : > { %v2058_v12 = vsel %vm4183_vm6, 0, %v4182_v21  ;;  %v504_v40 = vadd.f32 %v503_v9, %v502_v28  ;;  %v1873_v59 = vand.u32 3, %v1872_v46  ;;  %v2234_v57 = vsel %vm2228_vm3, %v2231_v17, %v2233_v27 }
 0x377   : > { %v2059_v36 = vsub.s32 32, %v2058_v12  ;;  %v2063_v2 = vsub.s32 4294967266, %v2058_v12  ;;  %v7027_v18 = vmul.u32.u64.low %v2243_v44, %v2242_v49  ;;  %v7028_v42 = vmul.u32.u64.high %v2243_v44, %v2242_v49, %v7027_v18 }
 0x378   : > { %v2060_v20 = vshll.u32 %v6999_v22, %v2058_v12  ;;  %v505_v37 = vrot.slane %v504_v40, 1  ;;  %v2253_v14 = vadd.s32 1, %v7021_v1  ;;  %vm1989_vm7 = vcmp.lt.s32.totalorder %v6633_v43, 0 }
 0x379   : > { %v2061_v7 = vshrl.u32 %v2043_v39, %v2059_v36  ;;  %v2064_v23 = vadd.s32 127, %v2063_v2  ;;  %v2073_v63 = vsub.s32 4, %v6993_v62  ;;  %v2250_v6 = vmul.u32 %v2243_v44, %v2234_v57 }
 0x37a   : > { %v7033_v41 = vadd.f32 %v505_v37, %v504_v40  ;;  %vm2252_vm8 = vc.u32 %v7028_v42, %v7020_v0  ;;  %vm1878_vm9 = vcmp.eq.s32.totalorder %v1873_v59, 2  ;;  %vm1875_vm10 = vcmp.eq.s32.totalorder %v1873_v59, 0 }
 0x37b   : > { %v2062_v38 = vor.u32 %v2061_v7, %v2060_v20  ;;  %v2065_v8 = vshll.u32 %v2064_v23, 23  ;;  %v2254_v48 = vsel %vm2252_vm8, %v2253_v14, %v7021_v1  ;;  %vm1874_vm11 = vcmp.lt.s32.totalorder %v1873_v59, 2 }
 0x37c   : > { %v4548_v13 = vpop.eup %4547  ;;  %v2255_v31 = vadd.s32 %v2254_v48, %v2250_v6  ;;  %v2316_v21 = vmul.f32 %v4905_v32, %v7033_v41  ;;  %vm1871_vm12 = vweird.f32 %v6629_v29  ;;  %v2074_v50 = vsel %vm1989_vm7, %v2073_v63, %v6993_v62 }
 0x37d   : > { %v4550_v46 = vpop.eup %4549  ;;  %v1879_v5 = vxor.u32 2147483648, %v4548_v13  ;;  %v2066_v28 = vor.u32 4788187, %v2065_v8  ;;  %v2069_v17 = vcvt.s32.f32 %v2062_v38  ;;  %v2318_v26 = vmul.f32 %v4909_v34, %v7033_v41 }
 0x37e   : > { %v1876_v22 = vxor.u32 2147483648, %v4550_v46  ;;  %v2256_v25 = vadd.s32 536870912, %v2255_v31  ;;  %vm1988_vm13 = vcmp.le.f32.partialorder %v1987_v51, 0.7853982  ;;  %v7051_v56 = vadd.f32 %v2316_v21, %v4933_v54 }
 0x37f   : > { %v1880_v16 = vsel %vm1878_vm9, %v1879_v5, %v4550_v46  ;;  %v2067_v15 = vand.u32 2147483647, %v2066_v28  ;;  %v2076_v12 = vsel %vm1988_vm13, 0, %v2074_v50  ;;  %v7056_v1 = vadd.f32 %v2318_v26, %v4943_v60 }
 0x380   : > { %v1877_v10 = vsel %vm1875_vm10, %v4548_v13, %v1876_v22  ;;  %v2257_v32 = vshrl.u32 %v2256_v25, 30  ;;  %v2451_v39 = vand.u32 2147483647, %v7051_v56  ;;  %v2454_v34 = vand.u32 2139095040, %v7051_v56 }
 0x381   : > { %v1881_v44 = vsel %vm1874_vm11, %v1877_v10, %v1880_v16  ;;  %v2070_v27 = vmul.f32 %v2069_v17, %v2067_v15  ;;  %v2080_v36 = vadd.s32 3, %v2076_v12  ;;  %vm2197_vm14 = vcmp.lt.s32.totalorder %v6917_v52, 0 }
 0x382   : > { %v1882_v9 = vsel %vm1871_vm12, nan, %v1881_v44  ;;  %v2258_v49 = vshll.u32 %v2257_v32, 30  ;;  %v2281_v40 = vsub.s32 4, %v2257_v32  ;;  %v2455_v54 = vshrl.u32 %v2454_v34, 23 }
 0x383   : > { %2310 = vst [vmem:[%s5295_s20 + $0x58] sm:$0xff] %v1882_v9  ;;  %v2071_v29 = vxor.u32 2147483648, %v2070_v27  ;;  %v2458_v57 = vand.u32 8388607, %v2451_v39  ;;  %v2662_v18 = vand.u32 2139095040, %v7056_v1  ;;  %v2081_v20 = vand.u32 3, %v2080_v36 }
 0x384   : > { %v2259_v2 = vsub.s32 %v2255_v31, %v2258_v49  ;;  %v4196_v60 = vadd.s32 4294967169, %v2455_v54  ;;  %v2282_v23 = vsel %vm2197_vm14, %v2281_v40, %v2257_v32  ;;  %v2320_v37 = vmul.f32 %v4907_v33, %v7033_v41 }
 0x385   : > { %v2072_v62 = vsel %vm1989_vm7, %v2071_v29, %v2070_v27  ;;  %v2663_v13 = vshrl.u32 %v2662_v18, 23  ;;  %vm7071_vm15 = vcmp.le.f32.partialorder %v2195_v47, 0.7853982  ;;  %v2459_v46 = vor.u32 8388608, %v2458_v57 }
 0x386   : > { %v2075_v51 = vsel %vm1988_vm13, %v6633_v43, %v2072_v62  ;;  %v2261_v59 = vsub.s32 0, %v2259_v2  ;;  %v2461_v14 = vadd.s32 1, %v4196_v60  ;;  %v2659_v5 = vand.u32 2147483647, %v7056_v1 }
 0x387   : > { %4551 = vcosq.f32 %v2075_v51  ;;  %v2284_v63 = vsel %vm7071_vm15, 0, %v2282_v23  ;;  %v4204_v6 = vadd.s32 4294967169, %v2663_v13  ;;  %vm2079_vm1 = vweird.f32 %v6633_v43 }
 0x388   : > { %4553 = vsinq.f32 %v2075_v51  ;;  %v4189_v7 = vmin.u32 %v2261_v59, %v2259_v2  ;;  %vm2462_vm0 = vcmp.gt.s32.totalorder %v2461_v14, 0  ;;  %vm2082_vm2 = vcmp.lt.s32.totalorder %v2081_v20, 2 }
 0x389   : > { %vm2083_vm5 = vcmp.eq.s32.totalorder %v2081_v20, 0  ;;  %v2463_v22 = vsel %vm2462_vm0, %v2461_v14, 0  ;;  %vm2086_vm3 = vcmp.eq.s32.totalorder %v2081_v20, 2  ;;  %v2251_v47 = vadd.s32 %v7020_v0, %v7028_v42 }
 0x38a   : > { %v2263_v8 = vclz %v4189_v7  ;;  %v7082_v28 = vadd.f32 %v2320_v37, %v4945_v61  ;;  %v2465_v48 = vand.u32 31, %v2463_v22  ;;  %v7084_v16 = vadd.s32 3, %v2284_v63 }
 0x38b   : > { %v7086_v31 = vshll.u32 %v2459_v46, 8  ;;  %v7090_v21 = vand.u32 8388607, %v2659_v5  ;;  %v2464_v17 = vshrl.u32 %v2463_v22, 5  ;;  %v2669_v50 = vadd.s32 1, %v4204_v6 }
 0x38c   : > { %v4190_v33 = vadd.s32 4294967294, %v2263_v8  ;;  %v2466_v44 = vsub.s32 32, %v2465_v48  ;;  %v2468_v9 = vshll.u32 %v7786_v4, %v2465_v48  ;;  %v2471_v32 = vshll.u32 %v7765_v35, %v2465_v48 }
 0x38d   : > { %v2474_v40 = vshll.u32 %v7766_v30, %v2465_v48  ;;  %v2480_v8 = vshll.u32 %v4696_v55, %v2465_v48  ;;  %vm2483_vm6 = vcmp.lt.s32.totalorder %v2464_v17, 1  ;;  %vm2486_vm7 = vcmp.lt.s32.totalorder %v2464_v17, 4 }
 0x38e   : > { %vm4191_vm4 = vcmp.lt.s32.totalorder %v4190_v33, 0  ;;  %v2469_v26 = vshrl.u32 %v7765_v35, %v2466_v44  ;;  %v2472_v29 = vshrl.u32 %v7766_v30, %v2466_v44  ;;  %v2475_v54 = vshrl.u32 %v7785_v45, %v2466_v44 }
 0x38f   : > { %v2266_v15 = vsel %vm4191_vm4, 0, %v4190_v33  ;;  %v2478_v37 = vshrl.u32 %v4696_v55, %v2466_v44  ;;  %v2467_v13 = vshrl.u32 %v7786_v4, %v2466_v44  ;;  %v2481_v20 = vshrl.u32 %v7768_v24, %v2466_v44 }
 0x390   : > { %v2267_v42 = vsub.s32 32, %v2266_v15  ;;  %v2271_v61 = vsub.s32 4294967266, %v2266_v15  ;;  %v2268_v49 = vshll.u32 %v2259_v2, %v2266_v15  ;;  %v2470_v36 = vor.u32 %v2469_v26, %v2468_v9 }
 0x391   : > { %v4552_v10 = vpop.eup %4551  ;;  %v2473_v18 = vor.u32 %v2472_v29, %v2471_v32  ;;  %v2476_v23 = vor.u32 %v2475_v54, %v2474_v40  ;;  %v2477_v2 = vshll.u32 %v7785_v45, %v2465_v48  ;;  %v2482_v43 = vor.u32 %v2481_v20, %v2480_v8 }
 0x392   : > { %v4554_v25 = vpop.eup %4553  ;;  %v2087_v0 = vxor.u32 2147483648, %v4552_v10  ;;  %v2269_v62 = vshrl.u32 %v2251_v47, %v2267_v42  ;;  %v2272_v34 = vadd.s32 127, %v2271_v61  ;;  %vm2484_vm8 = vcmp.lt.s32.totalorder %v2464_v17, 2 }
 0x393   : > { %v2084_v27 = vxor.u32 2147483648, %v4554_v25  ;;  %v2479_v63 = vor.u32 %v2478_v37, %v2477_v2  ;;  %v2488_v33 = vsel %vm2486_vm7, %v2476_v23, 2102212464  ;;  %vm2485_vm9 = vcmp.lt.s32.totalorder %v2464_v17, 3 }
 0x394   : > { %v2088_v12 = vsel %vm2086_vm3, %v2087_v0, %v4554_v25  ;;  %v2270_v57 = vor.u32 %v2269_v62, %v2268_v49  ;;  %v2273_v60 = vshll.u32 %v2272_v34, 23  ;;  %v2491_v22 = vsel %vm2483_vm6, %v2470_v36, %v2473_v18 }
 0x395   : > { %v2085_v51 = vsel %vm2083_vm5, %v4552_v10, %v2084_v27  ;;  %v2492_v47 = vsel %vm2486_vm7, %v2479_v63, 920167782  ;;  %v2495_v10 = vsel %vm2483_vm6, %v2473_v18, %v2476_v23  ;;  %v2487_v25 = vsel %vm2483_vm6, %v2467_v13, %v2470_v36 }
 0x396   : > { %v2089_v59 = vsel %vm2082_vm2, %v2085_v51, %v2088_v12  ;;  %v2274_v14 = vor.u32 4788187, %v2273_v60  ;;  %v2277_v46 = vcvt.s32.f32 %v2270_v57  ;;  %v2493_v0 = vsel %vm2485_vm9, %v2476_v23, %v2492_v47 }
 0x397   : > { %v2090_v7 = vsel %vm2079_vm1, nan, %v2089_v59  ;;  %v2496_v42 = vsel %vm2486_vm7, %v2482_v43, 1326507024  ;;  %v2489_v61 = vsel %vm2485_vm9, %v2473_v18, %v2488_v33  ;;  %v2494_v48 = vsel %vm2484_vm8, %v2491_v22, %v2493_v0  ;;  %v7831_v59 = vld [vmem:[#allocation9_spill] sm:$0xff] }
 0x398   : > { %2312 = vst [vmem:[%s5295_s20 + $0x68] sm:$0xff] %v2090_v7  ;;  %v2275_v6 = vand.u32 2147483647, %v2274_v14  ;;  %v2497_v44 = vsel %vm2485_vm9, %v2479_v63, %v2496_v42  ;;  %vm2670_vm10 = vcmp.gt.s32.totalorder %v2669_v50, 0  ;;  %v2870_v62 = vand.u32 2139095040, %v7082_v28 }
 0x399   : > { %v2498_v27 = vsel %vm2484_vm8, %v2495_v10, %v2497_v44  ;;  %v7112_v26 = vmul.u32.u64.low %v7086_v31, %v2494_v48  ;;  %v7113_v32 = vmul.u32.u64.high %v7086_v31, %v2494_v48, %v7112_v26  ;;  %v2671_v49 = vsel %vm2670_vm10, %v2669_v50, 0 }
 0x39a   : > { %v2278_v15 = vmul.f32 %v2277_v46, %v2275_v6  ;;  %v7117_v29 = vmul.u32.u64.low %v7086_v31, %v2498_v27  ;;  %v7118_v12 = vmul.u32.u64.high %v7086_v31, %v2498_v27, %v7117_v29  ;;  %v2490_v51 = vsel %vm2484_vm8, %v2487_v25, %v2489_v61 }
 0x39b   : > { %v2673_v36 = vand.u32 31, %v2671_v49  ;;  %v7128_v54 = vand.u32 3, %v7084_v16  ;;  %v7132_v57 = vmul.f32 %v7831_v59, %v7033_v41  ;;  %v2667_v50 = vor.u32 8388608, %v7090_v21 }
 0x39c   : > { %v2279_v9 = vxor.u32 2147483648, %v2278_v15  ;;  %v2509_v60 = vadd.s32 1, %v7113_v32  ;;  %v2867_v17 = vand.u32 2147483647, %v7082_v28  ;;  %v2506_v7 = vmul.u32 %v7086_v31, %v2490_v51 }
 0x39d   : > { %v2674_v18 = vsub.s32 32, %v2673_v36  ;;  %vm2508_vm11 = vc.u32 %v7118_v12, %v7112_v26  ;;  %v2871_v38 = vshrl.u32 %v2870_v62, 23  ;;  %v2679_v2 = vshll.u32 %v7765_v35, %v2673_v36 }
 0x39e   : > { %v2280_v34 = vsel %vm2197_vm14, %v2279_v9, %v2278_v15  ;;  %v2510_v16 = vsel %vm2508_vm11, %v2509_v60, %v7113_v32  ;;  %v2672_v14 = vshrl.u32 %v2671_v49, 5  ;;  %v2682_v13 = vshll.u32 %v7766_v30, %v2673_v36 }
 0x39f   : > { %v2283_v40 = vsel %vm7071_vm15, %v6917_v52, %v2280_v34  ;;  %v2677_v23 = vshrl.u32 %v7765_v35, %v2674_v18  ;;  %v2680_v21 = vshrl.u32 %v7766_v30, %v2674_v18  ;;  %v2511_v37 = vadd.s32 %v2510_v16, %v2506_v7 }
 0x3a0   : > { %4555 = vcosq.f32 %v2283_v40  ;;  %v2683_v8 = vshrl.u32 %v7785_v45, %v2674_v18  ;;  %vm2294_vm12 = vcmp.eq.s32.totalorder %v7128_v54, 2  ;;  %v2676_v31 = vshll.u32 %v7786_v4, %v2673_v36 }
 0x3a1   : > { %4557 = vsinq.f32 %v2283_v40  ;;  %v2681_v20 = vor.u32 %v2680_v21, %v2679_v2  ;;  %v2685_v46 = vshll.u32 %v7785_v45, %v2673_v36  ;;  %v2686_v63 = vshrl.u32 %v4696_v55, %v2674_v18 }
 0x3a2   : > { %vm2291_vm13 = vcmp.eq.s32.totalorder %v7128_v54, 0  ;;  %v2512_v6 = vadd.s32 536870912, %v2511_v37  ;;  %v2684_v43 = vor.u32 %v2683_v8, %v2682_v13  ;;  %v2688_v33 = vshll.u32 %v4696_v55, %v2673_v36 }
 0x3a3   : > { %v2689_v22 = vshrl.u32 %v7768_v24, %v2674_v18  ;;  %vm2290_vm14 = vcmp.lt.s32.totalorder %v7128_v54, 2  ;;  %v2678_v47 = vor.u32 %v2677_v23, %v2676_v31  ;;  %v2687_v10 = vor.u32 %v2686_v63, %v2685_v46  ;;  %v7833_v54 = vld [vmem:[#allocation13_spill] sm:$0xff] }
 0x3a4   : > { %v7154_v15 = vshll.u32 %v2667_v50, 8  ;;  %v4212_v25 = vadd.s32 4294967169, %v2871_v38  ;;  %vm2287_vm15 = vweird.f32 %v6917_v52  ;;  %v2513_v0 = vshrl.u32 %v2512_v6, 30 }
 0x3a5   : > { %v2690_v42 = vor.u32 %v2689_v22, %v2688_v33  ;;  %vm2694_vm0 = vcmp.lt.s32.totalorder %v2672_v14, 4  ;;  %v7159_v61 = vand.u32 8388607, %v2867_v17  ;;  %v2675_v48 = vshrl.u32 %v7786_v4, %v2674_v18  ;;  %v7832_v33 = vld [vmem:[#allocation10_spill] sm:$0xff] }
 0x3a6   : > { %vm2691_vm1 = vcmp.lt.s32.totalorder %v2672_v14, 1  ;;  %vm2692_vm2 = vcmp.lt.s32.totalorder %v2672_v14, 2  ;;  %v2700_v44 = vsel %vm2694_vm0, %v2687_v10, 920167782  ;;  %v2514_v9 = vshll.u32 %v2513_v0, 30 }
 0x3a7   : > { %vm2693_vm5 = vcmp.lt.s32.totalorder %v2672_v14, 3  ;;  %v2696_v27 = vsel %vm2694_vm0, %v2684_v43, 2102212464  ;;  %v2703_v32 = vsel %vm2691_vm1, %v2681_v20, %v2684_v43  ;;  %v2699_v49 = vsel %vm2691_vm1, %v2678_v47, %v2681_v20 }
 0x3a8   : > { %v2701_v62 = vsel %vm2693_vm5, %v2684_v43, %v2700_v44  ;;  %v2704_v34 = vsel %vm2694_vm0, %v2690_v42, 1326507024  ;;  %v2877_v51 = vadd.s32 1, %v4212_v25  ;;  %v7162_v59 = vsub.s32 %v2511_v37, %v2514_v9 }
 0x3a9   : > { %v2695_v50 = vsel %vm2691_vm1, %v2675_v48, %v2678_v47  ;;  %v2705_v60 = vsel %vm2693_vm5, %v2687_v10, %v2704_v34  ;;  %v2697_v18 = vsel %vm2693_vm5, %v2681_v20, %v2696_v27  ;;  %v2702_v2 = vsel %vm2692_vm2, %v2699_v49, %v2701_v62 }
 0x3aa   : > { %v4556_v29 = vpop.eup %4555  ;;  %v2706_v38 = vsel %vm2692_vm2, %v2703_v32, %v2705_v60  ;;  %vm2878_vm3 = vcmp.gt.s32.totalorder %v2877_v51, 0  ;;  %v2517_v23 = vsub.s32 0, %v7162_v59  ;;  %v2537_v13 = vsub.s32 4, %v2513_v0 }
 0x3ab   : > { %v4558_v36 = vpop.eup %4557  ;;  %v2295_v40 = vxor.u32 2147483648, %v4556_v29  ;;  %v2879_v21 = vsel %vm2878_vm3, %v2877_v51, 0  ;;  %v7172_v8 = vmul.u32.u64.low %v7154_v15, %v2706_v38  ;;  %v7173_v31 = vmul.u32.u64.high %v7154_v15, %v2706_v38, %v7172_v8 }
 0x3ac   : > { %v2292_v7 = vxor.u32 2147483648, %v4558_v36  ;;  %v4197_v46 = vmin.u32 %v2517_v23, %v7162_v59  ;;  %v2698_v63 = vsel %vm2692_vm2, %v2695_v50, %v2697_v18  ;;  %v2881_v6 = vand.u32 31, %v2879_v21 }
 0x3ad   : > { %v2296_v16 = vsel %vm2294_vm12, %v2295_v40, %v4558_v36  ;;  %v7183_v22 = vmul.f32 %v7832_v33, %v7033_v41  ;;  %v7186_v47 = vmul.u32.u64.low %v7154_v15, %v2702_v2  ;;  %v7187_v10 = vmul.u32.u64.high %v7154_v15, %v2702_v2, %v7186_v47 }
 0x3ae   : > { %v2293_v37 = vsel %vm2291_vm13, %v4556_v29, %v2292_v7  ;;  %v7193_v25 = vadd.f32 %v7132_v57, %v7833_v54  ;;  %vm2453_vm4 = vcmp.lt.s32.totalorder %v7051_v56, 0  ;;  %v2519_v14 = vclz %v4197_v46 }
 0x3af   : > { %v2297_v20 = vsel %vm2290_vm14, %v2293_v37, %v2296_v16  ;;  %v2875_v52 = vor.u32 8388608, %v7159_v61  ;;  %v2507_v42 = vadd.s32 %v7112_v26, %v7118_v12  ;;  %v7201_v48 = vsel %vm2453_vm4, %v2537_v13, %v2513_v0 }
 0x3b0   : > { %v2298_v43 = vsel %vm2287_vm15, nan, %v2297_v20  ;;  %v2714_v44 = vmul.u32 %v7154_v15, %v2698_v63  ;;  %v2882_v9 = vsub.s32 32, %v2881_v6  ;;  %v4198_v27 = vadd.s32 4294967294, %v2519_v14 }
 0x3b1   : > { %2314 = vst [vmem:[%s5295_s20 + $0x78] sm:$0xff] %v2298_v43  ;;  %vm2716_vm6 = vc.u32 %v7173_v31, %v7186_v47  ;;  %v7206_v57 = vshrl.u32 %v2879_v21, 5  ;;  %v2884_v32 = vshll.u32 %v7786_v4, %v2881_v6  ;;  %v2717_v61 = vadd.s32 1, %v7187_v10 }
 0x3b2   : > { %v2885_v29 = vshrl.u32 %v7765_v35, %v2882_v9  ;;  %v2887_v26 = vshll.u32 %v7765_v35, %v2881_v6  ;;  %v2888_v12 = vshrl.u32 %v7766_v30, %v2882_v9  ;;  %vm4199_vm7 = vcmp.lt.s32.totalorder %v4198_v27, 0 }
 0x3b3   : > { %v2890_v15 = vshll.u32 %v7766_v30, %v2881_v6  ;;  %v2891_v0 = vshrl.u32 %v7785_v45, %v2882_v9  ;;  %v2894_v49 = vshrl.u32 %v4696_v55, %v2882_v9  ;;  %v2522_v62 = vsel %vm4199_vm7, 0, %v4198_v27 }
 0x3b4   : > { %v2718_v34 = vsel %vm2716_vm6, %v2717_v61, %v7187_v10  ;;  %v2893_v51 = vshll.u32 %v7785_v45, %v2881_v6  ;;  %v2896_v36 = vshll.u32 %v4696_v55, %v2881_v6  ;;  %v2523_v40 = vsub.s32 32, %v2522_v62 }
 0x3b5   : > { %v2527_v50 = vsub.s32 4294967266, %v2522_v62  ;;  %v2719_v60 = vadd.s32 %v2718_v34, %v2714_v44  ;;  %v2886_v7 = vor.u32 %v2885_v29, %v2884_v32  ;;  %v2524_v18 = vshll.u32 %v7162_v59, %v2522_v62 }
 0x3b6   : > { %v2889_v38 = vor.u32 %v2888_v12, %v2887_v26  ;;  %v2895_v16 = vor.u32 %v2894_v49, %v2893_v51  ;;  %v2897_v23 = vshrl.u32 %v7768_v24, %v2882_v9  ;;  %v2525_v2 = vshrl.u32 %v2507_v42, %v2523_v40 }
 0x3b7   : > { %v2528_v21 = vadd.s32 127, %v2527_v50  ;;  %v2720_v37 = vadd.s32 536870912, %v2719_v60  ;;  %v2892_v13 = vor.u32 %v2891_v0, %v2890_v15  ;;  %v2883_v8 = vshrl.u32 %v7786_v4, %v2882_v9 }
 0x3b8   : > { %v2898_v20 = vor.u32 %v2897_v23, %v2896_v36  ;;  %vm2899_vm8 = vcmp.lt.s32.totalorder %v7206_v57, 1  ;;  %vm2900_vm9 = vcmp.lt.s32.totalorder %v7206_v57, 2  ;;  %v2526_v46 = vor.u32 %v2525_v2, %v2524_v18 }
 0x3b9   : > { %v2529_v63 = vshll.u32 %v2528_v21, 23  ;;  %v2721_v6 = vshrl.u32 %v2720_v37, 30  ;;  %vm2902_vm10 = vcmp.lt.s32.totalorder %v7206_v57, 4  ;;  %vm2901_vm11 = vcmp.lt.s32.totalorder %v7206_v57, 3 }
 0x3ba   : > { %v2907_v59 = vsel %vm2899_vm8, %v2886_v7, %v2889_v38  ;;  %v2908_v43 = vsel %vm2902_vm10, %v2895_v16, 920167782  ;;  %v2912_v33 = vsel %vm2902_vm10, %v2898_v20, 1326507024  ;;  %v2904_v14 = vsel %vm2902_vm10, %v2892_v13, 2102212464 }
 0x3bb   : > { %v2530_v10 = vor.u32 4788187, %v2529_v63  ;;  %v2722_v54 = vshll.u32 %v2721_v6, 30  ;;  %v2911_v42 = vsel %vm2899_vm8, %v2889_v38, %v2892_v13  ;;  %v2903_v44 = vsel %vm2899_vm8, %v2883_v8, %v2886_v7 }
 0x3bc   : > { %v2909_v9 = vsel %vm2901_vm11, %v2892_v13, %v2908_v43  ;;  %v2913_v27 = vsel %vm2901_vm11, %v2895_v16, %v2912_v33  ;;  %v2915_v32 = vshll.u32 %v2875_v52, 8  ;;  %v2533_v29 = vcvt.s32.f32 %v2526_v46  ;;  %v7836_v16 = vld [vmem:[#allocation11_spill] sm:$0xff] }
 0x3bd   : > { %v2531_v61 = vand.u32 2147483647, %v2530_v10  ;;  %v7230_v26 = vsub.s32 %v2719_v60, %v2722_v54  ;;  %v2910_v12 = vsel %vm2900_vm9, %v2907_v59, %v2909_v9  ;;  %v2905_v15 = vsel %vm2901_vm11, %v2889_v38, %v2904_v14 }
 0x3be   : > { %v2914_v0 = vsel %vm2900_vm9, %v2911_v42, %v2913_v27  ;;  %v7238_v49 = vmul.u32.u64.low %v2915_v32, %v2910_v12  ;;  %v7239_v62 = vmul.u32.u64.high %v2915_v32, %v2910_v12, %v7238_v49  ;;  %vm7244_vm12 = vcmp.le.f32.partialorder %v2451_v39, 0.7853982 }
 0x3bf   : > { %v2534_v34 = vmul.f32 %v2533_v29, %v2531_v61  ;;  %v2725_v51 = vsub.s32 0, %v7230_v26  ;;  %v2540_v36 = vsel %vm7244_vm12, 0, %v7201_v48  ;;  %v2745_v40 = vsub.s32 4, %v2721_v6 }
 0x3c0   : > { %v7252_v50 = vmul.u32.u64.low %v2915_v32, %v2914_v0  ;;  %v7253_v60 = vmul.u32.u64.high %v2915_v32, %v2914_v0, %v7252_v50  ;;  %v2906_v39 = vsel %vm2900_vm9, %v2903_v44, %v2905_v15  ;;  %v3078_v38 = vand.u32 2139095040, %v7193_v25 }
 0x3c1   : > { %v2535_v7 = vxor.u32 2147483648, %v2534_v34  ;;  %v4205_v18 = vmin.u32 %v2725_v51, %v7230_v26  ;;  %v2326_v23 = vmul.f32 %v7836_v16, %v7033_v41  ;;  %v7263_v2 = vadd.f32 %v7183_v22, %v7817_v3 }
 0x3c2   : > { %vm2661_vm13 = vcmp.lt.s32.totalorder %v7056_v1, 0  ;;  %v2925_v48 = vadd.s32 1, %v7239_v62  ;;  %v2544_v37 = vadd.s32 3, %v2540_v36  ;;  %v3075_v57 = vand.u32 2147483647, %v7193_v25 }
 0x3c3   : > { %v2536_v21 = vsel %vm2453_vm4, %v2535_v7, %v2534_v34  ;;  %v2727_v13 = vclz %v4205_v18  ;;  %v2746_v20 = vsel %vm2661_vm13, %v2745_v40, %v2721_v6  ;;  %v2922_v3 = vmul.u32 %v2915_v32, %v2906_v39 }
 0x3c4   : > { %v2539_v8 = vsel %vm7244_vm12, %v7051_v56, %v2536_v21  ;;  %vm2924_vm14 = vc.u32 %v7253_v60, %v7238_v49  ;;  %v3079_v63 = vshrl.u32 %v3078_v38, 23  ;;  %v7279_v59 = vadd.f32 %v2326_v23, %v5187_v11 }
 0x3c5   : > { %4559 = vcosq.f32 %v2539_v8  ;;  %v4206_v22 = vadd.s32 4294967294, %v2727_v13  ;;  %v2926_v46 = vsel %vm2924_vm14, %v2925_v48, %v7239_v62  ;;  %vm7283_vm15 = vcmp.le.f32.partialorder %v2659_v5, 0.7853982 }
 0x3c6   : > { %4561 = vsinq.f32 %v2539_v8  ;;  %v2927_v6 = vadd.s32 %v2926_v46, %v2922_v3  ;;  %v2748_v33 = vsel %vm7283_vm15, 0, %v2746_v20  ;;  %v4220_v10 = vadd.s32 4294967169, %v3079_v63 }
 0x3c7   : > { %vm4207_vm0 = vcmp.lt.s32.totalorder %v4206_v22, 0  ;;  %v3286_v54 = vand.u32 2139095040, %v7263_v2  ;;  %v2545_v14 = vand.u32 3, %v2544_v37  ;;  %v3082_v11 = vand.u32 8388607, %v3075_v57 }
 0x3c8   : > { %v2730_v42 = vsel %vm4207_vm0, 0, %v4206_v22  ;;  %v2928_v44 = vadd.s32 536870912, %v2927_v6  ;;  %v2715_v5 = vadd.s32 %v7186_v47, %v7173_v31  ;;  %v3085_v32 = vadd.s32 1, %v4220_v10 }
 0x3c9   : > { %v2731_v9 = vsub.s32 32, %v2730_v42  ;;  %v2735_v27 = vsub.s32 4294967266, %v2730_v42  ;;  %v2732_v61 = vshll.u32 %v7230_v26, %v2730_v42  ;;  %v2752_v29 = vadd.s32 3, %v2748_v33 }
 0x3ca   : > { %vm2869_vm1 = vcmp.lt.s32.totalorder %v7082_v28, 0  ;;  %v2929_v12 = vshrl.u32 %v2928_v44, 30  ;;  %vm3086_vm2 = vcmp.gt.s32.totalorder %v3085_v32, 0  ;;  %v3287_v62 = vshrl.u32 %v3286_v54, 23 }
 0x3cb   : > { %v2733_v15 = vshrl.u32 %v2715_v5, %v2731_v9  ;;  %v2736_v0 = vadd.s32 127, %v2735_v27  ;;  %vm2543_vm5 = vweird.f32 %v7051_v56  ;;  %vm2546_vm3 = vcmp.lt.s32.totalorder %v2545_v14, 2 }
 0x3cc   : > { %v2930_v52 = vshll.u32 %v2929_v12, 30  ;;  %v3083_v34 = vor.u32 8388608, %v3082_v11  ;;  %v3087_v51 = vsel %vm3086_vm2, %v3085_v32, 0  ;;  %vm2547_vm4 = vcmp.eq.s32.totalorder %v2545_v14, 0 }
 0x3cd   : > { %v2734_v31 = vor.u32 %v2733_v15, %v2732_v61  ;;  %v2737_v47 = vshll.u32 %v2736_v0, 23  ;;  %v3089_v36 = vand.u32 31, %v3087_v51  ;;  %vm2550_vm6 = vcmp.eq.s32.totalorder %v2545_v14, 2 }
 0x3ce   : > { %v7297_v26 = vand.u32 3, %v2752_v29  ;;  %v7299_v40 = vsub.s32 %v2927_v6, %v2930_v52  ;;  %v2953_v50 = vsub.s32 4, %v2929_v12  ;;  %v3283_v38 = vand.u32 2147483647, %v7263_v2  ;;  %v7841_v29 = vld [vmem:[#allocation12_spill] sm:$0xff] }
 0x3cf   : > { %v4560_v7 = vpop.eup %4559  ;;  %v2738_v18 = vor.u32 4788187, %v2737_v47  ;;  %v3090_v39 = vsub.s32 32, %v3089_v36  ;;  %v4228_v16 = vadd.s32 4294967169, %v3287_v62  ;;  %v2923_v21 = vadd.s32 %v7238_v49, %v7253_v60 }
 0x3d0   : > { %v4562_v23 = vpop.eup %4561  ;;  %v2551_v48 = vxor.u32 2147483648, %v4560_v7  ;;  %v2933_v37 = vsub.s32 0, %v7299_v40  ;;  %v7305_v13 = vshll.u32 %v3083_v34, 8  ;;  %v2741_v3 = vcvt.s32.f32 %v2734_v31 }
 0x3d1   : > { %v2548_v8 = vxor.u32 2147483648, %v4562_v23  ;;  %v2739_v20 = vand.u32 2147483647, %v2738_v18  ;;  %v3093_v22 = vshrl.u32 %v7765_v35, %v3090_v39  ;;  %v7312_v6 = vsel %vm2869_vm1, %v2953_v50, %v2929_v12 }
 0x3d2   : > { %v2552_v46 = vsel %vm2550_vm6, %v2551_v48, %v4562_v23  ;;  %v4213_v63 = vmin.u32 %v2933_v37, %v7299_v40  ;;  %v3088_v33 = vshrl.u32 %v3087_v51, 5  ;;  %v3092_v10 = vshll.u32 %v7786_v4, %v3089_v36 }
 0x3d3   : > { %v2549_v49 = vsel %vm2547_vm4, %v4560_v7, %v2548_v8  ;;  %v2742_v60 = vmul.f32 %v2741_v3, %v2739_v20  ;;  %v3293_v54 = vadd.s32 1, %v4228_v16  ;;  %v3091_v11 = vshrl.u32 %v7786_v4, %v3090_v39 }
 0x3d4   : > { %v2553_v42 = vsel %vm2546_vm3, %v2549_v49, %v2552_v46  ;;  %v2935_v44 = vclz %v4213_v63  ;;  %v3096_v5 = vshrl.u32 %v7766_v30, %v3090_v39  ;;  %v3094_v32 = vor.u32 %v3093_v22, %v3092_v10 }
 0x3d5   : > { %v2554_v9 = vsel %vm2543_vm5, nan, %v2553_v42  ;;  %v2743_v27 = vxor.u32 2147483648, %v2742_v60  ;;  %v3095_v61 = vshll.u32 %v7765_v35, %v3089_v36  ;;  %vm7324_vm7 = vcmp.le.f32.partialorder %v2867_v17, 0.7853982 }
 0x3d6   : > { %v4214_v14 = vadd.s32 4294967294, %v2935_v44  ;;  %v3098_v12 = vshll.u32 %v7766_v30, %v3089_v36  ;;  %v3099_v15 = vshrl.u32 %v7785_v45, %v3090_v39  ;;  %v3101_v0 = vshll.u32 %v7785_v45, %v3089_v36  ;;  %4012 = vst [vmem:[%s5295_s20 + $0x88] sm:$0xff] %v2554_v9 }
 0x3d7   : > { %v2744_v56 = vsel %vm2661_vm13, %v2743_v27, %v2742_v60  ;;  %v3102_v62 = vshrl.u32 %v4696_v55, %v3090_v39  ;;  %v3104_v52 = vshll.u32 %v4696_v55, %v3089_v36  ;;  %v3105_v17 = vshrl.u32 %v7768_v24, %v3090_v39 }
 0x3d8   : > { %v2747_v34 = vsel %vm7283_vm15, %v7056_v1, %v2744_v56  ;;  %vm4215_vm8 = vcmp.lt.s32.totalorder %v4214_v14, 0  ;;  %v3097_v51 = vor.u32 %v3096_v5, %v3095_v61  ;;  %v3100_v31 = vor.u32 %v3099_v15, %v3098_v12 }
 0x3d9   : > { %4563 = vcosq.f32 %v2747_v34  ;;  %v2938_v47 = vsel %vm4215_vm8, 0, %v4214_v14  ;;  %v3103_v50 = vor.u32 %v3102_v62, %v3101_v0  ;;  %v3106_v7 = vor.u32 %v3105_v17, %v3104_v52 }
 0x3da   : > { %4565 = vsinq.f32 %v2747_v34  ;;  %v2939_v18 = vsub.s32 32, %v2938_v47  ;;  %v2943_v16 = vsub.s32 4294967266, %v2938_v47  ;;  %vm3107_vm9 = vcmp.lt.s32.totalorder %v3088_v33, 1 }
 0x3db   : > { %v2940_v23 = vshll.u32 %v7299_v40, %v2938_v47  ;;  %vm3109_vm10 = vcmp.lt.s32.totalorder %v3088_v33, 3  ;;  %vm3110_vm11 = vcmp.lt.s32.totalorder %v3088_v33, 4  ;;  %v3111_v36 = vsel %vm3107_vm9, %v3091_v11, %v3094_v32 }
 0x3dc   : > { %v2941_v39 = vshrl.u32 %v2923_v21, %v2939_v18  ;;  %v2944_v48 = vadd.s32 127, %v2943_v16  ;;  %v3112_v43 = vsel %vm3110_vm11, %v3100_v31, 2102212464  ;;  %v3115_v37 = vsel %vm3107_vm9, %v3094_v32, %v3097_v51 }
 0x3dd   : > { %v3113_v8 = vsel %vm3109_vm10, %v3097_v51, %v3112_v43  ;;  %v3116_v20 = vsel %vm3110_vm11, %v3103_v50, 920167782  ;;  %v3119_v3 = vsel %vm3107_vm9, %v3097_v51, %v3100_v31  ;;  %v3120_v22 = vsel %vm3110_vm11, %v3106_v7, 1326507024 }
 0x3de   : > { %v2942_v46 = vor.u32 %v2941_v39, %v2940_v23  ;;  %v2945_v63 = vshll.u32 %v2944_v48, 23  ;;  %vm3108_vm12 = vcmp.lt.s32.totalorder %v3088_v33, 2  ;;  %v3117_v49 = vsel %vm3109_vm10, %v3100_v31, %v3116_v20 }
 0x3df   : > { %v2956_v40 = vsel %vm7324_vm7, 0, %v7312_v6  ;;  %v3118_v60 = vsel %vm3108_vm12, %v3115_v37, %v3117_v49  ;;  %v3121_v21 = vsel %vm3109_vm10, %v3103_v50, %v3120_v22  ;;  %vm3294_vm13 = vcmp.gt.s32.totalorder %v3293_v54, 0 }
 0x3e0   : > { %vm2751_vm14 = vweird.f32 %v7056_v1  ;;  %v2946_v10 = vor.u32 4788187, %v2945_v63  ;;  %v3114_v42 = vsel %vm3108_vm12, %v3111_v36, %v3113_v8  ;;  %v3122_v44 = vsel %vm3108_vm12, %v3119_v3, %v3121_v21 }
 0x3e1   : > { %v3295_v11 = vsel %vm3294_vm13, %v3293_v54, 0  ;;  %v7349_v5 = vmul.u32.u64.low %v7305_v13, %v3122_v44  ;;  %v7350_v9 = vmul.u32.u64.high %v7305_v13, %v3122_v44, %v7349_v5  ;;  %vm2754_vm15 = vcmp.lt.s32.totalorder %v7297_v26, 2 }
 0x3e2   : > { %v7353_v27 = vmul.u32.u64.low %v7305_v13, %v3118_v60  ;;  %v7354_v32 = vmul.u32.u64.high %v7305_v13, %v3118_v60, %v7353_v27  ;;  %v2947_v6 = vand.u32 2147483647, %v2946_v10  ;;  %v2949_v33 = vcvt.s32.f32 %v2942_v46 }
 0x3e3   : > { %v3297_v61 = vand.u32 31, %v3295_v11  ;;  %v4564_v14 = vpop.eup %4563  ;;  %vm2755_vm0 = vcmp.eq.s32.totalorder %v7297_v26, 0  ;;  %vm2758_vm2 = vcmp.eq.s32.totalorder %v7297_v26, 2  ;;  %v2960_v54 = vadd.s32 3, %v2956_v40 }
 0x3e4   : > { %v3290_v12 = vand.u32 8388607, %v3283_v38  ;;  %v4566_v15 = vpop.eup %4565  ;;  %v2759_v0 = vxor.u32 2147483648, %v4564_v14  ;;  %v2950_v56 = vmul.f32 %v2949_v33, %v2947_v6  ;;  %v3130_v62 = vmul.u32 %v7305_v13, %v3114_v42 }
 0x3e5   : > { %v3298_v52 = vsub.s32 32, %v3297_v61  ;;  %v2756_v17 = vxor.u32 2147483648, %v4566_v15  ;;  %vm3132_vm5 = vc.u32 %v7350_v9, %v7353_v27  ;;  %v3133_v34 = vadd.s32 1, %v7354_v32 }
 0x3e6   : > { %v7366_v51 = vshrl.u32 %v3295_v11, 5  ;;  %v2760_v31 = vsel %vm2758_vm2, %v2759_v0, %v4566_v15  ;;  %v2951_v47 = vxor.u32 2147483648, %v2950_v56  ;;  %v3300_v50 = vshll.u32 %v7786_v4, %v3297_v61 }
 0x3e7   : > { %v3301_v7 = vshrl.u32 %v7765_v35, %v3298_v52  ;;  %v2757_v18 = vsel %vm2755_vm0, %v4564_v14, %v2756_v17  ;;  %v3134_v13 = vsel %vm3132_vm5, %v3133_v34, %v7354_v32  ;;  %v3303_v16 = vshll.u32 %v7765_v35, %v3297_v61 }
 0x3e8   : > { %v3304_v23 = vshrl.u32 %v7766_v30, %v3298_v52  ;;  %v2761_v36 = vsel %vm2754_vm15, %v2757_v18, %v2760_v31  ;;  %v2952_v39 = vsel %vm2869_vm1, %v2951_v47, %v2950_v56  ;;  %v3135_v48 = vadd.s32 %v3134_v13, %v3130_v62 }
 0x3e9   : > { %v3302_v43 = vor.u32 %v3301_v7, %v3300_v50  ;;  %v2762_v37 = vsel %vm2751_vm14, nan, %v2761_v36  ;;  %v2955_v8 = vsel %vm7324_vm7, %v7082_v28, %v2952_v39  ;;  %v3306_v3 = vshll.u32 %v7766_v30, %v3297_v61 }
 0x3ea   : > { %v3305_v20 = vor.u32 %v3304_v23, %v3303_v16  ;;  %4567 = vcosq.f32 %v2955_v8  ;;  %v3136_v22 = vadd.s32 536870912, %v3135_v48  ;;  %v3307_v26 = vshrl.u32 %v7785_v45, %v3298_v52  ;;  %4014 = vst [vmem:[%s5295_s20 + $0x98] sm:$0xff] %v2762_v37 }
 0x3eb   : > { %v3309_v46 = vshll.u32 %v7785_v45, %v3297_v61  ;;  %4569 = vsinq.f32 %v2955_v8  ;;  %v3310_v63 = vshrl.u32 %v4696_v55, %v3298_v52  ;;  %v3312_v1 = vshll.u32 %v4696_v55, %v3297_v61 }
 0x3ec   : > { %v3313_v49 = vshrl.u32 %v7768_v24, %v3298_v52  ;;  %v7393_v40 = vmul.f32 %v7841_v29, %v7033_v41  ;;  %v3137_v60 = vshrl.u32 %v3136_v22, 30  ;;  %v3291_v21 = vor.u32 8388608, %v3290_v12 }
 0x3ed   : > { %v3308_v10 = vor.u32 %v3307_v26, %v3306_v3  ;;  %v2961_v42 = vand.u32 3, %v2960_v54  ;;  %v3311_v44 = vor.u32 %v3310_v63, %v3309_v46  ;;  %v3494_v5 = vand.u32 2139095040, %v7279_v59 }
 0x3ee   : > { %v3314_v11 = vor.u32 %v3313_v49, %v3312_v1  ;;  %v3138_v32 = vshll.u32 %v3137_v60, 30  ;;  %v3299_v6 = vshrl.u32 %v7786_v4, %v3298_v52  ;;  %vm3315_vm1 = vcmp.lt.s32.totalorder %v7366_v51, 1 }
 0x3ef   : > { %vm3318_vm3 = vcmp.lt.s32.totalorder %v7366_v51, 4  ;;  %vm3317_vm4 = vcmp.lt.s32.totalorder %v7366_v51, 3  ;;  %v3323_v61 = vsel %vm3315_vm1, %v3302_v43, %v3305_v20  ;;  %vm3077_vm6 = vcmp.lt.s32.totalorder %v7193_v25, 0 }
 0x3f0   : > { %v3320_v33 = vsel %vm3318_vm3, %v3308_v10, 2102212464  ;;  %v3324_v14 = vsel %vm3318_vm3, %v3311_v44, 920167782  ;;  %v7401_v12 = vsub.s32 %v3135_v48, %v3138_v32  ;;  %vm3316_vm7 = vcmp.lt.s32.totalorder %v7366_v51, 2 }
 0x3f1   : > { %v3325_v54 = vsel %vm3317_vm4, %v3308_v10, %v3324_v14  ;;  %v3327_v15 = vsel %vm3315_vm1, %v3305_v20, %v3308_v10  ;;  %vm2959_vm8 = vweird.f32 %v7082_v28  ;;  %v3319_v0 = vsel %vm3315_vm1, %v3299_v6, %v3302_v43 }
 0x3f2   : > { %v3326_v56 = vsel %vm3316_vm7, %v3323_v61, %v3325_v54  ;;  %v3328_v62 = vsel %vm3318_vm3, %v3314_v11, 1326507024  ;;  %v3331_v52 = vshll.u32 %v3291_v21, 8  ;;  %v3141_v17 = vsub.s32 0, %v7401_v12 }
 0x3f3   : > { %v3321_v34 = vsel %vm3317_vm4, %v3305_v20, %v3320_v33  ;;  %v3329_v31 = vsel %vm3317_vm4, %v3311_v44, %v3328_v62  ;;  %v3495_v47 = vshrl.u32 %v3494_v5, 23  ;;  %v3491_v13 = vand.u32 2147483647, %v7279_v59 }
 0x3f4   : > { %v3330_v50 = vsel %vm3316_vm7, %v3327_v15, %v3329_v31  ;;  %v7416_v7 = vmul.u32.u64.low %v3331_v52, %v3326_v56  ;;  %v7417_v18 = vmul.u32.u64.high %v3331_v52, %v3326_v56, %v7416_v7  ;;  %v4568_v16 = vpop.eup %4567  ;;  %vm2962_vm9 = vcmp.lt.s32.totalorder %v2961_v42, 2 }
 0x3f5   : > { %v4221_v23 = vmin.u32 %v3141_v17, %v7401_v12  ;;  %v7422_v36 = vmul.u32.u64.low %v3331_v52, %v3330_v50  ;;  %v7423_v39 = vmul.u32.u64.high %v3331_v52, %v3330_v50, %v7422_v36  ;;  %v4570_v48 = vpop.eup %4569  ;;  %v2967_v43 = vxor.u32 2147483648, %v4568_v16 }
 0x3f6   : > { %v3161_v37 = vsub.s32 4, %v3137_v60  ;;  %v3322_v8 = vsel %vm3316_vm7, %v3319_v0, %v3321_v34  ;;  %v4236_v20 = vadd.s32 4294967169, %v3495_v47  ;;  %vm2963_vm10 = vcmp.eq.s32.totalorder %v2961_v42, 0 }
 0x3f7   : > { %v2964_v3 = vxor.u32 2147483648, %v4570_v48  ;;  %vm2966_vm11 = vcmp.eq.s32.totalorder %v2961_v42, 2  ;;  %v3143_v22 = vclz %v4221_v23  ;;  %v3341_v46 = vadd.s32 1, %v7417_v18 }
 0x3f8   : > { %v2968_v26 = vsel %vm2966_vm11, %v2967_v43, %v4570_v48  ;;  %v3498_v63 = vand.u32 8388607, %v3491_v13  ;;  %v3501_v1 = vadd.s32 1, %v4236_v20  ;;  %v3338_v21 = vmul.u32 %v3331_v52, %v3322_v8 }
 0x3f9   : > { %v2965_v49 = vsel %vm2963_vm10, %v4568_v16, %v2964_v3  ;;  %v4222_v29 = vadd.s32 4294967294, %v3143_v22  ;;  %vm3340_vm12 = vc.u32 %v7423_v39, %v7416_v7  ;;  %v3162_v10 = vsel %vm3077_vm6, %v3161_v37, %v3137_v60 }
 0x3fa   : > { %v2969_v51 = vsel %vm2962_vm9, %v2965_v49, %v2968_v26  ;;  %v3342_v44 = vsel %vm3340_vm12, %v3341_v46, %v7417_v18  ;;  %vm3502_vm13 = vcmp.gt.s32.totalorder %v3501_v1, 0  ;;  %v7440_v6 = vmul.f32 %v4931_v53, %v7033_v41 }
 0x3fb   : > { %v2970_v11 = vsel %vm2959_vm8, nan, %v2969_v51  ;;  %vm4223_vm14 = vcmp.lt.s32.totalorder %v4222_v29, 0  ;;  %v3343_v5 = vadd.s32 %v3342_v44, %v3338_v21  ;;  %v3503_v32 = vsel %vm3502_vm13, %v3501_v1, 0 }
 0x3fc   : > { %vm7444_vm15 = vcmp.le.f32.partialorder %v3075_v57, 0.7853982  ;;  %v3146_v60 = vsel %vm4223_vm14, 0, %v4222_v29  ;;  %v3505_v33 = vand.u32 31, %v3503_v32  ;;  %4016 = vst [vmem:[%s5295_s20 + $0xa8] sm:$0xff] %v2970_v11  ;;  %v3131_v28 = vadd.s32 %v7353_v27, %v7350_v9 }
 0x3fd   : > { %v3147_v61 = vsub.s32 32, %v3146_v60  ;;  %v3151_v14 = vsub.s32 4294967266, %v3146_v60  ;;  %v3344_v54 = vadd.s32 536870912, %v3343_v5  ;;  %v7453_v15 = vadd.f32 %v7393_v40, %v5309_v58 }
 0x3fe   : > { %v3164_v53 = vsel %vm7444_vm15, 0, %v3162_v10  ;;  %v3499_v41 = vor.u32 8388608, %v3498_v63  ;;  %v3506_v57 = vsub.s32 32, %v3505_v33  ;;  %v3148_v0 = vshll.u32 %v7401_v12, %v3146_v60 }
 0x3ff   : > { %v3149_v56 = vshrl.u32 %v3131_v28, %v3147_v61  ;;  %v3152_v62 = vadd.s32 127, %v3151_v14  ;;  %v3345_v52 = vshrl.u32 %v3344_v54, 30  ;;  %v3508_v17 = vshll.u32 %v7786_v4, %v3505_v33 }
 0x400   : > { %v3509_v9 = vshrl.u32 %v7765_v35, %v3506_v57  ;;  %v3512_v27 = vshrl.u32 %v7766_v30, %v3506_v57  ;;  %v3515_v34 = vshrl.u32 %v7785_v45, %v3506_v57  ;;  %v3511_v47 = vshll.u32 %v7765_v35, %v3505_v33 }
 0x401   : > { %v3150_v58 = vor.u32 %v3149_v56, %v3148_v0  ;;  %v3153_v40 = vshll.u32 %v3152_v62, 23  ;;  %v3346_v31 = vshll.u32 %v3345_v52, 30  ;;  %v3504_v50 = vshrl.u32 %v3503_v32, 5 }
 0x402   : > { %v3514_v18 = vshll.u32 %v7766_v30, %v3505_v33  ;;  %v3517_v12 = vshll.u32 %v7785_v45, %v3505_v33  ;;  %v3518_v16 = vshrl.u32 %v4696_v55, %v3506_v57  ;;  %v3510_v48 = vor.u32 %v3509_v9, %v3508_v17 }
 0x403   : > { %v3154_v23 = vor.u32 4788187, %v3153_v40  ;;  %v7466_v36 = vsub.s32 %v3343_v5, %v3346_v31  ;;  %v3513_v43 = vor.u32 %v3512_v27, %v3511_v47  ;;  %vm3285_vm0 = vcmp.lt.s32.totalorder %v7263_v2, 0 }
 0x404   : > { %v3516_v37 = vor.u32 %v3515_v34, %v3514_v18  ;;  %v3519_v8 = vor.u32 %v3518_v16, %v3517_v12  ;;  %v3520_v20 = vshll.u32 %v4696_v55, %v3505_v33  ;;  %v3521_v3 = vshrl.u32 %v7768_v24, %v3506_v57 }
 0x405   : > { %v3155_v22 = vand.u32 2147483647, %v3154_v23  ;;  %v3157_v26 = vcvt.s32.f32 %v3150_v58  ;;  %v3168_v46 = vadd.s32 3, %v3164_v53  ;;  %v3349_v63 = vsub.s32 0, %v7466_v36 }
 0x406   : > { %v3339_v1 = vadd.s32 %v7416_v7, %v7423_v39  ;;  %v3507_v49 = vshrl.u32 %v7786_v4, %v3506_v57  ;;  %v3522_v29 = vor.u32 %v3521_v3, %v3520_v20  ;;  %v3539_v21 = vshll.u32 %v3499_v41, 8 }
 0x407   : > { %v3158_v51 = vmul.f32 %v3157_v26, %v3155_v22  ;;  %v4229_v10 = vmin.u32 %v3349_v63, %v7466_v36  ;;  %vm3523_vm2 = vcmp.lt.s32.totalorder %v3504_v50, 1  ;;  %vm3526_vm5 = vcmp.lt.s32.totalorder %v3504_v50, 4 }
 0x408   : > { %v3369_v44 = vsub.s32 4, %v3345_v52  ;;  %v3528_v11 = vsel %vm3526_vm5, %v3516_v37, 2102212464  ;;  %v3531_v5 = vsel %vm3523_vm2, %v3510_v48, %v3513_v43  ;;  %v3532_v32 = vsel %vm3526_vm5, %v3519_v8, 920167782 }
 0x409   : > { %v3159_v60 = vxor.u32 2147483648, %v3158_v51  ;;  %v3351_v33 = vclz %v4229_v10  ;;  %vm3524_vm1 = vcmp.lt.s32.totalorder %v3504_v50, 2  ;;  %vm3525_vm3 = vcmp.lt.s32.totalorder %v3504_v50, 3 }
 0x40a   : > { %v3527_v28 = vsel %vm3523_vm2, %v3507_v49, %v3510_v48  ;;  %v3533_v61 = vsel %vm3525_vm3, %v3516_v37, %v3532_v32  ;;  %v3535_v7 = vsel %vm3523_vm2, %v3513_v43, %v3516_v37  ;;  %v3536_v39 = vsel %vm3526_vm5, %v3522_v29, 1326507024 }
 0x40b   : > { %v3160_v14 = vsel %vm3077_vm6, %v3159_v60, %v3158_v51  ;;  %v4230_v54 = vadd.s32 4294967294, %v3351_v33  ;;  %v3529_v53 = vsel %vm3525_vm3, %v3513_v43, %v3528_v11  ;;  %v3534_v41 = vsel %vm3524_vm1, %v3531_v5, %v3533_v61 }
 0x40c   : > { %v3163_v57 = vsel %vm7444_vm15, %v7193_v25, %v3160_v14  ;;  %v3537_v0 = vsel %vm3525_vm3, %v3519_v8, %v3536_v39  ;;  %v7482_v56 = vmul.u32.u64.low %v3539_v21, %v3534_v41  ;;  %v7483_v62 = vmul.u32.u64.high %v3539_v21, %v3534_v41, %v7482_v56 }
 0x40d   : > { %4571 = vcosq.f32 %v3163_v57  ;;  %vm4231_vm4 = vcmp.lt.s32.totalorder %v4230_v54, 0  ;;  %v3370_v17 = vsel %vm3285_vm0, %v3369_v44, %v3345_v52  ;;  %v3538_v9 = vsel %vm3524_vm1, %v3535_v7, %v3537_v0 }
 0x40e   : > { %4573 = vsinq.f32 %v3163_v57  ;;  %v3354_v27 = vsel %vm4231_vm4, 0, %v4230_v54  ;;  %v7488_v34 = vmul.u32.u64.low %v3539_v21, %v3538_v9  ;;  %v7489_v58 = vmul.u32.u64.high %v3539_v21, %v3538_v9, %v7488_v34 }
 0x40f   : > { %v3355_v40 = vsub.s32 32, %v3354_v27  ;;  %v3359_v31 = vsub.s32 4294967266, %v3354_v27  ;;  %v3530_v42 = vsel %vm3524_vm1, %v3527_v28, %v3529_v53  ;;  %v3702_v47 = vand.u32 2139095040, %v7453_v15 }
 0x410   : > { %v7495_v18 = vadd.f32 %v7440_v6, %v5464_v19  ;;  %vm7499_vm6 = vcmp.le.f32.partialorder %v3283_v38, 0.7853982  ;;  %v3549_v12 = vadd.s32 1, %v7483_v62  ;;  %v3356_v16 = vshll.u32 %v7466_v36, %v3354_v27 }
 0x411   : > { %v3357_v23 = vshrl.u32 %v3339_v1, %v3355_v40  ;;  %v3360_v48 = vadd.s32 127, %v3359_v31  ;;  %v3703_v50 = vshrl.u32 %v3702_v47, 23  ;;  %v3169_v43 = vand.u32 3, %v3168_v46 }
 0x412   : > { %v3372_v37 = vsel %vm7499_vm6, 0, %v3370_v17  ;;  %v3546_v8 = vmul.u32 %v3539_v21, %v3530_v42  ;;  %vm3548_vm7 = vc.u32 %v7489_v58, %v7482_v56  ;;  %v3699_v22 = vand.u32 2147483647, %v7453_v15 }
 0x413   : > { %v3358_v19 = vor.u32 %v3357_v23, %v3356_v16  ;;  %v3361_v6 = vshll.u32 %v3360_v48, 23  ;;  %v3550_v38 = vsel %vm3548_vm7, %v3549_v12, %v7483_v62  ;;  %v4244_v20 = vadd.s32 4294967169, %v3703_v50 }
 0x414   : > { %v3551_v3 = vadd.s32 %v3550_v38, %v3546_v8  ;;  %v3910_v63 = vand.u32 2139095040, %v7495_v18  ;;  %vm3167_vm8 = vweird.f32 %v7193_v25  ;;  %vm3170_vm9 = vcmp.lt.s32.totalorder %v3169_v43, 2 }
 0x415   : > { %v3362_v26 = vor.u32 4788187, %v3361_v6  ;;  %v3709_v36 = vadd.s32 1, %v4244_v20  ;;  %v3376_v46 = vadd.s32 3, %v3372_v37  ;;  %vm3174_vm10 = vcmp.eq.s32.totalorder %v3169_v43, 2 }
 0x416   : > { %v3552_v1 = vadd.s32 536870912, %v3551_v3  ;;  %v3365_v21 = vcvt.s32.f32 %v3358_v19  ;;  %v3706_v11 = vand.u32 8388607, %v3699_v22  ;;  %v3911_v28 = vshrl.u32 %v3910_v63, 23 }
 0x417   : > { %v4572_v49 = vpop.eup %4571  ;;  %v3363_v29 = vand.u32 2147483647, %v3362_v26  ;;  %vm3710_vm11 = vcmp.gt.s32.totalorder %v3709_v36, 0  ;;  %vm3171_vm12 = vcmp.eq.s32.totalorder %v3169_v43, 0  ;;  %v7516_v7 = vand.u32 3, %v3376_v46 }
 0x418   : > { %v4574_v51 = vpop.eup %4573  ;;  %v3175_v10 = vxor.u32 2147483648, %v4572_v49  ;;  %v7512_v44 = vshrl.u32 %v3552_v1, 30  ;;  %v3711_v5 = vsel %vm3710_vm11, %v3709_v36, 0  ;;  %v3907_v41 = vand.u32 2147483647, %v7495_v18 }
 0x419   : > { %v3172_v32 = vxor.u32 2147483648, %v4574_v51  ;;  %v3366_v60 = vmul.f32 %v3365_v21, %v3363_v29  ;;  %v3713_v33 = vand.u32 31, %v3711_v5  ;;  %v7522_v0 = vadd.s32 %v7482_v56, %v7489_v58 }
 0x41a   : > { %v3176_v61 = vsel %vm3174_vm10, %v3175_v10, %v4574_v51  ;;  %v3554_v39 = vshll.u32 %v7512_v44, 30  ;;  %v3707_v17 = vor.u32 8388608, %v3706_v11  ;;  %v4252_v40 = vadd.s32 4294967169, %v3911_v28 }
 0x41b   : > { %v3173_v14 = vsel %vm3171_vm12, %v4572_v49, %v3172_v32  ;;  %v3367_v54 = vxor.u32 2147483648, %v3366_v60  ;;  %v3714_v53 = vsub.s32 32, %v3713_v33  ;;  %v3716_v34 = vshll.u32 %v7786_v4, %v3713_v33 }
 0x41c   : > { %v3177_v57 = vsel %vm3170_vm9, %v3173_v14, %v3176_v61  ;;  %v7524_v62 = vsub.s32 %v3551_v3, %v3554_v39  ;;  %v3719_v58 = vshll.u32 %v7765_v35, %v3713_v33  ;;  %v3722_v47 = vshll.u32 %v7766_v30, %v3713_v33 }
 0x41d   : > { %v3178_v9 = vsel %vm3167_vm8, nan, %v3177_v57  ;;  %v3368_v27 = vsel %vm3285_vm0, %v3367_v54, %v3366_v60  ;;  %v3717_v56 = vshrl.u32 %v7765_v35, %v3714_v53  ;;  %v3720_v25 = vshrl.u32 %v7766_v30, %v3714_v53 }
 0x41e   : > { %v3371_v31 = vsel %vm7499_vm6, %v7263_v2, %v3368_v27  ;;  %v3557_v42 = vsub.s32 0, %v7524_v62  ;;  %4018 = vst [vmem:[%s5295_s20 + $0xb8] sm:$0xff] %v3178_v9  ;;  %v3723_v12 = vshrl.u32 %v7785_v45, %v3714_v53  ;;  %v3712_v23 = vshrl.u32 %v3711_v5, 5 }
 0x41f   : > { %4575 = vcosq.f32 %v3371_v31  ;;  %v3718_v52 = vor.u32 %v3717_v56, %v3716_v34  ;;  %v3721_v48 = vor.u32 %v3720_v25, %v3719_v58  ;;  %v3725_v43 = vshll.u32 %v7785_v45, %v3713_v33 }
 0x420   : > { %4577 = vsinq.f32 %v3371_v31  ;;  %v4237_v16 = vmin.u32 %v3557_v42, %v7524_v62  ;;  %v3724_v50 = vor.u32 %v3723_v12, %v3722_v47  ;;  %v3726_v37 = vshrl.u32 %v4696_v55, %v3714_v53 }
 0x421   : > { %v3577_v19 = vsub.s32 4, %v7512_v44  ;;  %v7545_v6 = vshll.u32 %v3707_v17, 8  ;;  %v3917_v38 = vadd.s32 1, %v4252_v40  ;;  %vm3382_vm13 = vcmp.eq.s32.totalorder %v7516_v7, 2 }
 0x422   : > { %v3559_v8 = vclz %v4237_v16  ;;  %v3715_v20 = vshrl.u32 %v7786_v4, %v3714_v53  ;;  %v3727_v3 = vor.u32 %v3726_v37, %v3725_v43  ;;  %v3728_v26 = vshll.u32 %v4696_v55, %v3713_v33 }
 0x423   : > { %v3729_v36 = vshrl.u32 %v7768_v24, %v3714_v53  ;;  %vm3379_vm14 = vcmp.eq.s32.totalorder %v7516_v7, 0  ;;  %vm3493_vm15 = vcmp.lt.s32.totalorder %v7279_v59, 0  ;;  %vm3731_vm0 = vcmp.lt.s32.totalorder %v3712_v23, 1 }
 0x424   : > { %v4238_v63 = vadd.s32 4294967294, %v3559_v8  ;;  %vm3733_vm2 = vcmp.lt.s32.totalorder %v3712_v23, 3  ;;  %vm3734_vm5 = vcmp.lt.s32.totalorder %v3712_v23, 4  ;;  %vm3378_vm1 = vcmp.lt.s32.totalorder %v7516_v7, 2 }
 0x425   : > { %v3730_v46 = vor.u32 %v3729_v36, %v3728_v26  ;;  %v3735_v1 = vsel %vm3731_vm0, %v3715_v20, %v3718_v52  ;;  %v3736_v49 = vsel %vm3734_vm5, %v3724_v50, 2102212464  ;;  %v3739_v29 = vsel %vm3731_vm0, %v3718_v52, %v3721_v48 }
 0x426   : > { %vm3375_vm3 = vweird.f32 %v7263_v2  ;;  %vm4239_vm4 = vcmp.lt.s32.totalorder %v4238_v63, 0  ;;  %vm3732_vm6 = vcmp.lt.s32.totalorder %v3712_v23, 2  ;;  %v3737_v21 = vsel %vm3733_vm2, %v3721_v48, %v3736_v49 }
 0x427   : > { %v3740_v51 = vsel %vm3734_vm5, %v3727_v3, 920167782  ;;  %v3562_v10 = vsel %vm4239_vm4, 0, %v4238_v63  ;;  %v3743_v5 = vsel %vm3731_vm0, %v3721_v48, %v3724_v50  ;;  %v3744_v32 = vsel %vm3734_vm5, %v3730_v46, 1326507024 }
 0x428   : > { %v3741_v11 = vsel %vm3733_vm2, %v3724_v50, %v3740_v51  ;;  %v3563_v60 = vsub.s32 32, %v3562_v10  ;;  %v3567_v33 = vsub.s32 4294967266, %v3562_v10  ;;  %v3738_v28 = vsel %vm3732_vm6, %v3735_v1, %v3737_v21 }
 0x429   : > { %v3742_v61 = vsel %vm3732_vm6, %v3739_v29, %v3741_v11  ;;  %v4576_v39 = vpop.eup %4575  ;;  %v3564_v14 = vshll.u32 %v7524_v62, %v3562_v10  ;;  %v3745_v54 = vsel %vm3733_vm2, %v3727_v3, %v3744_v32  ;;  %vm3918_vm7 = vcmp.gt.s32.totalorder %v3917_v38, 0 }
 0x42a   : > { %v7562_v53 = vmul.u32.u64.low %v7545_v6, %v3742_v61  ;;  %v7563_v57 = vmul.u32.u64.high %v7545_v6, %v3742_v61, %v7562_v53  ;;  %v4578_v17 = vpop.eup %4577  ;;  %v3383_v9 = vxor.u32 2147483648, %v4576_v39  ;;  %v3565_v27 = vshrl.u32 %v7522_v0, %v3563_v60 }
 0x42b   : > { %v3568_v34 = vadd.s32 127, %v3567_v33  ;;  %v3746_v40 = vsel %vm3732_vm6, %v3743_v5, %v3745_v54  ;;  %v3380_v31 = vxor.u32 2147483648, %v4578_v17  ;;  %v3919_v47 = vsel %vm3918_vm7, %v3917_v38, 0 }
 0x42c   : > { %v7569_v42 = vmul.u32.u64.low %v7545_v6, %v3746_v40  ;;  %v7570_v56 = vmul.u32.u64.high %v7545_v6, %v3746_v40, %v7569_v42  ;;  %v3384_v62 = vsel %vm3382_vm13, %v3383_v9, %v4578_v17  ;;  %v3566_v58 = vor.u32 %v3565_v27, %v3564_v14 }
 0x42d   : > { %v3569_v25 = vshll.u32 %v3568_v34, 23  ;;  %v3381_v12 = vsel %vm3379_vm14, %v4576_v39, %v3380_v31  ;;  %v3578_v0 = vsel %vm3493_vm15, %v3577_v19, %v7512_v44  ;;  %v3757_v16 = vadd.s32 1, %v7563_v57 }
 0x42e   : > { %v3921_v23 = vand.u32 31, %v3919_v47  ;;  %v3385_v52 = vsel %vm3378_vm1, %v3381_v12, %v3384_v62  ;;  %vm7584_vm8 = vcmp.le.f32.partialorder %v3491_v13, 0.7853982  ;;  %v3914_v43 = vand.u32 8388607, %v3907_v41 }
 0x42f   : > { %v3570_v50 = vor.u32 4788187, %v3569_v25  ;;  %v3386_v37 = vsel %vm3375_vm3, nan, %v3385_v52  ;;  %v3754_v44 = vmul.u32 %v7545_v6, %v3738_v28  ;;  %vm3756_vm9 = vc.u32 %v7570_v56, %v7562_v53 }
 0x430   : > { %v3922_v7 = vsub.s32 32, %v3921_v23  ;;  %v3573_v19 = vcvt.s32.f32 %v3566_v58  ;;  %v3580_v13 = vsel %vm7584_vm8, 0, %v3578_v0  ;;  %v3758_v38 = vsel %vm3756_vm9, %v3757_v16, %v7563_v57  ;;  %4020 = vst [vmem:[%s5295_s20 + $0xc8] sm:$0xff] %v3386_v37 }
 0x431   : > { %v3571_v8 = vand.u32 2147483647, %v3570_v50  ;;  %v3759_v20 = vadd.s32 %v3758_v38, %v3754_v44  ;;  %v3920_v3 = vshrl.u32 %v3919_v47, 5  ;;  %v3924_v6 = vshll.u32 %v7786_v4, %v3921_v23 }
 0x432   : > { %v3925_v26 = vshrl.u32 %v7765_v35, %v3922_v7  ;;  %v3928_v2 = vshrl.u32 %v7766_v30, %v3922_v7  ;;  %v3927_v63 = vshll.u32 %v7765_v35, %v3921_v23  ;;  %v3931_v46 = vshrl.u32 %v7785_v45, %v3922_v7 }
 0x433   : > { %v3574_v36 = vmul.f32 %v3573_v19, %v3571_v8  ;;  %v3760_v1 = vadd.s32 536870912, %v3759_v20  ;;  %v3930_v49 = vshll.u32 %v7766_v30, %v3921_v23  ;;  %v3933_v29 = vshll.u32 %v7785_v45, %v3921_v23 }
 0x434   : > { %v3934_v21 = vshrl.u32 %v4696_v55, %v3922_v7  ;;  %v3926_v10 = vor.u32 %v3925_v26, %v3924_v6  ;;  %v3929_v11 = vor.u32 %v3928_v2, %v3927_v63  ;;  %v3937_v5 = vshrl.u32 %v7768_v24, %v3922_v7 }
 0x435   : > { %v3575_v51 = vxor.u32 2147483648, %v3574_v36  ;;  %v7608_v32 = vshrl.u32 %v3760_v1, 30  ;;  %v3932_v60 = vor.u32 %v3931_v46, %v3930_v49  ;;  %v3936_v35 = vshll.u32 %v4696_v55, %v3921_v23 }
 0x436   : > { %v3935_v33 = vor.u32 %v3934_v21, %v3933_v29  ;;  %v3584_v61 = vadd.s32 3, %v3580_v13  ;;  %v3915_v30 = vor.u32 8388608, %v3914_v43  ;;  %vm3939_vm10 = vcmp.lt.s32.totalorder %v3920_v3, 1 }
 0x437   : > { %v3576_v28 = vsel %vm3493_vm15, %v3575_v51, %v3574_v36  ;;  %v3762_v39 = vshll.u32 %v7608_v32, 30  ;;  %v3938_v14 = vor.u32 %v3937_v5, %v3936_v35  ;;  %vm3942_vm11 = vcmp.lt.s32.totalorder %v3920_v3, 4 }
 0x438   : > { %v3579_v45 = vsel %vm7584_vm8, %v7279_v59, %v3576_v28  ;;  %v3923_v24 = vshrl.u32 %v7786_v4, %v3922_v7  ;;  %v3947_v54 = vsel %vm3939_vm10, %v3926_v10, %v3929_v11  ;;  %v3948_v55 = vsel %vm3942_vm11, %v3935_v33, 920167782 }
 0x439   : > { %4579 = vcosq.f32 %v3579_v45  ;;  %v3763_v57 = vsub.s32 %v3759_v20, %v3762_v39  ;;  %vm3941_vm12 = vcmp.lt.s32.totalorder %v3920_v3, 3  ;;  %v3944_v17 = vsel %vm3942_vm11, %v3932_v60, 2102212464 }
 0x43a   : > { %4581 = vsinq.f32 %v3579_v45  ;;  %vm3940_vm13 = vcmp.lt.s32.totalorder %v3920_v3, 2  ;;  %v3949_v9 = vsel %vm3941_vm12, %v3932_v60, %v3948_v55  ;;  %v3951_v27 = vsel %vm3939_vm10, %v3929_v11, %v3932_v60 }
 0x43b   : > { %v3955_v34 = vshll.u32 %v3915_v30, 8  ;;  %v3765_v40 = vsub.s32 0, %v3763_v57  ;;  %v3943_v31 = vsel %vm3939_vm10, %v3923_v24, %v3926_v10  ;;  %v3950_v42 = vsel %vm3940_vm13, %v3947_v54, %v3949_v9 }
 0x43c   : > { %v3952_v4 = vsel %vm3942_vm11, %v3938_v14, 1326507024  ;;  %v3945_v62 = vsel %vm3941_vm12, %v3929_v11, %v3944_v17  ;;  %v3585_v52 = vand.u32 3, %v3584_v61  ;;  %v3755_v3 = vadd.s32 %v7562_v53, %v7570_v56 }
 0x43d   : > { %v3953_v58 = vsel %vm3941_vm12, %v3935_v33, %v3952_v4  ;;  %v7625_v25 = vmul.u32.u64.low %v3955_v34, %v3950_v42  ;;  %v7626_v47 = vmul.u32.u64.high %v3955_v34, %v3950_v42, %v7625_v25  ;;  %v4245_v12 = vmin.u32 %v3765_v40, %v3763_v57 }
 0x43e   : > { %v3954_v0 = vsel %vm3940_vm13, %v3951_v27, %v3953_v58  ;;  %v3946_v50 = vsel %vm3940_vm13, %v3943_v31, %v3945_v62  ;;  %vm3587_vm15 = vcmp.eq.s32.totalorder %v3585_v52, 0  ;;  %vm3590_vm2 = vcmp.eq.s32.totalorder %v3585_v52, 2 }
 0x43f   : > { %v7629_v16 = vmul.u32.u64.low %v3955_v34, %v3954_v0  ;;  %v7630_v23 = vmul.u32.u64.high %v3955_v34, %v3954_v0, %v7629_v16  ;;  %v3767_v48 = vclz %v4245_v12  ;;  %v3965_v43 = vadd.s32 1, %v7626_v47 }
 0x440   : > { %v3962_v7 = vmul.u32 %v3955_v34, %v3946_v50  ;;  %vm3583_vm5 = vweird.f32 %v7279_v59  ;;  %vm3586_vm1 = vcmp.lt.s32.totalorder %v3585_v52, 2  ;;  %v3785_v59 = vsub.s32 4, %v7608_v32 }
 0x441   : > { %v4246_v37 = vadd.s32 4294967294, %v3767_v48  ;;  %vm3964_vm14 = vc.u32 %v7630_v23, %v7625_v25  ;;  %vm3701_vm3 = vcmp.lt.s32.totalorder %v7453_v15, 0  ;;  %vm3700_vm4 = vcmp.le.f32.partialorder %v3699_v22, 0.7853982 }
 0x442   : > { %v3966_v13 = vsel %vm3964_vm14, %v3965_v43, %v7626_v47  ;;  %v3786_v24 = vsel %vm3701_vm3, %v3785_v59, %v7608_v32  ;;  %v3963_v9 = vadd.s32 %v7625_v25, %v7630_v23  ;;  %vm3791_vm10 = vweird.f32 %v7453_v15 }
 0x443   : > { %v4580_v44 = vpop.eup %4579  ;;  %vm4247_vm0 = vcmp.lt.s32.totalorder %v4246_v37, 0  ;;  %v3967_v26 = vadd.s32 %v3966_v13, %v3962_v7  ;;  %vm3909_vm11 = vcmp.lt.s32.totalorder %v7495_v18, 0  ;;  %vm3908_vm12 = vcmp.le.f32.partialorder %v3907_v41, 0.7853982 }
 0x444   : > { %v4582_v8 = vpop.eup %4581  ;;  %v3591_v19 = vxor.u32 2147483648, %v4580_v44  ;;  %v3770_v20 = vsel %vm4247_vm0, 0, %v4246_v37  ;;  %vm3999_vm0 = vweird.f32 %v7495_v18 }
 0x445   : > { %v3588_v38 = vxor.u32 2147483648, %v4582_v8  ;;  %v3771_v36 = vsub.s32 32, %v3770_v20  ;;  %v3775_v6 = vsub.s32 4294967266, %v3770_v20  ;;  %v3968_v46 = vadd.s32 536870912, %v3967_v26 }
 0x446   : > { %v3592_v2 = vsel %vm3590_vm2, %v3591_v19, %v4582_v8  ;;  %v3772_v49 = vshll.u32 %v3763_v57, %v3770_v20  ;;  %v3788_v57 = vsel %vm3700_vm4, 0, %v3786_v24 }
 0x447   : > { %v3589_v63 = vsel %vm3587_vm15, %v4580_v44, %v3588_v38  ;;  %v3773_v29 = vshrl.u32 %v3755_v3, %v3771_v36  ;;  %v3776_v21 = vadd.s32 127, %v3775_v6  ;;  %v3969_v10 = vshrl.u32 %v3968_v46, 30 }
 0x448   : > { %v3593_v1 = vsel %vm3586_vm1, %v3589_v63, %v3592_v2  ;;  %v3792_v40 = vadd.s32 3, %v3788_v57 }
 0x449   : > { %v3594_v51 = vsel %vm3583_vm5, nan, %v3593_v1  ;;  %v3774_v11 = vor.u32 %v3773_v29, %v3772_v49  ;;  %v3777_v5 = vshll.u32 %v3776_v21, 23  ;;  %v3970_v60 = vshll.u32 %v3969_v10, 30 }
 0x44a   : > { %4022 = vst [vmem:[%s5295_s20 + $0xd8] sm:$0xff] %v3594_v51  ;;  %v3793_v58 = vand.u32 3, %v3792_v40  ;;  %v3993_v50 = vsub.s32 4, %v3969_v10 }
 0x44b   : > { %v3778_v33 = vor.u32 4788187, %v3777_v5  ;;  %v3971_v35 = vsub.s32 %v3967_v26, %v3970_v60  ;;  %v3781_v56 = vcvt.s32.f32 %v3774_v11 }
 0x44c   : > { %vm3798_vm7 = vcmp.eq.s32.totalorder %v3793_v58, 2  ;;  %vm3795_vm8 = vcmp.eq.s32.totalorder %v3793_v58, 0  ;;  %vm3794_vm9 = vcmp.lt.s32.totalorder %v3793_v58, 2  ;;  %v3994_v19 = vsel %vm3909_vm11, %v3993_v50, %v3969_v10 }
 0x44d   : > { %v3779_v53 = vand.u32 2147483647, %v3778_v33  ;;  %v3973_v28 = vsub.s32 0, %v3971_v35  ;;  %v3996_v38 = vsel %vm3908_vm12, 0, %v3994_v19 }
 0x44e   : > { %v4000_v20 = vadd.s32 3, %v3996_v38 }
 0x44f   : > { %v3782_v61 = vmul.f32 %v3781_v56, %v3779_v53  ;;  %v4253_v30 = vmin.u32 %v3973_v28, %v3971_v35 }
 0x451   : > { %v3783_v45 = vxor.u32 2147483648, %v3782_v61  ;;  %v3975_v39 = vclz %v4253_v30 }
 0x453   : > { %v3784_v14 = vsel %vm3701_vm3, %v3783_v45, %v3782_v61  ;;  %v4254_v55 = vadd.s32 4294967294, %v3975_v39 }
 0x454   : > { %v3787_v54 = vsel %vm3700_vm4, %v7453_v15, %v3784_v14  ;;  %v4001_v15 = vand.u32 3, %v4000_v20 }
 0x455   : > { %4583 = vcosq.f32 %v3787_v54  ;;  %vm4255_vm6 = vcmp.lt.s32.totalorder %v4254_v55, 0 }
 0x456   : > { %4585 = vsinq.f32 %v3787_v54  ;;  %v3978_v17 = vsel %vm4255_vm6, 0, %v4254_v55  ;;  %vm4006_vm13 = vcmp.eq.s32.totalorder %v4001_v15, 2  ;;  %vm4003_vm14 = vcmp.eq.s32.totalorder %v4001_v15, 0 }
 0x457   : > { %v3979_v27 = vsub.s32 32, %v3978_v17  ;;  %v3983_v34 = vsub.s32 4294967266, %v3978_v17  ;;  %v3980_v31 = vshll.u32 %v3971_v35, %v3978_v17  ;;  %vm4002_vm15 = vcmp.lt.s32.totalorder %v4001_v15, 2 }
 0x459   : > { %v3981_v42 = vshrl.u32 %v3963_v9, %v3979_v27  ;;  %v3984_v4 = vadd.s32 127, %v3983_v34 }
 0x45b   : > { %v3982_v22 = vor.u32 %v3981_v42, %v3980_v31  ;;  %v3985_v62 = vshll.u32 %v3984_v4, 23 }
 0x45d   : > { %v3986_v32 = vor.u32 4788187, %v3985_v62  ;;  %v3989_v52 = vcvt.s32.f32 %v3982_v22 }
 0x45f   : > { %v4584_v47 = vpop.eup %4583  ;;  %v3987_v16 = vand.u32 2147483647, %v3986_v32 }
 0x460   : > { %v4586_v12 = vpop.eup %4585  ;;  %v3799_v0 = vxor.u32 2147483648, %v4584_v47 }
 0x461   : > { %v3796_v48 = vxor.u32 2147483648, %v4586_v12  ;;  %v3990_v23 = vmul.f32 %v3989_v52, %v3987_v16 }
 0x462   : > { %v3800_v25 = vsel %vm3798_vm7, %v3799_v0, %v4586_v12 }
 0x463   : > { %v3797_v43 = vsel %vm3795_vm8, %v4584_v47, %v3796_v48  ;;  %v3991_v44 = vxor.u32 2147483648, %v3990_v23 }
 0x464   : > { %v3801_v37 = vsel %vm3794_vm9, %v3797_v43, %v3800_v25 }
 0x465   : > { %v3802_v7 = vsel %vm3791_vm10, nan, %v3801_v37  ;;  %v3992_v8 = vsel %vm3909_vm11, %v3991_v44, %v3990_v23 }
 0x466   : > { %4024 = vst [vmem:[%s5295_s20 + $0xe8] sm:$0xff] %v3802_v7  ;;  %v3995_v13 = vsel %vm3908_vm12, %v7495_v18, %v3992_v8 }
 0x467   : > { %4587 = vcosq.f32 %v3995_v13 }
 0x468   : > { %4589 = vsinq.f32 %v3995_v13 }
 0x471   : > { %v4588_v26 = vpop.eup %4587 }
 0x472   : > { %v4590_v2 = vpop.eup %4589  ;;  %v4007_v3 = vxor.u32 2147483648, %v4588_v26 }
 0x473   : > { %v4004_v36 = vxor.u32 2147483648, %v4590_v2 }
 0x474   : > { %v4008_v41 = vsel %vm4006_vm13, %v4007_v3, %v4590_v2 }
 0x475   : > { %v4005_v6 = vsel %vm4003_vm14, %v4588_v26, %v4004_v36 }
 0x476   : > { %v4009_v63 = vsel %vm4002_vm15, %v4005_v6, %v4008_v41 }
 0x477   : > { %v4010_v46 = vsel %vm3999_vm0, nan, %v4009_v63 }
 0x478   : > { %4026 = vst [vmem:[%s5295_s20 + $0xf8] sm:$0xff] %v4010_v46 }
 0x479   : > { %4632 = shalt.err (!%p4629_p7)
}
 0x47a   : > { %s4633_s18 = scalar_lea.hbm %s7658_s14, 4096  ;;  %s4637_s23 = scalar_lea.hbm %s7714_s7, 8192 }
 0x47b   : > { %p4634_p8 = scmp.ne.s32.totalorder %s7658_s14, %s4633_s18  ;;  %p4638_p1 = scmp.lt.u32.totalorder %s7658_s14, %s7714_s7 }
 0x47c   : > { %p4639_p0 = scmp.lt.u32.totalorder %s4637_s23, %s4633_s18  ;;  %p4641_p6 = scmp.lt.u32.totalorder %s4633_s18, %s7658_s14 }
 0x47d   : > { %p4635_p11 = pnand %p4634_p8, %p7848_p9 }
 0x47e   : > { %p4640_p5 = por %p4639_p0, %p4638_p1 }
 0x47f   : > { %p4636_p13 = pneg %p4635_p11 }
 0x480   : > { %p4642_p10 = por %p4641_p6, %p4640_p5 }
 0x482   : > { %p4643_p12 = pnand %p4642_p10, %p4636_p13 }
 0x484   : > { %4646 = shalt.err (!%p4643_p12)
}
 0x485   : > { %s4699_s9 = smov 256   ;;  %s4700_s15 = smov 16  }
 0x486   : > { %4403 = dma.vmem_to_hbm [thread:$0]  (%p7848_p9), %s7660_s8, 4096, %s7658_s14, %s7666_s28, %s4699_s9, %s4699_s9, %s4700_s15  }
 0x487 PF: > { %p4415_p2 = scmp.ge.s32.totalorder %s4685_s27, 2  ;;  %s4056_s17 = sand.u32 1, %s4673_s24  }
 0x488   : > { %p7849_p3 = scmp.ne.s32.totalorder %s7749_s12, 0  ;;  %s4057_s16 = scalar_lea.sflag [#allocation4], %s4056_s17 }
 0x48a   : > { %p4410_p4 = pnand %p4415_p2, %p7849_p3 }
 0x48c   : > { %4668 = dma.done.wait (!%p4410_p4), %s4057_s16, 4096  }
 0x48d   : > { %4670 = vsyncadd (!%p4410_p4), %s4057_s16, 4294963200  ;;  %p18_p7 = scmp.ge.s32.totalorder %s4766_s30, 4   ;;  %s7850_s24 = smov %s4677_s25 }
 0x48e   : > { %s7851_s25 = smov %s4681_s26  ;;  %s7852_s26 = smov %s4777_s10 }
 0x48f   : > { %s7853_s27 = smov %s4766_s30  ;;  %20 = sbr.rel (!%p18_p7) target bundleno = 4 (0x4), region = 88 }
 0x496   :  { %4062 = vsyncpa [#allocation3], 1 }
 0x497   :  { %4064 = vsyncpa [#allocation3 + $0x1], 1 }
 0x498   :  { %4065 = vsyncpa [#allocation4], 1 }
 0x499   :  { %4067 = vsyncpa [#allocation4 + $0x1], 1 }

</bundles_post_ra>
